<compile_context>
chip_gen: v5e
topology: v5e:2x2
jax: 0.10.0
libtpu: 0.0.40
codegen_flags: <defaults>
</compile_context>

<pallas_src>
import functools

import jax
import jax.numpy as jnp
from jax.experimental import pallas as pl
from jax.experimental.pallas import tpu as pltpu

# ----------------------------- config (synthetic) -----------------------------
NUM_CLASSES = 8
CENTER_VARIANCE = 0.1
SIZE_VARIANCE = 0.2
# (Cin, H, W, boxes_per_location) per feature level
LEVELS = [(4, 16, 16, 4), (8, 8, 8, 6)]
BATCH = 2


# ----------------------------- Pallas kernels ---------------------------------
def _conv3x3_fused_kernel(x_ref, w_ref, b_ref, o_ref):
    """Fused reg+cls 3x3 stride-1 'same' conv for one batch element.

    One im2col matmul (K = 9*Cin) with a lane-dense (Cout, H*W) output.

    x_ref: (1, H+2, W+2, Cin)  zero-padded NHWC input tile
    w_ref: (Cout, 9*Cin)       rows = fused out-channels, cols = (kh, kw, cin)
    b_ref: (Cout, 1)
    o_ref: (1, Cout, H*W)      H*W on the lane axis
    """
    Cin = x_ref.shape[3]
    H = x_ref.shape[1] - 2
    W = x_ref.shape[2] - 2

    x = x_ref[0]  # (H+2, W+2, Cin)
    patches = []
    for kh in range(3):
        for kw in range(3):
            patches.append(x[kh:kh + H, kw:kw + W, :].reshape(H * W, Cin))
    p = jnp.concatenate(patches, axis=-1)          # (H*W, 9*Cin)

    # (Cout, 9Cin) contracted with (H*W, 9Cin) on the last dims -> (Cout, H*W).
    acc = jax.lax.dot_general(
        w_ref[...], p,
        dimension_numbers=(((1,), (1,)), ((), ())),
        preferred_element_type=jnp.float32)
    acc = acc + b_ref[...]                         # (Cout, 1) lane-broadcast
    o_ref[0] = acc.astype(o_ref.dtype)


def conv3x3_fused(x_nhwc_padded, w_flat, b_col, H, W):
    """x_nhwc_padded: (N, H+2, W+2, Cin); w_flat: (Cout, 9*Cin); b_col: (Cout, 1)."""
    N = x_nhwc_padded.shape[0]
    Cin = x_nhwc_padded.shape[3]
    Cout = w_flat.shape[0]
    return pl.pallas_call(
        _conv3x3_fused_kernel,
        out_shape=jax.ShapeDtypeStruct((N, Cout, H * W), x_nhwc_padded.dtype),
        grid=(N,),
        in_specs=[
            pl.BlockSpec((1, H + 2, W + 2, Cin), lambda n: (n, 0, 0, 0)),
            pl.BlockSpec((Cout, 9 * Cin), lambda n: (0, 0)),
            pl.BlockSpec((Cout, 1), lambda n: (0, 0)),
        ],
        out_specs=pl.BlockSpec((1, Cout, H * W), lambda n: (n, 0, 0)),
        compiler_params=pltpu.CompilerParams(
            dimension_semantics=("parallel",)),
    )(x_nhwc_padded, w_flat, b_col)


def _postprocess_kernel(loc_ref, conf_ref, prior_ref, scores_ref, boxes_ref,
                        *, center_variance, size_variance):
    """Softmax over classes + box decode + center->corner, one batch element.

    Transposed layout: P (=1408, multiple of 128) is the lane axis.

    loc_ref:   (1, 4, P)
    conf_ref:  (1, C, P)
    prior_ref: (4, P)   center form rows (cx, cy, w, h)
    scores_ref:(1, C, P)
    boxes_ref: (1, 4, P) corner form rows (xmin, ymin, xmax, ymax)
    """
    conf = conf_ref[0].astype(jnp.float32)          # (C, P)
    m = jnp.max(conf, axis=0, keepdims=True)        # (1, P) sublane reduce
    e = jnp.exp(conf - m)
    denom = jnp.sum(e, axis=0, keepdims=True)       # (1, P)
    scores_ref[0] = (e * pl.reciprocal(denom, approx=True)).astype(
        scores_ref.dtype)

    loc = loc_ref[0].astype(jnp.float32)            # (4, P)
    pri = prior_ref[...].astype(jnp.float32)        # (4, P)
    p_xy = pri[0:2, :]
    p_wh = pri[2:4, :]
    center = loc[0:2, :] * center_variance * p_wh + p_xy
    half = jnp.exp(loc[2:4, :] * size_variance) * p_wh * 0.5
    boxes_ref[0] = jnp.concatenate([center - half, center + half],
                                   axis=0).astype(boxes_ref.dtype)


def postprocess(loc_t, conf_t, priors_t):
    """loc_t: (N, 4, P), conf_t: (N, C, P), priors_t: (4, P)."""
    N, _, P = loc_t.shape
    C = conf_t.shape[1]
    kernel = functools.partial(_postprocess_kernel,
                               center_variance=CENTER_VARIANCE,
                               size_variance=SIZE_VARIANCE)
    return pl.pallas_call(
        kernel,
        out_shape=(jax.ShapeDtypeStruct((N, C, P), jnp.float32),
                   jax.ShapeDtypeStruct((N, 4, P), jnp.float32)),
        grid=(N,),
        in_specs=[
            pl.BlockSpec((1, 4, P), lambda n: (n, 0, 0)),
            pl.BlockSpec((1, C, P), lambda n: (n, 0, 0)),
            pl.BlockSpec((4, P), lambda n: (0, 0)),
        ],
        out_specs=(
            pl.BlockSpec((1, C, P), lambda n: (n, 0, 0)),
            pl.BlockSpec((1, 4, P), lambda n: (n, 0, 0)),
        ),
        compiler_params=pltpu.CompilerParams(
            dimension_semantics=("parallel",)),
    )(loc_t, conf_t, priors_t)


# ----------------------------- glue / module ----------------------------------
def make_params(key):
    params = []
    for (cin, _, _, k) in LEVELS:
        key, k1, k2 = jax.random.split(key, 3)
        w_reg = 0.05 * jax.random.normal(k1, (3, 3, cin, k * 4), jnp.float32)
        b_reg = jnp.zeros((k * 4,), jnp.float32)
        w_cls = 0.05 * jax.random.normal(k2, (3, 3, cin, k * NUM_CLASSES),
                                         jnp.float32)
        b_cls = jnp.zeros((k * NUM_CLASSES,), jnp.float32)
        params.append((w_reg, b_reg, w_cls, b_cls))
    return params


def make_prior_anchors():
    """Deterministic center-form priors; order matches prediction flattening
    (per level: h, w, box_index)."""
    priors = []
    for (_, H, W, k) in LEVELS:
        cy = (jnp.arange(H, dtype=jnp.float32) + 0.5) / H
        cx = (jnp.arange(W, dtype=jnp.float32) + 0.5) / W
        cy_g, cx_g = jnp.meshgrid(cy, cx, indexing="ij")            # (H, W)
        centers = jnp.stack([cx_g, cy_g], axis=-1)                  # (H, W, 2)
        centers = jnp.broadcast_to(centers[:, :, None, :], (H, W, k, 2))
        b = jnp.arange(k, dtype=jnp.float32)
        w_size = jnp.clip(0.10 * (b + 1.0), 0.0, 1.0)
        h_size = jnp.clip(0.08 * (b + 1.0), 0.0, 1.0)
        sizes = jnp.broadcast_to(jnp.stack([w_size, h_size], axis=-1),
                                 (H, W, k, 2))
        priors.append(jnp.concatenate([centers, sizes], -1).reshape(-1, 4))
    return jnp.concatenate(priors, axis=0)                           # (P, 4)


def ssd_box_head_forward(features_nchw, params, priors, training=False):
    """features_nchw: list of NCHW arrays (PyTorch convention)."""
    N = features_nchw[0].shape[0]
    loc_t_parts, conf_t_parts = [], []
    for x_nchw, (w_reg, b_reg, w_cls, b_cls), (cin, H, W, k) in zip(
            features_nchw, params, LEVELS):
        # Fuse reg + cls heads: one conv / one pallas_call per level.
        w = jnp.concatenate([w_reg, w_cls], axis=-1)       # (3,3,Cin,k*(4+C))
        cout = w.shape[-1]
        # w_flat[co, (kh*3+kw)*Cin + c] = w[kh, kw, c, co]
        w_flat = jnp.transpose(w, (3, 0, 1, 2)).reshape(cout, 9 * cin)
        b_col = jnp.concatenate([b_reg, b_cls]).reshape(cout, 1)

        x_nhwc = jnp.transpose(x_nchw, (0, 2, 3, 1))       # NCHW -> NHWC
        xp = jnp.pad(x_nhwc, ((0, 0), (1, 1), (1, 1), (0, 0)))
        out_t = conv3x3_fused(xp, w_flat, b_col, H, W)     # (N, cout, H*W)

        # Split heads and rebuild the PyTorch flattening order (h, w, box)
        # with coord/class on the sublane axis (free XLA layout plumbing).
        reg_t = out_t[:, :k * 4, :].reshape(N, k, 4, H * W)
        cls_t = out_t[:, k * 4:, :].reshape(N, k, NUM_CLASSES, H * W)
        loc_t_parts.append(
            jnp.transpose(reg_t, (0, 2, 3, 1)).reshape(N, 4, H * W * k))
        conf_t_parts.append(
            jnp.transpose(cls_t, (0, 2, 3, 1)).reshape(N, NUM_CLASSES,
                                                       H * W * k))

    loc_t = jnp.concatenate(loc_t_parts, axis=-1)           # (N, 4, P)
    conf_t = jnp.concatenate(conf_t_parts, axis=-1)         # (N, C, P)

    if training:
        return (jnp.transpose(loc_t, (0, 2, 1)),            # (N, P, 4)
                jnp.transpose(conf_t, (0, 2, 1)))           # (N, P, C)

    scores_t, boxes_t = postprocess(loc_t, conf_t,
                                    jnp.transpose(priors, (1, 0)))
    # TODO(synk): PostProcessor (per-class thresholding + NMS) omitted; returns
    # the (scores, corner-form boxes) detection tuple fed into it.
    return (jnp.transpose(scores_t, (0, 2, 1)),              # (N, P, C)
            jnp.transpose(boxes_t, (0, 2, 1)))               # (N, P, 4)


# ----------------------------- reference (pure JAX) ----------------------------
def reference_forward(features_nchw, params, priors):
    locs, confs = [], []
    for x_nchw, (w_reg, b_reg, w_cls, b_cls) in zip(features_nchw, params):
        x = jnp.transpose(x_nchw, (0, 2, 3, 1))
        dn = ("NHWC", "HWIO", "NHWC")
        reg = jax.lax.conv_general_dilated(x, w_reg, (1, 1), "SAME",
                                           dimension_numbers=dn) + b_reg
        cls = jax.lax.conv_general_dilated(x, w_cls, (1, 1), "SAME",
                                           dimension_numbers=dn) + b_cls
        N = x.shape[0]
        locs.append(reg.reshape(N, -1, 4))
        confs.append(cls.reshape(N, -1, NUM_CLASSES))
    loc = jnp.concatenate(locs, axis=1)
    conf = jnp.concatenate(confs, axis=1)
    scores = jax.nn.softmax(conf, axis=2)
    p = priors[None]
    center = loc[..., :2] * CENTER_VARIANCE * p[..., 2:] + p[..., :2]
    size = jnp.exp(loc[..., 2:] * SIZE_VARIANCE) * p[..., 2:]
    boxes = jnp.concatenate([center - size / 2, center + size / 2], axis=-1)
    return scores, boxes


# ----------------------------- main --------------------------------------------
if __name__ == "__main__":
    key = jax.random.PRNGKey(0)
    key, kf0, kf1, kp = jax.random.split(key, 4)
    features = [
        jax.random.normal(kf0, (BATCH, LEVELS[0][0], LEVELS[0][1],
                                LEVELS[0][2]), jnp.float32),
        jax.random.normal(kf1, (BATCH, LEVELS[1][0], LEVELS[1][1],
                                LEVELS[1][2]), jnp.float32),
    ]
    params = make_params(kp)
    priors = make_prior_anchors()

    fwd = jax.jit(functools.partial(ssd_box_head_forward, training=False))
    scores, boxes = fwd(features, params, priors)
    scores = jax.block_until_ready(scores)
    boxes = jax.block_until_ready(boxes)

    ref_scores, ref_boxes = reference_forward(features, params, priors)
    assert scores.shape == ref_scores.shape and boxes.shape == ref_boxes.shape
    assert jnp.allclose(scores, ref_scores, atol=1e-3, rtol=1e-3)
    assert jnp.allclose(boxes, ref_boxes, atol=1e-3, rtol=1e-3)

    print("KERNEL_OK")
</pallas_src>

<mosaic_0001>
module attributes {stable_mosaic.version = 11 : i64} {
  func.func @_conv3x3_fused_kernel(%arg0: i32, %arg1: memref<1x10x10x8xf32, #tpu.memory_space<vmem>>, %arg2: memref<72x72xf32, #tpu.memory_space<vmem>>, %arg3: memref<72x1xf32, #tpu.memory_space<vmem>>, %arg4: memref<1x72x64xf32, #tpu.memory_space<vmem>>) attributes {dimension_semantics = [#tpu.dimension_semantics<parallel>], iteration_bounds = array<i64: 2>, scalar_prefetch = 0 : i64, scratch_operands = 0 : i64, tpu.core_type = #tpu.core_type<tc>, window_params = [{transform_indices = @transform_0, window_bounds = array<i64: 1, 10, 10, 8>}, {pipeline_mode = #tpu.pipeline_mode<synchronous>, transform_indices = @transform_1, window_bounds = array<i64: 72, 72>}, {pipeline_mode = #tpu.pipeline_mode<synchronous>, transform_indices = @transform_2, window_bounds = array<i64: 72, 1>}, {transform_indices = @transform_3, window_bounds = array<i64: 1, 72, 64>}]} {
    %c0 = arith.constant 0 : index
    %c0_0 = arith.constant 0 : index
    %c0_1 = arith.constant 0 : index
    %c0_2 = arith.constant 0 : index
    %0 = vector.load %arg1[%c0, %c0_0, %c0_1, %c0_2] : memref<1x10x10x8xf32, #tpu.memory_space<vmem>>, vector<1x10x10x8xf32>
    %1 = vector.shape_cast %0 : vector<1x10x10x8xf32> to vector<10x10x8xf32>
    %2 = vector.extract_strided_slice %1 {offsets = [0, 0, 0], sizes = [8, 8, 8], strides = [1, 1, 1]} : vector<10x10x8xf32> to vector<8x8x8xf32>
    %3 = vector.shape_cast %2 : vector<8x8x8xf32> to vector<64x8xf32>
    %4 = vector.extract_strided_slice %1 {offsets = [0, 1, 0], sizes = [8, 8, 8], strides = [1, 1, 1]} : vector<10x10x8xf32> to vector<8x8x8xf32>
    %5 = vector.shape_cast %4 : vector<8x8x8xf32> to vector<64x8xf32>
    %6 = vector.extract_strided_slice %1 {offsets = [0, 2, 0], sizes = [8, 8, 8], strides = [1, 1, 1]} : vector<10x10x8xf32> to vector<8x8x8xf32>
    %7 = vector.shape_cast %6 : vector<8x8x8xf32> to vector<64x8xf32>
    %8 = vector.extract_strided_slice %1 {offsets = [1, 0, 0], sizes = [8, 8, 8], strides = [1, 1, 1]} : vector<10x10x8xf32> to vector<8x8x8xf32>
    %9 = vector.shape_cast %8 : vector<8x8x8xf32> to vector<64x8xf32>
    %10 = vector.extract_strided_slice %1 {offsets = [1, 1, 0], sizes = [8, 8, 8], strides = [1, 1, 1]} : vector<10x10x8xf32> to vector<8x8x8xf32>
    %11 = vector.shape_cast %10 : vector<8x8x8xf32> to vector<64x8xf32>
    %12 = vector.extract_strided_slice %1 {offsets = [1, 2, 0], sizes = [8, 8, 8], strides = [1, 1, 1]} : vector<10x10x8xf32> to vector<8x8x8xf32>
    %13 = vector.shape_cast %12 : vector<8x8x8xf32> to vector<64x8xf32>
    %14 = vector.extract_strided_slice %1 {offsets = [2, 0, 0], sizes = [8, 8, 8], strides = [1, 1, 1]} : vector<10x10x8xf32> to vector<8x8x8xf32>
    %15 = vector.shape_cast %14 : vector<8x8x8xf32> to vector<64x8xf32>
    %16 = vector.extract_strided_slice %1 {offsets = [2, 1, 0], sizes = [8, 8, 8], strides = [1, 1, 1]} : vector<10x10x8xf32> to vector<8x8x8xf32>
    %17 = vector.shape_cast %16 : vector<8x8x8xf32> to vector<64x8xf32>
    %18 = vector.extract_strided_slice %1 {offsets = [2, 2, 0], sizes = [8, 8, 8], strides = [1, 1, 1]} : vector<10x10x8xf32> to vector<8x8x8xf32>
    %19 = vector.shape_cast %18 : vector<8x8x8xf32> to vector<64x8xf32>
    %20 = tpu.concatenate %3, %5, %7, %9, %11, %13, %15, %17, %19 in 1 : vector<64x8xf32>, vector<64x8xf32>, vector<64x8xf32>, vector<64x8xf32>, vector<64x8xf32>, vector<64x8xf32>, vector<64x8xf32>, vector<64x8xf32>, vector<64x8xf32> -> vector<64x72xf32>
    %c0_3 = arith.constant 0 : index
    %c0_4 = arith.constant 0 : index
    %21 = vector.load %arg2[%c0_3, %c0_4] : memref<72x72xf32, #tpu.memory_space<vmem>>, vector<72x72xf32>
    %cst = arith.constant dense<0.000000e+00> : vector<72x64xf32>
    %22 = tpu.matmul %21, %20, %cst {dimension_numbers = #tpu.dot_dimension_numbers<[1], [1], [0], [0], [0, 0, 1, 0], [], []>} : vector<72x72xf32>, vector<64x72xf32>, vector<72x64xf32> -> vector<72x64xf32>
    %c0_5 = arith.constant 0 : index
    %c0_6 = arith.constant 0 : index
    %23 = vector.load %arg3[%c0_5, %c0_6] : memref<72x1xf32, #tpu.memory_space<vmem>>, vector<72x1xf32>
    %24 = vector.broadcast %23 : vector<72x1xf32> to vector<72x64xf32>
    %25 = arith.addf %22, %24 : vector<72x64xf32>
    %c0_7 = arith.constant 0 : index
    %c0_8 = arith.constant 0 : index
    %c0_9 = arith.constant 0 : index
    %26 = vector.load %arg4[%c0_7, %c0_8, %c0_9] : memref<1x72x64xf32, #tpu.memory_space<vmem>>, vector<1x72x64xf32>
    %27 = vector.shape_cast %26 : vector<1x72x64xf32> to vector<72x64xf32>
    %28 = vector.shape_cast %25 : vector<72x64xf32> to vector<1x72x64xf32>
    tpu.vector_store %arg4[%c0_7, %c0_8, %c0_9], %28 {strides = array<i32>} : memref<1x72x64xf32, #tpu.memory_space<vmem>>, vector<1x72x64xf32>,
    return
  }
  func.func @transform_0(%arg0: i32) -> (i32, i32, i32, i32) {
    %c0_i32 = arith.constant 0 : i32
    %c0_i32_0 = arith.constant 0 : i32
    %c0_i32_1 = arith.constant 0 : i32
    %c0_i32_2 = arith.constant 0 : i32
    return %arg0, %c0_i32, %c0_i32_0, %c0_i32_1 : i32, i32, i32, i32
  }
  func.func @transform_1(%arg0: i32) -> (i32, i32) {
    %c0_i32 = arith.constant 0 : i32
    %c0_i32_0 = arith.constant 0 : i32
    %c0_i32_1 = arith.constant 0 : i32
    return %c0_i32, %c0_i32_0 : i32, i32
  }
  func.func @transform_2(%arg0: i32) -> (i32, i32) {
    %c0_i32 = arith.constant 0 : i32
    %c0_i32_0 = arith.constant 0 : i32
    %c0_i32_1 = arith.constant 0 : i32
    return %c0_i32, %c0_i32_0 : i32, i32
  }
  func.func @transform_3(%arg0: i32) -> (i32, i32, i32) {
    %c0_i32 = arith.constant 0 : i32
    %c0_i32_0 = arith.constant 0 : i32
    %c0_i32_1 = arith.constant 0 : i32
    return %arg0, %c0_i32, %c0_i32_0 : i32, i32, i32
  }
}

module attributes {stable_mosaic.version = 11 : i64} {
  func.func @_conv3x3_fused_kernel(%arg0: i32, %arg1: memref<1x18x18x4xf32, #tpu.memory_space<vmem>>, %arg2: memref<48x36xf32, #tpu.memory_space<vmem>>, %arg3: memref<48x1xf32, #tpu.memory_space<vmem>>, %arg4: memref<1x48x256xf32, #tpu.memory_space<vmem>>) attributes {dimension_semantics = [#tpu.dimension_semantics<parallel>], iteration_bounds = array<i64: 2>, scalar_prefetch = 0 : i64, scratch_operands = 0 : i64, tpu.core_type = #tpu.core_type<tc>, window_params = [{transform_indices = @transform_0, window_bounds = array<i64: 1, 18, 18, 4>}, {pipeline_mode = #tpu.pipeline_mode<synchronous>, transform_indices = @transform_1, window_bounds = array<i64: 48, 36>}, {pipeline_mode = #tpu.pipeline_mode<synchronous>, transform_indices = @transform_2, window_bounds = array<i64: 48, 1>}, {transform_indices = @transform_3, window_bounds = array<i64: 1, 48, 256>}]} {
    %c0 = arith.constant 0 : index
    %c0_0 = arith.constant 0 : index
    %c0_1 = arith.constant 0 : index
    %c0_2 = arith.constant 0 : index
    %0 = vector.load %arg1[%c0, %c0_0, %c0_1, %c0_2] : memref<1x18x18x4xf32, #tpu.memory_space<vmem>>, vector<1x18x18x4xf32>
    %1 = vector.shape_cast %0 : vector<1x18x18x4xf32> to vector<18x18x4xf32>
    %2 = vector.extract_strided_slice %1 {offsets = [0, 0, 0], sizes = [16, 16, 4], strides = [1, 1, 1]} : vector<18x18x4xf32> to vector<16x16x4xf32>
    %3 = vector.shape_cast %2 : vector<16x16x4xf32> to vector<256x4xf32>
    %4 = vector.extract_strided_slice %1 {offsets = [0, 1, 0], sizes = [16, 16, 4], strides = [1, 1, 1]} : vector<18x18x4xf32> to vector<16x16x4xf32>
    %5 = vector.shape_cast %4 : vector<16x16x4xf32> to vector<256x4xf32>
    %6 = vector.extract_strided_slice %1 {offsets = [0, 2, 0], sizes = [16, 16, 4], strides = [1, 1, 1]} : vector<18x18x4xf32> to vector<16x16x4xf32>
    %7 = vector.shape_cast %6 : vector<16x16x4xf32> to vector<256x4xf32>
    %8 = vector.extract_strided_slice %1 {offsets = [1, 0, 0], sizes = [16, 16, 4], strides = [1, 1, 1]} : vector<18x18x4xf32> to vector<16x16x4xf32>
    %9 = vector.shape_cast %8 : vector<16x16x4xf32> to vector<256x4xf32>
    %10 = vector.extract_strided_slice %1 {offsets = [1, 1, 0], sizes = [16, 16, 4], strides = [1, 1, 1]} : vector<18x18x4xf32> to vector<16x16x4xf32>
    %11 = vector.shape_cast %10 : vector<16x16x4xf32> to vector<256x4xf32>
    %12 = vector.extract_strided_slice %1 {offsets = [1, 2, 0], sizes = [16, 16, 4], strides = [1, 1, 1]} : vector<18x18x4xf32> to vector<16x16x4xf32>
    %13 = vector.shape_cast %12 : vector<16x16x4xf32> to vector<256x4xf32>
    %14 = vector.extract_strided_slice %1 {offsets = [2, 0, 0], sizes = [16, 16, 4], strides = [1, 1, 1]} : vector<18x18x4xf32> to vector<16x16x4xf32>
    %15 = vector.shape_cast %14 : vector<16x16x4xf32> to vector<256x4xf32>
    %16 = vector.extract_strided_slice %1 {offsets = [2, 1, 0], sizes = [16, 16, 4], strides = [1, 1, 1]} : vector<18x18x4xf32> to vector<16x16x4xf32>
    %17 = vector.shape_cast %16 : vector<16x16x4xf32> to vector<256x4xf32>
    %18 = vector.extract_strided_slice %1 {offsets = [2, 2, 0], sizes = [16, 16, 4], strides = [1, 1, 1]} : vector<18x18x4xf32> to vector<16x16x4xf32>
    %19 = vector.shape_cast %18 : vector<16x16x4xf32> to vector<256x4xf32>
    %20 = tpu.concatenate %3, %5, %7, %9, %11, %13, %15, %17, %19 in 1 : vector<256x4xf32>, vector<256x4xf32>, vector<256x4xf32>, vector<256x4xf32>, vector<256x4xf32>, vector<256x4xf32>, vector<256x4xf32>, vector<256x4xf32>, vector<256x4xf32> -> vector<256x36xf32>
    %c0_3 = arith.constant 0 : index
    %c0_4 = arith.constant 0 : index
    %21 = vector.load %arg2[%c0_3, %c0_4] : memref<48x36xf32, #tpu.memory_space<vmem>>, vector<48x36xf32>
    %cst = arith.constant dense<0.000000e+00> : vector<48x256xf32>
    %22 = tpu.matmul %21, %20, %cst {dimension_numbers = #tpu.dot_dimension_numbers<[1], [1], [0], [0], [0, 0, 1, 0], [], []>} : vector<48x36xf32>, vector<256x36xf32>, vector<48x256xf32> -> vector<48x256xf32>
    %c0_5 = arith.constant 0 : index
    %c0_6 = arith.constant 0 : index
    %23 = vector.load %arg3[%c0_5, %c0_6] : memref<48x1xf32, #tpu.memory_space<vmem>>, vector<48x1xf32>
    %24 = vector.broadcast %23 : vector<48x1xf32> to vector<48x256xf32>
    %25 = arith.addf %22, %24 : vector<48x256xf32>
    %c0_7 = arith.constant 0 : index
    %c0_8 = arith.constant 0 : index
    %c0_9 = arith.constant 0 : index
    %26 = vector.load %arg4[%c0_7, %c0_8, %c0_9] : memref<1x48x256xf32, #tpu.memory_space<vmem>>, vector<1x48x256xf32>
    %27 = vector.shape_cast %26 : vector<1x48x256xf32> to vector<48x256xf32>
    %28 = vector.shape_cast %25 : vector<48x256xf32> to vector<1x48x256xf32>
    tpu.vector_store %arg4[%c0_7, %c0_8, %c0_9], %28 {strides = array<i32>} : memref<1x48x256xf32, #tpu.memory_space<vmem>>, vector<1x48x256xf32>,
    return
  }
  func.func @transform_0(%arg0: i32) -> (i32, i32, i32, i32) {
    %c0_i32 = arith.constant 0 : i32
    %c0_i32_0 = arith.constant 0 : i32
    %c0_i32_1 = arith.constant 0 : i32
    %c0_i32_2 = arith.constant 0 : i32
    return %arg0, %c0_i32, %c0_i32_0, %c0_i32_1 : i32, i32, i32, i32
  }
  func.func @transform_1(%arg0: i32) -> (i32, i32) {
    %c0_i32 = arith.constant 0 : i32
    %c0_i32_0 = arith.constant 0 : i32
    %c0_i32_1 = arith.constant 0 : i32
    return %c0_i32, %c0_i32_0 : i32, i32
  }
  func.func @transform_2(%arg0: i32) -> (i32, i32) {
    %c0_i32 = arith.constant 0 : i32
    %c0_i32_0 = arith.constant 0 : i32
    %c0_i32_1 = arith.constant 0 : i32
    return %c0_i32, %c0_i32_0 : i32, i32
  }
  func.func @transform_3(%arg0: i32) -> (i32, i32, i32) {
    %c0_i32 = arith.constant 0 : i32
    %c0_i32_0 = arith.constant 0 : i32
    %c0_i32_1 = arith.constant 0 : i32
    return %arg0, %c0_i32, %c0_i32_0 : i32, i32, i32
  }
}

module attributes {stable_mosaic.version = 11 : i64} {
  func.func @_postprocess_kernel(%arg0: i32, %arg1: memref<1x4x1408xf32, #tpu.memory_space<vmem>>, %arg2: memref<1x8x1408xf32, #tpu.memory_space<vmem>>, %arg3: memref<4x1408xf32, #tpu.memory_space<vmem>>, %arg4: memref<1x8x1408xf32, #tpu.memory_space<vmem>>, %arg5: memref<1x4x1408xf32, #tpu.memory_space<vmem>>) attributes {dimension_semantics = [#tpu.dimension_semantics<parallel>], iteration_bounds = array<i64: 2>, scalar_prefetch = 0 : i64, scratch_operands = 0 : i64, tpu.core_type = #tpu.core_type<tc>, window_params = [{transform_indices = @transform_0, window_bounds = array<i64: 1, 4, 1408>}, {transform_indices = @transform_1, window_bounds = array<i64: 1, 8, 1408>}, {pipeline_mode = #tpu.pipeline_mode<synchronous>, transform_indices = @transform_2, window_bounds = array<i64: 4, 1408>}, {transform_indices = @transform_3, window_bounds = array<i64: 1, 8, 1408>}, {transform_indices = @transform_4, window_bounds = array<i64: 1, 4, 1408>}]} {
    %c0 = arith.constant 0 : index
    %c0_0 = arith.constant 0 : index
    %c0_1 = arith.constant 0 : index
    %0 = vector.load %arg2[%c0, %c0_0, %c0_1] : memref<1x8x1408xf32, #tpu.memory_space<vmem>>, vector<1x8x1408xf32>
    %1 = vector.shape_cast %0 : vector<1x8x1408xf32> to vector<8x1408xf32>
    %cst = arith.constant dense<0xFF800000> : vector<1408xf32>
    %2 = vector.multi_reduction <maximumf>, %1, %cst [0] : vector<8x1408xf32> to vector<1408xf32>
    %3 = vector.shape_cast %2 : vector<1408xf32> to vector<1x1408xf32>
    %4 = vector.broadcast %3 : vector<1x1408xf32> to vector<8x1408xf32>
    %5 = arith.subf %1, %4 : vector<8x1408xf32>
    %6 = math.exp %5 : vector<8x1408xf32>
    %cst_2 = arith.constant dense<0.000000e+00> : vector<1408xf32>
    %7 = vector.multi_reduction <add>, %6, %cst_2 [0] : vector<8x1408xf32> to vector<1408xf32>
    %8 = vector.shape_cast %7 : vector<1408xf32> to vector<1x1408xf32>
    %9 = tpu.reciprocal %8 {approx = true} : vector<1x1408xf32> -> vector<1x1408xf32>
    %10 = vector.broadcast %9 : vector<1x1408xf32> to vector<8x1408xf32>
    %11 = arith.mulf %6, %10 : vector<8x1408xf32>
    %c0_3 = arith.constant 0 : index
    %c0_4 = arith.constant 0 : index
    %c0_5 = arith.constant 0 : index
    %12 = vector.load %arg4[%c0_3, %c0_4, %c0_5] : memref<1x8x1408xf32, #tpu.memory_space<vmem>>, vector<1x8x1408xf32>
    %13 = vector.shape_cast %12 : vector<1x8x1408xf32> to vector<8x1408xf32>
    %14 = vector.shape_cast %11 : vector<8x1408xf32> to vector<1x8x1408xf32>
    tpu.vector_store %arg4[%c0_3, %c0_4, %c0_5], %14 {strides = array<i32>} : memref<1x8x1408xf32, #tpu.memory_space<vmem>>, vector<1x8x1408xf32>,
    %c0_6 = arith.constant 0 : index
    %c0_7 = arith.constant 0 : index
    %c0_8 = arith.constant 0 : index
    %15 = vector.load %arg1[%c0_6, %c0_7, %c0_8] : memref<1x4x1408xf32, #tpu.memory_space<vmem>>, vector<1x4x1408xf32>
    %16 = vector.shape_cast %15 : vector<1x4x1408xf32> to vector<4x1408xf32>
    %c0_9 = arith.constant 0 : index
    %c0_10 = arith.constant 0 : index
    %17 = vector.load %arg3[%c0_9, %c0_10] : memref<4x1408xf32, #tpu.memory_space<vmem>>, vector<4x1408xf32>
    %18 = vector.extract_strided_slice %17 {offsets = [0, 0], sizes = [2, 1408], strides = [1, 1]} : vector<4x1408xf32> to vector<2x1408xf32>
    %19 = vector.extract_strided_slice %17 {offsets = [2, 0], sizes = [2, 1408], strides = [1, 1]} : vector<4x1408xf32> to vector<2x1408xf32>
    %20 = vector.extract_strided_slice %16 {offsets = [0, 0], sizes = [2, 1408], strides = [1, 1]} : vector<4x1408xf32> to vector<2x1408xf32>
    %cst_11 = arith.constant 1.000000e-01 : f32
    %21 = vector.broadcast %cst_11 : f32 to vector<2x1408xf32>
    %22 = arith.mulf %20, %21 : vector<2x1408xf32>
    %23 = arith.mulf %22, %19 : vector<2x1408xf32>
    %24 = arith.addf %23, %18 : vector<2x1408xf32>
    %25 = vector.extract_strided_slice %16 {offsets = [2, 0], sizes = [2, 1408], strides = [1, 1]} : vector<4x1408xf32> to vector<2x1408xf32>
    %cst_12 = arith.constant 2.000000e-01 : f32
    %26 = vector.broadcast %cst_12 : f32 to vector<2x1408xf32>
    %27 = arith.mulf %25, %26 : vector<2x1408xf32>
    %28 = math.exp %27 : vector<2x1408xf32>
    %29 = arith.mulf %28, %19 : vector<2x1408xf32>
    %cst_13 = arith.constant 5.000000e-01 : f32
    %30 = vector.broadcast %cst_13 : f32 to vector<2x1408xf32>
    %31 = arith.mulf %29, %30 : vector<2x1408xf32>
    %32 = arith.subf %24, %31 : vector<2x1408xf32>
    %33 = arith.addf %24, %31 : vector<2x1408xf32>
    %34 = tpu.concatenate %32, %33 in 0 : vector<2x1408xf32>, vector<2x1408xf32> -> vector<4x1408xf32>
    %c0_14 = arith.constant 0 : index
    %c0_15 = arith.constant 0 : index
    %c0_16 = arith.constant 0 : index
    %35 = vector.load %arg5[%c0_14, %c0_15, %c0_16] : memref<1x4x1408xf32, #tpu.memory_space<vmem>>, vector<1x4x1408xf32>
    %36 = vector.shape_cast %35 : vector<1x4x1408xf32> to vector<4x1408xf32>
    %37 = vector.shape_cast %34 : vector<4x1408xf32> to vector<1x4x1408xf32>
    tpu.vector_store %arg5[%c0_14, %c0_15, %c0_16], %37 {strides = array<i32>} : memref<1x4x1408xf32, #tpu.memory_space<vmem>>, vector<1x4x1408xf32>,
    return
  }
  func.func @transform_0(%arg0: i32) -> (i32, i32, i32) {
    %c0_i32 = arith.constant 0 : i32
    %c0_i32_0 = arith.constant 0 : i32
    %c0_i32_1 = arith.constant 0 : i32
    return %arg0, %c0_i32, %c0_i32_0 : i32, i32, i32
  }
  func.func @transform_1(%arg0: i32) -> (i32, i32, i32) {
    %c0_i32 = arith.constant 0 : i32
    %c0_i32_0 = arith.constant 0 : i32
    %c0_i32_1 = arith.constant 0 : i32
    return %arg0, %c0_i32, %c0_i32_0 : i32, i32, i32
  }
  func.func @transform_2(%arg0: i32) -> (i32, i32) {
    %c0_i32 = arith.constant 0 : i32
    %c0_i32_0 = arith.constant 0 : i32
    %c0_i32_1 = arith.constant 0 : i32
    return %c0_i32, %c0_i32_0 : i32, i32
  }
  func.func @transform_3(%arg0: i32) -> (i32, i32, i32) {
    %c0_i32 = arith.constant 0 : i32
    %c0_i32_0 = arith.constant 0 : i32
    %c0_i32_1 = arith.constant 0 : i32
    return %arg0, %c0_i32, %c0_i32_0 : i32, i32, i32
  }
  func.func @transform_4(%arg0: i32) -> (i32, i32, i32) {
    %c0_i32 = arith.constant 0 : i32
    %c0_i32_0 = arith.constant 0 : i32
    %c0_i32_1 = arith.constant 0 : i32
    return %arg0, %c0_i32, %c0_i32_0 : i32, i32, i32
  }
}

</mosaic_0001>

<bundles_post_ra>
// kernel: ssd_box_head_forward.4
= control target key start
LH: loop header
LB: loop body
LE: loop exit
PB: predicated region body
PF: predicated region fallthrough
CT: control target
= control target key end

     0   :  { %s869_s12 = smov 0   ;;  %s1307_s0 = inlined_call_operand.vmem [shape: f32[2,10,10,8], index: 0, kind: input, shape index: {}]   ;;  %s1308_s1 = inlined_call_operand.vmem [shape: f32[72,72], index: 1, kind: input, shape index: {}]   ;;  %s1309_s2 = inlined_call_operand.vmem [shape: f32[72,1], index: 2, kind: input, shape index: {}]   ;;  %s1310_s3 = inlined_call_operand.vmem [shape: f32[2,72,64], index: 3, kind: output, shape index: {}]  }
   0x1 LB: > { %s760_s13 = sadd.s32 4294967295, %s838_s12   ;;  %p764_p0 = scmp.ge.s32.totalorder %s838_s12, 1  ;;  %s838_s12 = sphi %s869_s12, %s13_s12  }
   0x2   : > { %p137_p1 = scmp.lt.s32.totalorder %s838_s12, 3 }
   0x4   : > { %p138_p2 = pnand %p764_p0, %p137_p1 }
   0x5   : > { %p161_p3 = scmp.lt.s32.totalorder (!%p138_p2), %s760_s13, 1  ;;  %s840_s18 = smov (!%p138_p2), 8  }
   0x6   : > { %141 = sbr.rel (%p138_p2) target bundleno = 461 (0x1cd), region = 32  ;;  %s841_s19 = smov (!%p138_p2), 24  }
   0x7   : > { %s842_s20 = smov (!%p138_p2), 16   ;;  %s843_s21 = smov (!%p138_p2), 40  }
   0x8   : > { %s844_s22 = smov (!%p138_p2), 32   ;;  %s845_s23 = smov (!%p138_p2), 48  }
   0x9   : > { %s846_s24 = smov (!%p138_p2), 64   ;;  %s847_s25 = smov (!%p138_p2), 56  }
   0xb   : > { %s1312_s13 = smov (!%p161_p3, %s760_s13), 1  ;;  %vm207_vm0 = vcmask 1046528   ;;  %vm232_vm1 = vcmask 1045504   ;;  %vm465_vm2 = vcmask 64512   ;;  %vm474_vm3 = vcmask 130048  }
   0xc   : > { %s810_s14 = smul.u32 160, %s1312_s13  ;;  %vm483_vm4 = vcmask 195584   ;;  %vm492_vm5 = vcmask 261120   ;;  %vm501_vm6 = vcmask 326656   ;;  %vm510_vm7 = vcmask 392192  }
   0xd   : > { %vm519_vm8 = vcmask 457728   ;;  %vm528_vm9 = vcmask 523264   ;;  %vm600_vm10 = vcmask 588800   ;;  %s811_s10 = smul.u32 72, %s1312_s13 }
   0xe   : > { %s883_s17 = scalar_lea.vmem %s1307_s0, %s810_s14 }
   0xf   : > { %v886_v0 = vld [vmem:[%s883_s17 + $0x40] sm:$0xff]  ;;  %v889_v1 = vld [vmem:[%s883_s17 + $0x48] sm:$0x3]  ;;  %v909_v11 = vld [vmem:[%s883_s17 + $0x50] sm:$0xff]  ;;  %s1284_s15 = scalar_lea.vmem %s1310_s3, %s811_s10 }
  0x10   : > { %v892_v2 = vld [vmem:[%s883_s17 + $0x20] sm:$0xff]  ;;  %v220_v3 = vrot.slane %v886_v0, 1  ;;  %v221_v4 = vrot.slane %v889_v1, 1  ;;  %v897_v5 = vld [vmem:[%s883_s17 + $0x28] sm:$0x3]  ;;  %v919_v15 = vld [vmem:[%s883_s17 + $0x30] sm:$0xff] }
  0x11   : > { %v214_v6 = vrot.slane %v892_v2, 1  ;;  %v901_v7 = vld [vmem:[%s883_s17] sm:$0xff]  ;;  %v215_v8 = vrot.slane %v897_v5, 1  ;;  %v905_v9 = vld [vmem:[%s883_s17 + $0x8] sm:$0x3]  ;;  %v930_v18 = vld [vmem:[%s883_s17 + $0x10] sm:$0xff] }
  0x12   : > { %v208_v10 = vrot.slane %v901_v7, 1  ;;  %v912_v12 = vsel %vm207_vm0, %v220_v3, %v221_v4  ;;  %v209_v13 = vrot.slane %v905_v9, 1  ;;  %v916_v14 = vld [vmem:[%s883_s17 + $0x58] sm:$0x3]  ;;  %v223_v21 = vrot.slane %v909_v11, 1  ;;  %v955_v30 = vld [vmem:[%s883_s17 + $0x70] sm:$0xff] }
  0x13   : > { %v922_v16 = vld [vmem:[%s883_s17 + $0x38] sm:$0x3]  ;;  %281 = vrot.lane.b32.xlu2 %v912_v12, %s840_s18  ;;  %v927_v17 = vsel %vm207_vm0, %v214_v6, %v215_v8  ;;  %v224_v22 = vrot.slane %v916_v14, 1  ;;  %v217_v23 = vrot.slane %v919_v15, 1  ;;  %v211_v25 = vrot.slane %v930_v18, 1  ;;  %v187_v36 = vld [vmem:[%s883_s17 + $0x80] sm:$0xff] }
  0x14   : > { %v933_v19 = vld [vmem:[%s883_s17 + $0x18] sm:$0x3]  ;;  %277 = vrot.lane.b32.xlu1 %v927_v17, %s840_s18  ;;  %v210_v20 = vsel %vm207_vm0, %v208_v10, %v209_v13  ;;  %v218_v24 = vrot.slane %v922_v16, 1  ;;  %v254_v32 = vrot.slane %v955_v30, 2  ;;  %v229_v34 = vrot.slane %v955_v30, 1  ;;  %v971_v40 = vld [vmem:[%s883_s17 + $0x60] sm:$0xff] }
  0x15   : > { %273 = vrot.lane.b32.xlu0 %v210_v20, %s840_s18  ;;  %v212_v26 = vrot.slane %v933_v19, 1  ;;  %v946_v27 = vsel %vm207_vm0, %v223_v21, %v224_v22  ;;  %v186_v31 = vld [vmem:[%s883_s17 + $0x78] sm:$0x3]  ;;  %v188_v38 = vld [vmem:[%s883_s17 + $0x88] sm:$0x3]  ;;  %v262_v42 = vrot.slane %v187_v36, 2 }
  0x16   : > { %v949_v28 = vsel %vm207_vm0, %v217_v23, %v218_v24  ;;  %v255_v33 = vrot.slane %v186_v31, 2  ;;  %v230_v35 = vrot.slane %v186_v31, 1  ;;  %v184_v41 = vld [vmem:[%s883_s17 + $0x68] sm:$0x3]  ;;  %v263_v43 = vrot.slane %v188_v38, 2  ;;  %v189_v53 = vld [vmem:[%s883_s17 + $0x90] sm:$0xff] }
  0x17   : > { %v952_v29 = vsel %vm207_vm0, %v211_v25, %v212_v26  ;;  %v226_v44 = vrot.slane %v971_v40, 1  ;;  %v227_v45 = vrot.slane %v184_v41, 1  ;;  %v259_v46 = vrot.slane %v187_v36, 1  ;;  %v190_v54 = vld [vmem:[%s883_s17 + $0x98] sm:$0x3] }
  0x18   : > { %v256_v37 = vsel %vm232_vm1, %v254_v32, %v255_v33  ;;  %v231_v39 = vsel %vm207_vm0, %v229_v34, %v230_v35  ;;  %v260_v47 = vrot.slane %v188_v38, 1  ;;  %v264_v48 = vsel %vm232_vm1, %v262_v42, %v263_v43 }
  0x19   : > { %v228_v49 = vsel %vm207_vm0, %v226_v44, %v227_v45  ;;  %v251_v51 = vrot.slane %v971_v40, 2  ;;  %v252_v52 = vrot.slane %v184_v41, 2  ;;  %v270_v56 = vrot.slane %v189_v53, 2 }
  0x1a   : > { %v261_v50 = vsel %vm207_vm0, %v259_v46, %v260_v47  ;;  %v271_v57 = vrot.slane %v190_v54, 2  ;;  %v267_v58 = vrot.slane %v189_v53, 1  ;;  %v268_v59 = vrot.slane %v190_v54, 1 }
  0x1b   : > { %283 = vrot.lane.b32.xlu2 %v946_v27, %s840_s18  ;;  %v253_v55 = vsel %vm232_vm1, %v251_v51, %v252_v52  ;;  %v248_v62 = vrot.slane %v909_v11, 2  ;;  %v249_v63 = vrot.slane %v916_v14, 2  ;;  %v245_v4 = vrot.slane %v886_v0, 2 }
  0x1c   : > { %279 = vrot.lane.b32.xlu1 %v949_v28, %s840_s18  ;;  %v272_v60 = vsel %vm232_vm1, %v270_v56, %v271_v57  ;;  %v269_v61 = vsel %vm207_vm0, %v267_v58, %v268_v59  ;;  %v246_v6 = vrot.slane %v889_v1, 2  ;;  %v242_v1 = vrot.slane %v919_v15, 2 }
  0x1d   : > { %275 = vrot.lane.b32.xlu0 %v952_v29, %s840_s18  ;;  %v250_v3 = vsel %vm232_vm1, %v248_v62, %v249_v63  ;;  %v243_v10 = vrot.slane %v922_v16, 2  ;;  %v239_v20 = vrot.slane %v892_v2, 2  ;;  %v240_v21 = vrot.slane %v897_v5, 2 }
  0x1e   : > { %v247_v8 = vsel %vm232_vm1, %v245_v4, %v246_v6  ;;  %v236_v5 = vrot.slane %v930_v18, 2  ;;  %v237_v24 = vrot.slane %v933_v19, 2  ;;  %v234_v44 = vrot.slane %v905_v9, 2 }
  0x1f   : > { %v1025_v13 = vsel %vm232_vm1, %v242_v1, %v243_v10  ;;  %v1044_v22 = vsel %vm232_vm1, %v239_v20, %v240_v21 }
  0x23   : > { %335 = vrot.lane.b32.xlu2 %v187_v36, %s841_s19 }
  0x24   : > { %311 = vrot.lane.b32.xlu1 %v256_v37, %s842_s20 }
  0x25   : > { %287 = vrot.lane.b32.xlu0 %v231_v39, %s840_s18 }
  0x2b   : > { %383 = vrot.lane.b32.xlu2 %v264_v48, %s843_s21 }
  0x2c   : > { %285 = vrot.lane.b32.xlu1 %v228_v49, %s840_s18 }
  0x2d   : > { %359 = vrot.lane.b32.xlu0 %v261_v50, %s844_s22 }
  0x33   : > { %333 = vrot.lane.b32.xlu2 %v955_v30, %s841_s19 }
  0x34   : > { %407 = vrot.lane.b32.xlu1 %v189_v53, %s845_s23 }
  0x35   : > { %309 = vrot.lane.b32.xlu0 %v253_v55, %s842_s20 }
  0x3b   : > { %455 = vrot.lane.b32.xlu2 %v272_v60, %s846_s24 }
  0x3c   : > { %357 = vrot.lane.b32.xlu1 %v231_v39, %s844_s22 }
  0x3d   : > { %431 = vrot.lane.b32.xlu0 %v269_v61, %s847_s25 }
  0x43   : > { %405 = vrot.lane.b32.xlu2 %v187_v36, %s845_s23 }
  0x44   : > { %307 = vrot.lane.b32.xlu1 %v250_v3, %s842_s20 }
  0x45   : > { %381 = vrot.lane.b32.xlu0 %v256_v37, %s843_s21 }
  0x4b   : > { %355 = vrot.lane.b32.xlu2 %v228_v49, %s844_s22 }
  0x4c   : > { %429 = vrot.lane.b32.xlu1 %v261_v50, %s847_s25 }
  0x4d   : > { %331 = vrot.lane.b32.xlu0 %v971_v40, %s841_s19 }
  0x53   : > { %305 = vrot.lane.b32.xlu2 %v247_v8, %s842_s20 }
  0x54   : > { %379 = vrot.lane.b32.xlu1 %v253_v55, %s843_s21 }
  0x55   : > { %453 = vrot.lane.b32.xlu0 %v264_v48, %s846_s24 }
  0x5b   : > { %427 = vrot.lane.b32.xlu2 %v231_v39, %s847_s25 }
  0x5c   : > { %329 = vrot.lane.b32.xlu1 %v909_v11, %s841_s19 }
  0x5d   : > { %403 = vrot.lane.b32.xlu0 %v955_v30, %s845_s23 }
  0x63   : > { %377 = vrot.lane.b32.xlu2 %v250_v3, %s843_s21 }
  0x64   : > { %451 = vrot.lane.b32.xlu1 %v256_v37, %s846_s24 }
  0x65   : > { %353 = vrot.lane.b32.xlu0 %v946_v27, %s844_s22 }
  0x6b   : > { %327 = vrot.lane.b32.xlu2 %v886_v0, %s841_s19 }
  0x6c   : > { %401 = vrot.lane.b32.xlu1 %v971_v40, %s845_s23 }
  0x6d   : > { %303 = vrot.lane.b32.xlu0 %v1025_v13, %s842_s20  ;;  %v1033_v14 = vpop.permute.xlu2 %281 }
  0x73   : > { %449 = vrot.lane.b32.xlu2 %v253_v55, %s846_s24 }
  0x74   : > { %351 = vrot.lane.b32.xlu1 %v912_v12, %s844_s22 }
  0x75   : > { %425 = vrot.lane.b32.xlu0 %v228_v49, %s847_s25  ;;  %v1039_v16 = vpop.permute.xlu2 %283 }
  0x7b   : > { %399 = vrot.lane.b32.xlu2 %v909_v11, %s845_s23 }
  0x7c   : > { %301 = vrot.lane.b32.xlu1 %v1044_v22, %s842_s20 }
  0x7d   : > { %375 = vrot.lane.b32.xlu0 %v247_v8, %s843_s21  ;;  %v336_v23 = vpop.permute.xlu2 %335 }
  0x83   : > { %349 = vrot.lane.b32.xlu2 %v949_v28, %s844_s22 }
  0x84   : > { %423 = vrot.lane.b32.xlu1 %v946_v27, %s847_s25  ;;  %v238_v27 = vsel %vm232_vm1, %v236_v5, %v237_v24 }
  0x85   : > { %325 = vrot.lane.b32.xlu0 %v919_v15, %s841_s19  ;;  %v384_v25 = vpop.permute.xlu2 %383 }
  0x86   : > { %v278_v26 = vpop.permute.xlu1 %277 }
  0x87   : > { %v1061_v31 = vsel %vm465_vm2, %v892_v2, %v278_v26  ;;  %v274_v32 = vpop.permute.xlu0 %273 }
  0x88   : > { %v1065_v33 = vsel %vm465_vm2, %v901_v7, %v274_v32 }
  0x8b   : > { %299 = vrot.lane.b32.xlu2 %v238_v27, %s842_s20 }
  0x8c   : > { %373 = vrot.lane.b32.xlu1 %v1025_v13, %s843_s21 }
  0x8d   : > { %447 = vrot.lane.b32.xlu0 %v250_v3, %s846_s24  ;;  %v1072_v19 = vpop.permute.xlu2 %333 }
  0x8e   : > { %v280_v34 = vpop.permute.xlu1 %279 }
  0x8f   : > { %v1076_v35 = vsel %vm465_vm2, %v919_v15, %v280_v34  ;;  %v276_v36 = vpop.permute.xlu0 %275 }
  0x90   : > { %v1080_v37 = vsel %vm465_vm2, %v930_v18, %v276_v36 }
  0x93   : > { %421 = vrot.lane.b32.xlu2 %v912_v12, %s847_s25  ;;  %v233_v12 = vrot.slane %v901_v7, 2 }
  0x94   : > { %323 = vrot.lane.b32.xlu1 %v892_v2, %s841_s19 }
  0x95   : > { %397 = vrot.lane.b32.xlu0 %v886_v0, %s845_s23  ;;  %v456_v38 = vpop.permute.xlu2 %455  ;;  %v235_v46 = vsel %vm232_vm1, %v233_v12, %v234_v44 }
  0x96   : > { %v312_v39 = vpop.permute.xlu1 %311 }
  0x97   : > { %v288_v41 = vpop.permute.xlu0 %287 }
  0x98   : > { %v473_v47 = vsel %vm465_vm2, %v955_v30, %v288_v41 }
  0x99   : > { %v482_v7 = vsel %vm474_vm3, %v473_v47, %v312_v39 }
  0x9a   : > { %v491_v50 = vsel %vm483_vm4, %v482_v7, %v336_v23 }
  0x9b   : > { %371 = vrot.lane.b32.xlu2 %v1044_v22, %s843_s21 }
  0x9c   : > { %445 = vrot.lane.b32.xlu1 %v247_v8, %s846_s24  ;;  %v471_v8 = vsel %vm465_vm2, %v909_v11, %v1039_v16 }
  0x9d   : > { %347 = vrot.lane.b32.xlu0 %v927_v17, %s844_s22  ;;  %v406_v42 = vpop.permute.xlu2 %405 }
  0x9e   : > { %v286_v43 = vpop.permute.xlu1 %285 }
  0x9f   : > { %v360_v45 = vpop.permute.xlu0 %359  ;;  %v472_v56 = vsel %vm465_vm2, %v971_v40, %v286_v43 }
  0xa3   : > { %321 = vrot.lane.b32.xlu2 %v930_v18, %s841_s19  ;;  %v500_v18 = vsel %vm492_vm5, %v491_v50, %v360_v45 }
  0xa4   : > { %395 = vrot.lane.b32.xlu1 %v919_v15, %s845_s23  ;;  %v509_v15 = vsel %vm501_vm6, %v500_v18, %v384_v25 }
  0xa5   : > { %297 = vrot.lane.b32.xlu0 %v235_v46, %s842_s20  ;;  %v356_v49 = vpop.permute.xlu2 %355 }
  0xa6   : > { %v408_v48 = vpop.permute.xlu1 %407 }
  0xa7   : > { %v310_v9 = vpop.permute.xlu0 %309  ;;  %v518_v51 = vsel %vm510_vm7, %v509_v15, %v408_v48 }
  0xa8   : > { %v481_v58 = vsel %vm474_vm3, %v472_v56, %v310_v9 }
  0xab   : > { %443 = vrot.lane.b32.xlu2 %v1025_v13, %s846_s24 }
  0xac   : > { %345 = vrot.lane.b32.xlu1 %v952_v29, %s844_s22 }
  0xad   : > { %419 = vrot.lane.b32.xlu0 %v949_v28, %s847_s25  ;;  %v306_v55 = vpop.permute.xlu2 %305 }
  0xae   : > { %v358_v30 = vpop.permute.xlu1 %357 }
  0xaf   : > { %v432_v52 = vpop.permute.xlu0 %431 }
  0xb0   : > { %v527_v53 = vsel %vm519_vm8, %v518_v51, %v432_v52 }
  0xb1   : > { %v536_v54 = vsel %vm528_vm9, %v527_v53, %v456_v38 }
  0xb2   : > { %767 = vmatpush.xpose.msk.msra.mxu0 %vm600_vm10, %v536_v54  ;;  %786 = vmatpush.xpose.msk.msra.mxu1 %vm600_vm10, %v536_v54 }
  0xb3   : > { %787 = vmatpush.xpose.msk.msra.mxu2 %vm600_vm10, %v536_v54  ;;  %788 = vmatpush.xpose.msk.msra.mxu3 %vm600_vm10, %v536_v54 }
  0xb4   : > { %393 = vrot.lane.b32.xlu1 %v892_v2, %s845_s23  ;;  %417 = vrot.lane.b32.xlu2 %v927_v17, %s847_s25  ;;  %v490_v2 = vsel %vm483_vm4, %v481_v58, %v1072_v19  ;;  %v470_v19 = vsel %vm465_vm2, %v886_v0, %v1033_v14 }
  0xb5   : > { %369 = vrot.lane.b32.xlu0 %v238_v27, %s843_s21  ;;  %v428_v57 = vpop.permute.xlu2 %427  ;;  %v499_v17 = vsel %vm492_vm5, %v490_v2, %v358_v30  ;;  %v479_v34 = vsel %vm474_vm3, %v470_v19, %v306_v55  ;;  %v848_v55 = vmov 0   ;;  %v549_v2 = vld [vmem:[%s1309_s2 + $0x18] sm:$0xff] }
  0xb6   : > { %v308_v28 = vpop.permute.xlu1 %307  ;;  %829 = vset.pattern.permute.xlu1 %v848_v55  ;;  %831 = vset.pattern.permute.xlu0 %v848_v55 }
  0xb7   : > { %v382_v29 = vpop.permute.xlu0 %381  ;;  %v480_v1 = vsel %vm474_vm3, %v471_v8, %v308_v28  ;;  %830 = vset.pattern.permute.xlu2 %v848_v55 }
  0xb8   : > { %v508_v61 = vsel %vm501_vm6, %v499_v17, %v382_v29 }
  0xb9   : > { %v517_v63 = vsel %vm510_vm7, %v508_v61, %v406_v42 }
  0xbd   : > { %441 = vrot.lane.b32.xlu0 %v1044_v22, %s846_s24  ;;  %v378_v62 = vpop.permute.xlu2 %377 }
  0xbe   : > { %v430_v59 = vpop.permute.xlu1 %429 }
  0xbf   : > { %v332_v60 = vpop.permute.xlu0 %331  ;;  %v526_v40 = vsel %vm519_vm8, %v517_v63, %v430_v59 }
  0xc0   : > { %v489_v10 = vsel %vm483_vm4, %v480_v1, %v332_v60 }
  0xc1   : > { %v498_v22 = vsel %vm492_vm5, %v489_v10, %v356_v49 }
  0xc5   : > { %v328_v21 = vpop.permute.xlu2 %327 }
  0xc6   : > { %v380_v3 = vpop.permute.xlu1 %379 }
  0xc7   : > { %v454_v4 = vpop.permute.xlu0 %453  ;;  %v507_v23 = vsel %vm501_vm6, %v498_v22, %v380_v3 }
  0xc8   : > { %v535_v6 = vsel %vm528_vm9, %v526_v40, %v454_v4  ;;  %v551_v40 = vld [vmem:[%s1309_s2 + $0x28] sm:$0xff] }
  0xc9   : > { %768 = vmatpush.xpose.msk.msra.mxu0 %vm600_vm10, %v535_v6  ;;  %789 = vmatpush.xpose.msk.msra.mxu1 %vm600_vm10, %v535_v6 }
  0xca   : > { %790 = vmatpush.xpose.msk.msra.mxu2 %vm600_vm10, %v535_v6  ;;  %791 = vmatpush.xpose.msk.msra.mxu3 %vm600_vm10, %v535_v6 }
  0xcd   : > { %v450_v11 = vpop.permute.xlu2 %449 }
  0xce   : > { %v330_v13 = vpop.permute.xlu1 %329 }
  0xcf   : > { %v404_v20 = vpop.permute.xlu0 %403  ;;  %v488_v36 = vsel %vm483_vm4, %v479_v34, %v330_v13  ;;  %v554_v13 = vld [vmem:[%s1309_s2 + $0x40] sm:$0xff] }
  0xd0   : > { %v516_v5 = vsel %vm510_vm7, %v507_v23, %v404_v20 }
  0xd1   : > { %v525_v25 = vsel %vm519_vm8, %v516_v5, %v428_v57 }
  0xd5   : > { %v400_v39 = vpop.permute.xlu2 %399 }
  0xd6   : > { %v452_v24 = vpop.permute.xlu1 %451 }
  0xd7   : > { %v534_v26 = vsel %vm528_vm9, %v525_v25, %v452_v24  ;;  %v354_v32 = vpop.permute.xlu0 %353 }
  0xd8   : > { %769 = vmatpush.xpose.msk.msra.mxu0 %vm600_vm10, %v534_v26  ;;  %792 = vmatpush.xpose.msk.msra.mxu1 %vm600_vm10, %v534_v26  ;;  %v497_v38 = vsel %vm492_vm5, %v488_v36, %v354_v32  ;;  %v547_v32 = vld [vmem:[%s1309_s2 + $0x8] sm:$0xff]  ;;  %v550_v36 = vld [vmem:[%s1309_s2 + $0x20] sm:$0xff] }
  0xd9   : > { %793 = vmatpush.xpose.msk.msra.mxu2 %vm600_vm10, %v534_v26  ;;  %794 = vmatpush.xpose.msk.msra.mxu3 %vm600_vm10, %v534_v26  ;;  %v506_v41 = vsel %vm501_vm6, %v497_v38, %v378_v62  ;;  %v548_v26 = vld [vmem:[%s1309_s2 + $0x10] sm:$0xff] }
  0xda   : > { %567 = vperm.xlu0 %831, %v548_v26   ;;  %562 = vperm.xlu2 %830, %v547_v32  }
  0xdd   : > { %v350_v0 = vpop.permute.xlu2 %349 }
  0xde   : > { %v402_v16 = vpop.permute.xlu1 %401 }
  0xdf   : > { %v304_v27 = vpop.permute.xlu0 %303  ;;  %v515_v43 = vsel %vm510_vm7, %v506_v41, %v402_v16 }
  0xe0   : > { %v478_v47 = vsel %vm474_vm3, %v1076_v35, %v304_v27  ;;  %v546_v35 = vld [vmem:[%s1309_s2] sm:$0xff] }
  0xe1   : > { %v487_v49 = vsel %vm483_vm4, %v478_v47, %v328_v21  ;;  %557 = vperm.xlu1 %829, %v546_v35   ;;  %v541_v47 = vld [vmem:[%s1308_s1 + $0x20] sm:$0xff] }
  0xe2   : > { %577 = vperm.xlu2 %830, %v550_v36  }
  0xe5   : > { %v300_v9 = vpop.permute.xlu2 %299 }
  0xe6   : > { %v352_v42 = vpop.permute.xlu1 %351  ;;  %v476_v8 = vsel %vm474_vm3, %v1080_v37, %v300_v9  ;;  %v545_v9 = vld [vmem:[%s1308_s1 + $0x40] sm:$0xff] }
  0xe7   : > { %v426_v12 = vpop.permute.xlu0 %425  ;;  %v496_v50 = vsel %vm492_vm5, %v487_v49, %v352_v42 }
  0xe8   : > { %v524_v44 = vsel %vm519_vm8, %v515_v43, %v426_v12  ;;  %v537_v12 = vld [vmem:[%s1308_s1] sm:$0xff] }
  0xe9   : > { %v533_v45 = vsel %vm528_vm9, %v524_v44, %v450_v11  ;;  %572 = vperm.xlu1 %829, %v549_v2   ;;  %v538_v44 = vld [vmem:[%s1308_s1 + $0x8] sm:$0xff] }
  0xea   : > { %770 = vmatpush.xpose.msk.msra.mxu0 %vm600_vm10, %v533_v45  ;;  %795 = vmatpush.xpose.msk.msra.mxu1 %vm600_vm10, %v533_v45 }
  0xeb   : > { %796 = vmatpush.xpose.msk.msra.mxu2 %vm600_vm10, %v533_v45  ;;  %797 = vmatpush.xpose.msk.msra.mxu3 %vm600_vm10, %v533_v45  ;;  %v540_v45 = vld [vmem:[%s1308_s1 + $0x18] sm:$0xff] }
  0xed   : > { %v422_v54 = vpop.permute.xlu2 %421 }
  0xee   : > { %v302_v14 = vpop.permute.xlu1 %301 }
  0xef   : > { %v376_v46 = vpop.permute.xlu0 %375  ;;  %v477_v28 = vsel %vm474_vm3, %v1061_v31, %v302_v14  ;;  %v552_v14 = vld [vmem:[%s1309_s2 + $0x30] sm:$0xff] }
  0xf0   : > { %v505_v18 = vsel %vm501_vm6, %v496_v50, %v376_v46  ;;  %587 = vperm.xlu2 %830, %v552_v14   ;;  %v539_v46 = vld [vmem:[%s1308_s1 + $0x10] sm:$0xff] }
  0xf1   : > { %v514_v15 = vsel %vm510_vm7, %v505_v18, %v400_v39  ;;  %582 = vperm.xlu1 %829, %v551_v40  }
  0xf5   : > { %v372_v60 = vpop.permute.xlu2 %371 }
  0xf6   : > { %v424_v48 = vpop.permute.xlu1 %423 }
  0xf7   : > { %v326_v7 = vpop.permute.xlu0 %325  ;;  %v523_v51 = vsel %vm519_vm8, %v514_v15, %v424_v48  ;;  %v544_v48 = vld [vmem:[%s1308_s1 + $0x38] sm:$0xff] }
  0xf8   : > { %v486_v29 = vsel %vm483_vm4, %v477_v28, %v326_v7  ;;  %v542_v7 = vld [vmem:[%s1308_s1 + $0x28] sm:$0xff] }
  0xf9   : > { %v495_v58 = vsel %vm492_vm5, %v486_v29, %v350_v0  ;;  %597 = vperm.xlu1 %829, %v554_v13   ;;  %v543_v0 = vld [vmem:[%s1308_s1 + $0x30] sm:$0xff] }
  0xfd   : > { %v322_v3 = vpop.permute.xlu2 %321 }
  0xfe   : > { %v374_v30 = vpop.permute.xlu1 %373 }
  0xff   : > { %v448_v52 = vpop.permute.xlu0 %447  ;;  %v504_v59 = vsel %vm501_vm6, %v495_v58, %v374_v30 }
 0x100   : > { %v532_v53 = vsel %vm528_vm9, %v523_v51, %v448_v52 }
 0x101   : > { %771 = vmatpush.xpose.msk.msra.mxu0 %vm600_vm10, %v532_v53  ;;  %798 = vmatpush.xpose.msk.msra.mxu1 %vm600_vm10, %v532_v53 }
 0x102   : > { %799 = vmatpush.xpose.msk.msra.mxu2 %vm600_vm10, %v532_v53  ;;  %800 = vmatpush.xpose.msk.msra.mxu3 %vm600_vm10, %v532_v53 }
 0x105   : > { %v444_v21 = vpop.permute.xlu2 %443 }
 0x106   : > { %v324_v56 = vpop.permute.xlu1 %323 }
 0x107   : > { %v398_v57 = vpop.permute.xlu0 %397  ;;  %v485_v1 = vsel %vm483_vm4, %v476_v8, %v324_v56 }
 0x108   : > { %v513_v17 = vsel %vm510_vm7, %v504_v59, %v398_v57 }
 0x109   : > { %v522_v31 = vsel %vm519_vm8, %v513_v17, %v422_v54 }
 0x10e   : > { %v446_v61 = vpop.permute.xlu1 %445  ;;  %v418_v39 = vpop.permute.xlu2 %417 }
 0x10f   : > { %v531_v62 = vsel %vm528_vm9, %v522_v31, %v446_v61  ;;  %v348_v63 = vpop.permute.xlu0 %347 }
 0x110   : > { %772 = vmatpush.xpose.msk.msra.mxu0 %vm600_vm10, %v531_v62  ;;  %801 = vmatpush.xpose.msk.msra.mxu1 %vm600_vm10, %v531_v62  ;;  %v494_v10 = vsel %vm492_vm5, %v485_v1, %v348_v63 }
 0x111   : > { %802 = vmatpush.xpose.msk.msra.mxu2 %vm600_vm10, %v531_v62  ;;  %803 = vmatpush.xpose.msk.msra.mxu3 %vm600_vm10, %v531_v62  ;;  %v503_v20 = vsel %vm501_vm6, %v494_v10, %v372_v60 }
 0x116   : > { %v396_v4 = vpop.permute.xlu1 %395 }
 0x117   : > { %v298_v6 = vpop.permute.xlu0 %297  ;;  %v512_v22 = vsel %vm510_vm7, %v503_v20, %v396_v4 }
 0x118   : > { %v475_v25 = vsel %vm474_vm3, %v1065_v33, %v298_v6  ;;  %v553_v33 = vld [vmem:[%s1309_s2 + $0x38] sm:$0xff] }
 0x119   : > { %v484_v11 = vsel %vm483_vm4, %v475_v25, %v322_v3  ;;  %592 = vperm.xlu0 %831, %v553_v33  }
 0x11e   : > { %v346_v23 = vpop.permute.xlu1 %345 }
 0x11f   : > { %v420_v5 = vpop.permute.xlu0 %419  ;;  %v493_v27 = vsel %vm492_vm5, %v484_v11, %v346_v23 }
 0x120   : > { %v521_v24 = vsel %vm519_vm8, %v512_v22, %v420_v5 }
 0x121   : > { %v530_v37 = vsel %vm528_vm9, %v521_v24, %v444_v21 }
 0x122   : > { %773 = vmatpush.xpose.msk.msra.mxu0 %vm600_vm10, %v530_v37  ;;  %804 = vmatpush.xpose.msk.msra.mxu1 %vm600_vm10, %v530_v37 }
 0x123   : > { %805 = vmatpush.xpose.msk.msra.mxu2 %vm600_vm10, %v530_v37  ;;  %806 = vmatpush.xpose.msk.msra.mxu3 %vm600_vm10, %v530_v37 }
 0x126   : > { %v394_v34 = vpop.permute.xlu1 %393 }
 0x127   : > { %v370_v16 = vpop.permute.xlu0 %369 }
 0x128   : > { %v502_v19 = vsel %vm501_vm6, %v493_v27, %v370_v16 }
 0x129   : > { %v511_v38 = vsel %vm510_vm7, %v502_v19, %v394_v34 }
 0x12a   : > { %v520_v41 = vsel %vm519_vm8, %v511_v38, %v418_v39 }
 0x12f   : > { %v442_v42 = vpop.permute.xlu0 %441 }
 0x130   : > { %v529_v43 = vsel %vm528_vm9, %v520_v41, %v442_v42 }
 0x131   : > { %774 = vmatpush.xpose.msk.msra.mxu0 %vm600_vm10, %v529_v43  ;;  %807 = vmatpush.xpose.msk.msra.mxu1 %vm600_vm10, %v529_v43 }
 0x132   : > { %808 = vmatpush.xpose.msk.msra.mxu2 %vm600_vm10, %v529_v43  ;;  %809 = vmatpush.xpose.msk.msra.mxu3 %vm600_vm10, %v529_v43 }
 0x134   : > { %775 = vmatmul.msk.f32.vlgmr.msra.gmra.mxu0 %vm600_vm10, %v537_v12  ;;  %776 = vmatmul.msk.f32.vlgmr.msra.gmra.mxu1 %vm600_vm10, %v538_v44  ;;  %v563_v49 = vpop.permute.xlu2 %562 }
 0x135   : > { %778 = vmatmul.msk.f32.vlgmr.msra.gmra.mxu2 %vm600_vm10, %v540_v45  ;;  %781 = vmatmul.msk.f32.vlgmr.msra.gmra.mxu3 %vm600_vm10, %v543_v0 }
 0x13c   : > { %777 = vmatmul.msk.f32.gmra.mxu1 %vm600_vm10, %v539_v46  ;;  %v578_v18 = vpop.permute.xlu2 %577 }
 0x13d   : > { %779 = vmatmul.msk.f32.gmra.mxu2 %vm600_vm10, %v541_v47  ;;  %782 = vmatmul.msk.f32.gmra.mxu3 %vm600_vm10, %v544_v48 }
 0x145   : > { %780 = vmatmul.msk.f32.gmra.mxu2 %vm600_vm10, %v542_v7  ;;  %783 = vmatmul.msk.f32.gmra.mxu3 %vm600_vm10, %v545_v9 }
 0x14a   : > { %v588_v35 = vpop.permute.xlu2 %587 }
 0x14c   : > { %v568_v54 = vpop.permute.xlu0 %567 }
 0x153   : > { %v558_v50 = vpop.permute.xlu1 %557 }
 0x15b   : > { %v573_v53 = vpop.permute.xlu1 %572 }
 0x163   : > { %v583_v59 = vpop.permute.xlu1 %582 }
 0x16b   : > { %v598_v62 = vpop.permute.xlu1 %597 }
 0x18b   : > { %v593_v60 = vpop.permute.xlu0 %592 }
 0x1b1   : > { %v669_v15 = vpop.f32.mrf.mxu0  ;;  %v672_v30 = vpop.f32.mrf.mxu1 }
 0x1b2   : > { %v670_v51 = vadd.f32 %v669_v15, %v558_v50  ;;  %v673_v52 = vadd.f32 %v672_v30, %v563_v49 }
 0x1b4   : > { %696 = vst.msk [vmem:[%s1284_s15] sm:$0xff] %vm528_vm9, %v670_v51 }
 0x1b5   : > { %697 = vst.msk [vmem:[%s1284_s15 + $0x8] sm:$0xff] %vm528_vm9, %v673_v52 }
 0x1b8   : > { %v678_v55 = vpop.f32.mrf.mxu2  ;;  %v687_v28 = vpop.f32.mrf.mxu3 }
 0x1b9   : > { %v679_v29 = vadd.f32 %v678_v55, %v573_v53  ;;  %v688_v56 = vadd.f32 %v687_v28, %v588_v35  ;;  %v675_v57 = vpop.f32.mrf.mxu1 }
 0x1ba   : > { %v676_v58 = vadd.f32 %v675_v57, %v568_v54 }
 0x1bb   : > { %699 = vst.msk [vmem:[%s1284_s15 + $0x18] sm:$0xff] %vm528_vm9, %v679_v29 }
 0x1bc   : > { %702 = vst.msk [vmem:[%s1284_s15 + $0x30] sm:$0xff] %vm528_vm9, %v688_v56 }
 0x1bd   : > { %698 = vst.msk [vmem:[%s1284_s15 + $0x10] sm:$0xff] %vm528_vm9, %v676_v58 }
 0x1c0   : > { %v681_v2 = vpop.f32.mrf.mxu2  ;;  %v690_v17 = vpop.f32.mrf.mxu3 }
 0x1c1   : > { %v682_v31 = vadd.f32 %v681_v2, %v578_v18  ;;  %v691_v61 = vadd.f32 %v690_v17, %v593_v60 }
 0x1c3   : > { %700 = vst.msk [vmem:[%s1284_s15 + $0x20] sm:$0xff] %vm528_vm9, %v682_v31 }
 0x1c4   : > { %703 = vst.msk [vmem:[%s1284_s15 + $0x38] sm:$0xff] %vm528_vm9, %v691_v61 }
 0x1c8   : > { %v684_v63 = vpop.f32.mrf.mxu2  ;;  %v693_v3 = vpop.f32.mrf.mxu3 }
 0x1c9   : > { %v685_v40 = vadd.f32 %v684_v63, %v583_v59  ;;  %v694_v4 = vadd.f32 %v693_v3, %v598_v62 }
 0x1cb   : > { %701 = vst.msk [vmem:[%s1284_s15 + $0x28] sm:$0xff] %vm528_vm9, %v685_v40 }
 0x1cc   : > { %704 = vst.msk [vmem:[%s1284_s15 + $0x40] sm:$0xff] %vm528_vm9, %v694_v4 }
 0x1cd PF: > { %s13_s12 = sadd.s32 1, %s838_s12  }
 0x1ce   : > { %p10_p4 = scmp.ge.s32.totalorder %s13_s12, 4  }
 0x1d0   :  { %12 = sbr.rel (!%p10_p4) target bundleno = 1 (0x1), region = 62 }

// kernel: ssd_box_head_forward.3
= control target key start
LH: loop header
LB: loop body
LE: loop exit
PB: predicated region body
PF: predicated region fallthrough
CT: control target
= control target key end

     0   :  { %s1960_s12 = smov 0   ;;  %s3916_s0 = inlined_call_operand.vmem [shape: f32[2,18,18,4], index: 0, kind: input, shape index: {}]   ;;  %s3917_s1 = inlined_call_operand.vmem [shape: f32[48,36], index: 1, kind: input, shape index: {}]   ;;  %s3918_s2 = inlined_call_operand.vmem [shape: f32[48,1], index: 2, kind: input, shape index: {}]   ;;  %s3919_s3 = inlined_call_operand.vmem [shape: f32[2,48,256], index: 3, kind: output, shape index: {}]  }
   0x1 LB: > { %s1787_s13 = sadd.s32 4294967295, %s1929_s12   ;;  %p1791_p0 = scmp.ge.s32.totalorder %s1929_s12, 1  ;;  %s1929_s12 = sphi %s1960_s12, %s13_s12  }
   0x2   : > { %p137_p1 = scmp.lt.s32.totalorder %s1929_s12, 3 }
   0x4   : > { %p138_p2 = pnand %p1791_p0, %p137_p1 }
   0x6   : > { %141 = sbr.rel (%p138_p2) target bundleno = 972 (0x3cc), region = 32 }
   0xb   : > { %p161_p3 = scmp.lt.s32.totalorder %s1787_s13, 1  ;;  %vm273_vm0 = vcmask 1046528   ;;  %s1931_s18 = smov 4   ;;  %vm354_vm1 = vcmask 1045504   ;;  %vm1229_vm2 = vcmask 31744   ;;  %vm1262_vm3 = vcmask 64512  }
   0xc   : > { %s1932_s19 = smov 8   ;;  %s1933_s20 = smov 12   ;;  %vm1295_vm4 = vcmask 97280   ;;  %vm1328_vm5 = vcmask 130048   ;;  %vm1361_vm6 = vcmask 162816   ;;  %vm1394_vm7 = vcmask 195584  }
   0xd   : > { %s4350_s13 = smov (!%p161_p3, %s1787_s13), 1  ;;  %s1934_s21 = smov 16   ;;  %vm1427_vm8 = vcmask 228352   ;;  %vm1460_vm9 = vcmask 261120   ;;  %vm1535_vm10 = vcmask 293888  }
   0xe   : > { %s1872_s14 = smul.u32 432, %s4350_s13  ;;  %s1935_s22 = smov 20  }
   0xf   : > { %s1936_s23 = smov 24   ;;  %s1937_s24 = smov 28  }
  0x10   : > { %s1974_s17 = scalar_lea.vmem %s3916_s0, %s1872_s14  ;;  %s1938_s25 = smov 32  }
  0x11   : > { %v1977_v0 = vld [vmem:[%s1974_s17 + $0x30] sm:$0xff]  ;;  %v1980_v1 = vld [vmem:[%s1974_s17 + $0x38] sm:$0xff]  ;;  %v1988_v5 = vld [vmem:[%s1974_s17 + $0x20] sm:$0xff] }
  0x12   : > { %v1983_v2 = vld [vmem:[%s1974_s17 + $0x18] sm:$0xff]  ;;  %v284_v3 = vrot.slane %v1977_v0, 1  ;;  %v285_v4 = vrot.slane %v1980_v1, 1  ;;  %v1992_v7 = vld [vmem:[%s1974_s17] sm:$0xff]  ;;  %v1995_v8 = vld [vmem:[%s1974_s17 + $0x8] sm:$0xff]  ;;  %v280_v9 = vrot.slane %v1988_v5, 1 }
  0x13   : > { %v279_v6 = vrot.slane %v1983_v2, 1  ;;  %v274_v10 = vrot.slane %v1992_v7, 1  ;;  %v275_v11 = vrot.slane %v1995_v8, 1  ;;  %v2001_v12 = vld [vmem:[%s1974_s17 + $0x40] sm:$0x3]  ;;  %v2035_v25 = vld [vmem:[%s1974_s17 + $0x68] sm:$0xff] }
  0x14   : > { %v2004_v13 = vsel %vm273_vm0, %v284_v3, %v285_v4  ;;  %v2007_v14 = vld [vmem:[%s1974_s17 + $0x28] sm:$0x3]  ;;  %v2010_v15 = vld [vmem:[%s1974_s17 + $0x10] sm:$0x3]  ;;  %v287_v18 = vrot.slane %v2001_v12, 1  ;;  %v2032_v24 = vld [vmem:[%s1974_s17 + $0x60] sm:$0xff] }
  0x15   : > { %4012 = vst [vmem:[#allocation2_spill] sm:$0xff] %v2004_v13  ;;  %469 = vrot.lane.b32.xlu2 %v2004_v13, %s1931_s18  ;;  %v2015_v16 = vsel %vm273_vm0, %v279_v6, %v280_v9  ;;  %v276_v17 = vsel %vm273_vm0, %v274_v10, %v275_v11  ;;  %v282_v19 = vrot.slane %v2007_v14, 1  ;;  %v277_v20 = vrot.slane %v2010_v15, 1  ;;  %v2038_v26 = vld [vmem:[%s1974_s17 + $0x50] sm:$0xff]  ;;  %v2041_v27 = vld [vmem:[%s1974_s17 + $0x58] sm:$0x3] }
  0x16   : > { %465 = vrot.lane.b32.xlu1 %v2015_v16, %s1931_s18  ;;  %461 = vrot.lane.b32.xlu0 %v276_v17, %s1931_s18  ;;  %v2025_v21 = vsel %vm273_vm0, %v285_v4, %v287_v18  ;;  %v2044_v28 = vld [vmem:[%s1974_s17 + $0x48] sm:$0xff]  ;;  %v294_v29 = vrot.slane %v2032_v24, 1  ;;  %v295_v30 = vrot.slane %v2035_v25, 1  ;;  %v290_v31 = vrot.slane %v2038_v26, 1  ;;  %v2066_v37 = vld [vmem:[%s1974_s17 + $0x80] sm:$0xff] }
  0x17   : > { %4013 = vst [vmem:[#allocation3_spill] sm:$0xff] %v2025_v21  ;;  %v2028_v22 = vsel %vm273_vm0, %v280_v9, %v282_v19  ;;  %v278_v23 = vsel %vm273_vm0, %v275_v11, %v277_v20  ;;  %v292_v32 = vrot.slane %v2041_v27, 1  ;;  %v289_v33 = vrot.slane %v2044_v28, 1  ;;  %v2069_v38 = vld [vmem:[%s1974_s17 + $0x88] sm:$0x3]  ;;  %v2072_v39 = vld [vmem:[%s1974_s17 + $0x78] sm:$0xff] }
  0x18   : > { %v2057_v34 = vsel %vm273_vm0, %v294_v29, %v295_v30  ;;  %v2075_v40 = vld [vmem:[%s1974_s17 + $0x70] sm:$0x3]  ;;  %v300_v41 = vrot.slane %v2066_v37, 1  ;;  %v302_v42 = vrot.slane %v2069_v38, 1  ;;  %v299_v43 = vrot.slane %v2072_v39, 1  ;;  %v2097_v48 = vld [vmem:[%s1974_s17 + $0xa8] sm:$0xff] }
  0x19   : > { %4014 = vst [vmem:[#allocation4_spill] sm:$0xff] %v2057_v34  ;;  %v2060_v35 = vsel %vm273_vm0, %v290_v31, %v292_v32  ;;  %v2063_v36 = vsel %vm273_vm0, %v289_v33, %v290_v31  ;;  %v297_v44 = vrot.slane %v2075_v40, 1  ;;  %v2100_v49 = vld [vmem:[%s1974_s17 + $0xb0] sm:$0xff]  ;;  %v2103_v50 = vld [vmem:[%s1974_s17 + $0x98] sm:$0xff]  ;;  %v2106_v51 = vld [vmem:[%s1974_s17 + $0xa0] sm:$0x3] }
  0x1a   : > { %4015 = vst [vmem:[#allocation5_spill] sm:$0xff] %v2060_v35  ;;  %v2088_v45 = vsel %vm273_vm0, %v300_v41, %v302_v42  ;;  %v2091_v46 = vsel %vm273_vm0, %v299_v43, %v300_v41  ;;  %v2109_v52 = vld [vmem:[%s1974_s17 + $0x90] sm:$0xff]  ;;  %v309_v53 = vrot.slane %v2097_v48, 1  ;;  %v310_v54 = vrot.slane %v2100_v49, 1  ;;  %v2132_v61 = vld [vmem:[%s1974_s17 + $0xc8] sm:$0xff]  ;;  %v2138_v63 = vld [vmem:[%s1974_s17 + $0xc0] sm:$0xff] }
  0x1b   : > { %4016 = vst [vmem:[#allocation6_spill] sm:$0xff] %v2063_v36  ;;  %v2094_v47 = vsel %vm273_vm0, %v295_v30, %v297_v44  ;;  %v305_v55 = vrot.slane %v2103_v50, 1  ;;  %v307_v56 = vrot.slane %v2106_v51, 1  ;;  %v304_v57 = vrot.slane %v2109_v52, 1  ;;  %v2135_v62 = vld [vmem:[%s1974_s17 + $0xd0] sm:$0x3] }
  0x1c   : > { %4017 = vst [vmem:[#allocation7_spill] sm:$0xff] %v2088_v45  ;;  %v2123_v58 = vsel %vm273_vm0, %v309_v53, %v310_v54  ;;  %v2141_v3 = vld [vmem:[%s1974_s17 + $0xb8] sm:$0x3]  ;;  %v315_v4 = vrot.slane %v2132_v61, 1  ;;  %v317_v6 = vrot.slane %v2135_v62, 1  ;;  %v314_v9 = vrot.slane %v2138_v63, 1 }
  0x1d   : > { %471 = vrot.lane.b32.xlu2 %v2025_v21, %s1931_s18  ;;  %4018 = vst [vmem:[#allocation8_spill] sm:$0xff] %v2091_v46  ;;  %v2126_v59 = vsel %vm273_vm0, %v305_v55, %v307_v56  ;;  %v2129_v60 = vsel %vm273_vm0, %v304_v57, %v305_v55  ;;  %v312_v10 = vrot.slane %v2141_v3, 1  ;;  %v2163_v19 = vld [vmem:[%s1974_s17 + $0xf0] sm:$0xff]  ;;  %v2166_v20 = vld [vmem:[%s1974_s17 + $0xf8] sm:$0xff]  ;;  %v2172_v29 = vld [vmem:[%s1974_s17 + $0xe8] sm:$0x3] }
  0x1e   : > { %467 = vrot.lane.b32.xlu1 %v2028_v22, %s1931_s18  ;;  %463 = vrot.lane.b32.xlu0 %v278_v23, %s1931_s18  ;;  %4019 = vst [vmem:[#allocation9_spill] sm:$0xff] %v2094_v47  ;;  %v2154_v11 = vsel %vm273_vm0, %v315_v4, %v317_v6  ;;  %v2157_v17 = vsel %vm273_vm0, %v314_v9, %v315_v4  ;;  %v2169_v23 = vld [vmem:[%s1974_s17 + $0xe0] sm:$0xff]  ;;  %v2175_v30 = vld [vmem:[%s1974_s17 + $0xd8] sm:$0xff]  ;;  %v324_v31 = vrot.slane %v2163_v19, 1  ;;  %v325_v32 = vrot.slane %v2166_v20, 1 }
  0x1f   : > { %4020 = vst [vmem:[#allocation10_spill] sm:$0xff] %v2123_v58  ;;  %v2160_v18 = vsel %vm273_vm0, %v310_v54, %v312_v10  ;;  %v320_v33 = vrot.slane %v2169_v23, 1  ;;  %v322_v41 = vrot.slane %v2172_v29, 1  ;;  %v319_v42 = vrot.slane %v2175_v30, 1  ;;  %v2198_v54 = vld [vmem:[%s1974_s17 + $0x110] sm:$0xff]  ;;  %v2204_v56 = vld [vmem:[%s1974_s17 + $0x108] sm:$0xff] }
  0x20   : > { %4021 = vst [vmem:[#allocation11_spill] sm:$0xff] %v2126_v59  ;;  %v2189_v43 = vsel %vm273_vm0, %v324_v31, %v325_v32  ;;  %v2201_v55 = vld [vmem:[%s1974_s17 + $0x118] sm:$0x3]  ;;  %v2207_v57 = vld [vmem:[%s1974_s17 + $0x100] sm:$0x3]  ;;  %v330_v4 = vrot.slane %v2198_v54, 1 }
  0x21   : > { %4022 = vst [vmem:[#allocation12_spill] sm:$0xff] %v2129_v60  ;;  %v2192_v44 = vsel %vm273_vm0, %v320_v33, %v322_v41  ;;  %v2195_v53 = vsel %vm273_vm0, %v319_v42, %v320_v33  ;;  %v332_v6 = vrot.slane %v2201_v55, 1  ;;  %v329_v9 = vrot.slane %v2204_v56, 1  ;;  %v2229_v42 = vld [vmem:[%s1974_s17 + $0x138] sm:$0xff] }
  0x22   : > { %4023 = vst [vmem:[#allocation13_spill] sm:$0xff] %v2154_v11  ;;  %v327_v10 = vrot.slane %v2207_v57, 1 }
  0x23   : > { %4024 = vst [vmem:[#allocation14_spill] sm:$0xff] %v2157_v17  ;;  %v2220_v31 = vsel %vm273_vm0, %v330_v4, %v332_v6  ;;  %v2223_v33 = vsel %vm273_vm0, %v329_v9, %v330_v4  ;;  %v2241_v6 = vld [vmem:[%s1974_s17 + $0x120] sm:$0xff] }
  0x24   : > { %4025 = vst [vmem:[#allocation15_spill] sm:$0xff] %v2160_v18  ;;  %v2226_v41 = vsel %vm273_vm0, %v325_v32, %v327_v10  ;;  %v339_v32 = vrot.slane %v2229_v42, 1 }
  0x25   : > { %477 = vrot.lane.b32.xlu2 %v2057_v34, %s1931_s18  ;;  %4026 = vst [vmem:[#allocation16_spill] sm:$0xff] %v2189_v43  ;;  %v2301_v34 = vld [vmem:[%s1974_s17 + $0x168] sm:$0xff] }
  0x26   : > { %475 = vrot.lane.b32.xlu1 %v2060_v35, %s1931_s18  ;;  %473 = vrot.lane.b32.xlu0 %v2063_v36, %s1931_s18  ;;  %4027 = vst [vmem:[#allocation17_spill] sm:$0xff] %v2192_v44 }
  0x27   : > { %4028 = vst [vmem:[#allocation18_spill] sm:$0xff] %v2195_v53 }
  0x28   : > { %4029 = vst [vmem:[#allocation19_spill] sm:$0xff] %v2220_v31 }
  0x29   : > { %4030 = vst [vmem:[#allocation20_spill] sm:$0xff] %v2223_v33 }
  0x2a   : > { %4031 = vst [vmem:[#allocation21_spill] sm:$0xff] %v2226_v41 }
  0x2d   : > { %483 = vrot.lane.b32.xlu2 %v2088_v45, %s1931_s18  ;;  %v2273_v45 = vld [vmem:[%s1974_s17 + $0x148] sm:$0x3] }
  0x2e   : > { %481 = vrot.lane.b32.xlu1 %v2091_v46, %s1931_s18  ;;  %479 = vrot.lane.b32.xlu0 %v2094_v47, %s1931_s18 }
  0x35   : > { %489 = vrot.lane.b32.xlu2 %v2123_v58, %s1931_s18 }
  0x36   : > { %487 = vrot.lane.b32.xlu1 %v2126_v59, %s1931_s18  ;;  %485 = vrot.lane.b32.xlu0 %v2129_v60, %s1931_s18 }
  0x3d   : > { %495 = vrot.lane.b32.xlu2 %v2154_v11, %s1931_s18  ;;  %v2235_v11 = vld [vmem:[%s1974_s17 + $0x128] sm:$0xff] }
  0x3e   : > { %493 = vrot.lane.b32.xlu1 %v2157_v17, %s1931_s18  ;;  %491 = vrot.lane.b32.xlu0 %v2160_v18, %s1931_s18  ;;  %v335_v9 = vrot.slane %v2235_v11, 1  ;;  %v2267_v18 = vld [vmem:[%s1974_s17 + $0x160] sm:$0x3]  ;;  %v2270_v17 = vld [vmem:[%s1974_s17 + $0x150] sm:$0xff] }
  0x45   : > { %501 = vrot.lane.b32.xlu2 %v2189_v43, %s1931_s18  ;;  %v2232_v43 = vld [vmem:[%s1974_s17 + $0x140] sm:$0xff] }
  0x46   : > { %499 = vrot.lane.b32.xlu1 %v2192_v44, %s1931_s18  ;;  %497 = vrot.lane.b32.xlu0 %v2195_v53, %s1931_s18  ;;  %4032 = vst [vmem:[#allocation22_spill] sm:$0xff] %v2232_v43  ;;  %v2238_v53 = vld [vmem:[%s1974_s17 + $0x130] sm:$0x3]  ;;  %v340_v4 = vrot.slane %v2232_v43, 1  ;;  %v334_v44 = vrot.slane %v2241_v6, 1 }
  0x47   : > { %v337_v10 = vrot.slane %v2238_v53, 1 }
  0x48   : > { %v2255_v58 = vsel %vm273_vm0, %v339_v32, %v340_v4  ;;  %v347_v32 = vrot.slane %v2267_v18, 1 }
  0x49   : > { %4033 = vst [vmem:[#allocation23_spill] sm:$0xff] %v2255_v58 }
  0x4d   : > { %507 = vrot.lane.b32.xlu2 %v2220_v31, %s1931_s18  ;;  %v2258_v31 = vsel %vm273_vm0, %v335_v9, %v337_v10  ;;  %v342_v10 = vrot.slane %v2273_v45, 1 }
  0x4e   : > { %505 = vrot.lane.b32.xlu1 %v2223_v33, %s1931_s18  ;;  %503 = vrot.lane.b32.xlu0 %v2226_v41, %s1931_s18  ;;  %4034 = vst [vmem:[#allocation24_spill] sm:$0xff] %v2258_v31  ;;  %v2261_v33 = vsel %vm273_vm0, %v334_v44, %v335_v9  ;;  %v2264_v41 = vld [vmem:[%s1974_s17 + $0x158] sm:$0xff]  ;;  %v344_v9 = vrot.slane %v2270_v17, 1 }
  0x4f   : > { %4035 = vst [vmem:[#allocation25_spill] sm:$0xff] %v2261_v33  ;;  %v345_v44 = vrot.slane %v2264_v41, 1 }
  0x51   : > { %v2286_v60 = vsel %vm273_vm0, %v345_v44, %v347_v32  ;;  %v2289_v59 = vsel %vm273_vm0, %v344_v9, %v345_v44  ;;  %v355_v44 = vrot.slane %v1992_v7, 2  ;;  %v361_v7 = vrot.slane %v1988_v5, 2 }
  0x52   : > { %4036 = vst [vmem:[#allocation26_spill] sm:$0xff] %v2286_v60 }
  0x53   : > { %4037 = vst [vmem:[#allocation27_spill] sm:$0xff] %v2289_v59 }
  0x55   : > { %513 = vrot.lane.b32.xlu2 %v2255_v58, %s1931_s18  ;;  %v2292_v58 = vsel %vm273_vm0, %v340_v4, %v342_v10  ;;  %v356_v4 = vrot.slane %v1995_v8, 2  ;;  %v349_v10 = vrot.slane %v2301_v34, 1  ;;  %v363_v8 = vrot.slane %v2007_v14, 2 }
  0x56   : > { %511 = vrot.lane.b32.xlu1 %v2258_v31, %s1931_s18  ;;  %509 = vrot.lane.b32.xlu0 %v2261_v33, %s1931_s18  ;;  %4038 = vst [vmem:[#allocation28_spill] sm:$0xff] %v2292_v58  ;;  %v2295_v31 = vld [vmem:[%s1974_s17 + $0x170] sm:$0xff]  ;;  %v2298_v33 = vld [vmem:[%s1974_s17 + $0x178] sm:$0x3]  ;;  %v370_v14 = vrot.slane %v2044_v28, 2 }
  0x57   : > { %v350_v32 = vrot.slane %v2295_v31, 1  ;;  %v352_v9 = vrot.slane %v2298_v33, 1  ;;  %v357_v47 = vsel %vm354_vm1, %v355_v44, %v356_v4  ;;  %v360_v44 = vrot.slane %v1983_v2, 2 }
  0x5d   : > { %519 = vrot.lane.b32.xlu2 %v2286_v60, %s1931_s18  ;;  %v2316_v60 = vsel %vm273_vm0, %v350_v32, %v352_v9  ;;  %v358_v9 = vrot.slane %v2010_v15, 2  ;;  %v371_v15 = vrot.slane %v2038_v26, 2 }
  0x5e   : > { %517 = vrot.lane.b32.xlu1 %v2289_v59, %s1931_s18  ;;  %515 = vrot.lane.b32.xlu0 %v2292_v58, %s1931_s18  ;;  %4039 = vst [vmem:[#allocation29_spill] sm:$0xff] %v2316_v60  ;;  %v2319_v59 = vsel %vm273_vm0, %v349_v10, %v350_v32  ;;  %v2331_v32 = vsel %vm354_vm1, %v361_v7, %v363_v8  ;;  %v366_v8 = vrot.slane %v1980_v1, 2 }
  0x5f   : > { %4040 = vst [vmem:[#allocation30_spill] sm:$0xff] %v2319_v59  ;;  %v2334_v10 = vsel %vm354_vm1, %v360_v44, %v361_v7  ;;  %v368_v7 = vrot.slane %v2001_v12, 2  ;;  %v2350_v44 = vsel %vm354_vm1, %v370_v14, %v371_v15  ;;  %v376_v12 = vrot.slane %v2035_v25, 2 }
  0x60   : > { %4041 = vst [vmem:[#allocation31_spill] sm:$0xff] %v2331_v32  ;;  %v378_v14 = vrot.slane %v2075_v40, 2  ;;  %v386_v40 = vrot.slane %v2103_v50, 2 }
  0x61   : > { %4043 = vst [vmem:[#allocation33_spill] sm:$0xff] %v2350_v44 }
  0x65   : > { %557 = vrot.lane.b32.xlu2 %v357_v47, %s1932_s19  ;;  %v359_v47 = vsel %vm354_vm1, %v356_v4, %v358_v9  ;;  %v365_v4 = vrot.slane %v1977_v0, 2  ;;  %v2353_v9 = vsel %vm354_vm1, %v366_v8, %v368_v7  ;;  %v375_v7 = vrot.slane %v2032_v24, 2 }
  0x66   : > { %523 = vrot.lane.b32.xlu1 %v2316_v60, %s1931_s18  ;;  %521 = vrot.lane.b32.xlu0 %v2319_v59, %s1931_s18  ;;  %4044 = vst [vmem:[#allocation34_spill] sm:$0xff] %v2353_v9 }
  0x6d   : > { %563 = vrot.lane.b32.xlu2 %v2331_v32, %s1932_s19 }
  0x6e   : > { %561 = vrot.lane.b32.xlu1 %v2334_v10, %s1932_s19  ;;  %559 = vrot.lane.b32.xlu0 %v359_v47, %s1932_s19  ;;  %v2356_v47 = vsel %vm354_vm1, %v365_v4, %v366_v8  ;;  %v373_v8 = vrot.slane %v2041_v27, 2  ;;  %v2371_v4 = vsel %vm354_vm1, %v376_v12, %v378_v14  ;;  %v385_v27 = vrot.slane %v2109_v52, 2 }
  0x6f   : > { %v2344_v59 = vpop.permute.xlu2 %469  ;;  %4045 = vst [vmem:[#allocation35_spill] sm:$0xff] %v2356_v47 }
  0x70   : > { %4042 = vst [vmem:[#allocation32_spill] sm:$0xff] %v2344_v59  ;;  %v2377_v32 = vsel %vm354_vm1, %v371_v15, %v373_v8  ;;  %v383_v15 = vrot.slane %v2069_v38, 2  ;;  %v2393_v8 = vsel %vm354_vm1, %v385_v27, %v386_v40  ;;  %v391_v38 = vrot.slane %v2100_v49, 2 }
  0x71   : > { %4047 = vst [vmem:[#allocation37_spill] sm:$0xff] %v2371_v4  ;;  %v393_v27 = vrot.slane %v2141_v3, 2  ;;  %v401_v3 = vrot.slane %v2169_v23, 2 }
  0x72   : > { %4049 = vst [vmem:[#allocation39_spill] sm:$0xff] %v2377_v32 }
  0x73   : > { %4051 = vst [vmem:[#allocation41_spill] sm:$0xff] %v2393_v8 }
  0x75   : > { %569 = vrot.lane.b32.xlu2 %v2350_v44, %s1932_s19  ;;  %v2374_v44 = vsel %vm354_vm1, %v375_v7, %v376_v12  ;;  %v381_v12 = vrot.slane %v2066_v37, 2  ;;  %v380_v7 = vrot.slane %v2072_v39, 2 }
  0x76   : > { %567 = vrot.lane.b32.xlu1 %v2353_v9, %s1932_s19  ;;  %565 = vrot.lane.b32.xlu0 %v2356_v47, %s1932_s19  ;;  %4048 = vst [vmem:[#allocation38_spill] sm:$0xff] %v2374_v44 }
  0x77   : > { %v2366_v59 = vpop.permute.xlu2 %471 }
  0x78   : > { %4046 = vst [vmem:[#allocation36_spill] sm:$0xff] %v2366_v59  ;;  %v2396_v59 = vsel %vm354_vm1, %v381_v12, %v383_v15  ;;  %v390_v15 = vrot.slane %v2097_v48, 2 }
  0x79   : > { %4052 = vst [vmem:[#allocation42_spill] sm:$0xff] %v2396_v59 }
  0x7d   : > { %575 = vrot.lane.b32.xlu2 %v2371_v4, %s1932_s19  ;;  %v2399_v4 = vsel %vm354_vm1, %v380_v7, %v381_v12  ;;  %v388_v12 = vrot.slane %v2106_v51, 2  ;;  %v400_v51 = vrot.slane %v2175_v30, 2 }
  0x7e   : > { %573 = vrot.lane.b32.xlu1 %v2374_v44, %s1932_s19  ;;  %571 = vrot.lane.b32.xlu0 %v2377_v32, %s1932_s19  ;;  %4053 = vst [vmem:[#allocation43_spill] sm:$0xff] %v2399_v4 }
  0x7f   : > { %v2387_v14 = vpop.permute.xlu2 %477 }
  0x80   : > { %4050 = vst [vmem:[#allocation40_spill] sm:$0xff] %v2387_v14 }
  0x85   : > { %581 = vrot.lane.b32.xlu2 %v2393_v8, %s1932_s19  ;;  %v2418_v8 = vsel %vm354_vm1, %v391_v38, %v393_v27 }
  0x86   : > { %579 = vrot.lane.b32.xlu1 %v2396_v59, %s1932_s19  ;;  %577 = vrot.lane.b32.xlu0 %v2399_v4, %s1932_s19  ;;  %4057 = vst [vmem:[#allocation47_spill] sm:$0xff] %v2418_v8  ;;  %v2421_v59 = vsel %vm354_vm1, %v390_v15, %v391_v38  ;;  %v2424_v4 = vsel %vm354_vm1, %v386_v40, %v388_v12  ;;  %v396_v38 = vrot.slane %v2132_v61, 2  ;;  %v398_v40 = vrot.slane %v2135_v62, 2 }
  0x87   : > { %v2409_v14 = vpop.permute.xlu2 %483  ;;  %4058 = vst [vmem:[#allocation48_spill] sm:$0xff] %v2421_v59  ;;  %v395_v15 = vrot.slane %v2138_v63, 2  ;;  %v406_v62 = vrot.slane %v2166_v20, 2 }
  0x88   : > { %4054 = vst [vmem:[#allocation44_spill] sm:$0xff] %v2409_v14  ;;  %v2413_v7 = vpop.permute.xlu1 %465  ;;  %v2415_v32 = vpop.permute.xlu0 %461 }
  0x89   : > { %4055 = vst [vmem:[#allocation45_spill] sm:$0xff] %v2413_v7  ;;  %v2444_v7 = vsel %vm354_vm1, %v400_v51, %v401_v3  ;;  %v408_v51 = vrot.slane %v2207_v57, 2  ;;  %v416_v57 = vrot.slane %v2235_v11, 2 }
  0x8a   : > { %4056 = vst [vmem:[#allocation46_spill] sm:$0xff] %v2415_v32  ;;  %v2447_v32 = vsel %vm354_vm1, %v396_v38, %v398_v40  ;;  %v405_v40 = vrot.slane %v2163_v19, 2 }
  0x8b   : > { %4059 = vst [vmem:[#allocation49_spill] sm:$0xff] %v2424_v4 }
  0x8c   : > { %4063 = vst [vmem:[#allocation53_spill] sm:$0xff] %v2444_v7 }
  0x8d   : > { %587 = vrot.lane.b32.xlu2 %v2418_v8, %s1932_s19  ;;  %4064 = vst [vmem:[#allocation54_spill] sm:$0xff] %v2447_v32  ;;  %v2450_v8 = vsel %vm354_vm1, %v395_v15, %v396_v38  ;;  %v403_v38 = vrot.slane %v2172_v29, 2  ;;  %v415_v29 = vrot.slane %v2241_v6, 2 }
  0x8e   : > { %585 = vrot.lane.b32.xlu1 %v2421_v59, %s1932_s19  ;;  %583 = vrot.lane.b32.xlu0 %v2424_v4, %s1932_s19  ;;  %4065 = vst [vmem:[#allocation55_spill] sm:$0xff] %v2450_v8 }
  0x8f   : > { %v2434_v27 = vpop.permute.xlu2 %489 }
  0x90   : > { %4060 = vst [vmem:[#allocation50_spill] sm:$0xff] %v2434_v27  ;;  %v2439_v12 = vpop.permute.xlu1 %467  ;;  %v2441_v14 = vpop.permute.xlu0 %463 }
  0x91   : > { %4061 = vst [vmem:[#allocation51_spill] sm:$0xff] %v2439_v12 }
  0x92   : > { %4062 = vst [vmem:[#allocation52_spill] sm:$0xff] %v2441_v14  ;;  %v2469_v14 = vsel %vm354_vm1, %v406_v62, %v408_v51 }
  0x93   : > { %4069 = vst [vmem:[#allocation59_spill] sm:$0xff] %v2469_v14 }
  0x95   : > { %593 = vrot.lane.b32.xlu2 %v2444_v7, %s1932_s19  ;;  %v2472_v7 = vsel %vm354_vm1, %v405_v40, %v406_v62  ;;  %v411_v62 = vrot.slane %v2198_v54, 2  ;;  %v410_v40 = vrot.slane %v2204_v56, 2 }
  0x96   : > { %591 = vrot.lane.b32.xlu1 %v2447_v32, %s1932_s19  ;;  %589 = vrot.lane.b32.xlu0 %v2450_v8, %s1932_s19  ;;  %4070 = vst [vmem:[#allocation60_spill] sm:$0xff] %v2472_v7  ;;  %v2475_v8 = vsel %vm354_vm1, %v401_v3, %v403_v38  ;;  %v413_v3 = vrot.slane %v2201_v55, 2  ;;  %v421_v55 = vrot.slane %v2232_v43, 2 }
  0x97   : > { %v2460_v27 = vpop.permute.xlu2 %495 }
  0x98   : > { %4066 = vst [vmem:[#allocation56_spill] sm:$0xff] %v2460_v27  ;;  %v2464_v15 = vpop.permute.xlu1 %475  ;;  %v2466_v12 = vpop.permute.xlu0 %473 }
  0x99   : > { %4067 = vst [vmem:[#allocation57_spill] sm:$0xff] %v2464_v15  ;;  %v2498_v15 = vsel %vm354_vm1, %v411_v62, %v413_v3  ;;  %v420_v3 = vrot.slane %v2229_v42, 2 }
  0x9a   : > { %4068 = vst [vmem:[#allocation58_spill] sm:$0xff] %v2466_v12  ;;  %v2495_v12 = vsel %vm354_vm1, %v415_v29, %v416_v57  ;;  %v423_v29 = vrot.slane %v2273_v45, 2  ;;  %v430_v45 = vrot.slane %v2301_v34, 2 }
  0x9b   : > { %4074 = vst [vmem:[#allocation64_spill] sm:$0xff] %v2495_v12 }
  0x9c   : > { %4075 = vst [vmem:[#allocation65_spill] sm:$0xff] %v2498_v15 }
  0x9d   : > { %599 = vrot.lane.b32.xlu2 %v2469_v14, %s1932_s19  ;;  %v2501_v14 = vsel %vm354_vm1, %v410_v40, %v411_v62  ;;  %v418_v62 = vrot.slane %v2238_v53, 2  ;;  %v431_v53 = vrot.slane %v2295_v31, 2 }
  0x9e   : > { %597 = vrot.lane.b32.xlu1 %v2472_v7, %s1932_s19  ;;  %595 = vrot.lane.b32.xlu0 %v2475_v8, %s1932_s19  ;;  %4076 = vst [vmem:[#allocation66_spill] sm:$0xff] %v2501_v14 }
  0x9f   : > { %v2485_v51 = vpop.permute.xlu2 %501 }
  0xa0   : > { %4071 = vst [vmem:[#allocation61_spill] sm:$0xff] %v2485_v51  ;;  %v2490_v38 = vpop.permute.xlu1 %481  ;;  %v2492_v27 = vpop.permute.xlu0 %479  ;;  %v2520_v51 = vsel %vm354_vm1, %v421_v55, %v423_v29 }
  0xa1   : > { %4072 = vst [vmem:[#allocation62_spill] sm:$0xff] %v2490_v38 }
  0xa2   : > { %4073 = vst [vmem:[#allocation63_spill] sm:$0xff] %v2492_v27 }
  0xa3   : > { %4080 = vst [vmem:[#allocation70_spill] sm:$0xff] %v2520_v51 }
  0xa5   : > { %605 = vrot.lane.b32.xlu2 %v2495_v12, %s1932_s19  ;;  %v2523_v12 = vsel %vm354_vm1, %v420_v3, %v421_v55  ;;  %v426_v55 = vrot.slane %v2264_v41, 2  ;;  %v425_v3 = vrot.slane %v2270_v17, 2 }
  0xa6   : > { %603 = vrot.lane.b32.xlu1 %v2498_v15, %s1932_s19  ;;  %601 = vrot.lane.b32.xlu0 %v2501_v14, %s1932_s19  ;;  %4081 = vst [vmem:[#allocation71_spill] sm:$0xff] %v2523_v12  ;;  %v2526_v14 = vsel %vm354_vm1, %v416_v57, %v418_v62  ;;  %v428_v57 = vrot.slane %v2267_v18, 2 }
  0xa7   : > { %v2511_v27 = vpop.permute.xlu2 %507  ;;  %4082 = vst [vmem:[#allocation72_spill] sm:$0xff] %v2526_v14 }
  0xa8   : > { %4077 = vst [vmem:[#allocation67_spill] sm:$0xff] %v2511_v27  ;;  %v2515_v40 = vpop.permute.xlu1 %487  ;;  %v2517_v38 = vpop.permute.xlu0 %485  ;;  %v2549_v27 = vsel %vm354_vm1, %v426_v55, %v428_v57 }
  0xa9   : > { %4078 = vst [vmem:[#allocation68_spill] sm:$0xff] %v2515_v40 }
  0xaa   : > { %4079 = vst [vmem:[#allocation69_spill] sm:$0xff] %v2517_v38  ;;  %v2546_v38 = vsel %vm354_vm1, %v430_v45, %v431_v53  ;;  %v433_v45 = vrot.slane %v2298_v33, 2 }
  0xab   : > { %4086 = vst [vmem:[#allocation76_spill] sm:$0xff] %v2546_v38 }
  0xac   : > { %4087 = vst [vmem:[#allocation77_spill] sm:$0xff] %v2549_v27 }
  0xad   : > { %611 = vrot.lane.b32.xlu2 %v2520_v51, %s1932_s19  ;;  %v2552_v51 = vsel %vm354_vm1, %v425_v3, %v426_v55  ;;  %v2568_v55 = vsel %vm354_vm1, %v431_v53, %v433_v45 }
  0xae   : > { %609 = vrot.lane.b32.xlu1 %v2523_v12, %s1932_s19  ;;  %607 = vrot.lane.b32.xlu0 %v2526_v14, %s1932_s19  ;;  %4088 = vst [vmem:[#allocation78_spill] sm:$0xff] %v2552_v51 }
  0xaf   : > { %v2536_v29 = vpop.permute.xlu2 %513 }
  0xb0   : > { %4083 = vst [vmem:[#allocation73_spill] sm:$0xff] %v2536_v29  ;;  %v2541_v62 = vpop.permute.xlu1 %493  ;;  %v2543_v40 = vpop.permute.xlu0 %491 }
  0xb1   : > { %4084 = vst [vmem:[#allocation74_spill] sm:$0xff] %v2541_v62 }
  0xb2   : > { %4085 = vst [vmem:[#allocation75_spill] sm:$0xff] %v2543_v40 }
  0xb5   : > { %617 = vrot.lane.b32.xlu2 %v2546_v38, %s1932_s19 }
  0xb6   : > { %615 = vrot.lane.b32.xlu1 %v2549_v27, %s1932_s19  ;;  %613 = vrot.lane.b32.xlu0 %v2552_v51, %s1932_s19 }
  0xb7   : > { %v2560_v18 = vpop.permute.xlu2 %519 }
  0xb8   : > { %4089 = vst [vmem:[#allocation79_spill] sm:$0xff] %v2560_v18  ;;  %v2563_v40 = vpop.permute.xlu1 %499  ;;  %v2565_v57 = vpop.permute.xlu0 %497 }
  0xb9   : > { %4090 = vst [vmem:[#allocation80_spill] sm:$0xff] %v2563_v40 }
  0xbd   : > { %655 = vrot.lane.b32.xlu2 %v1988_v5, %s1933_s20 }
  0xbe   : > { %653 = vrot.lane.b32.xlu1 %v1983_v2, %s1933_s20  ;;  %619 = vrot.lane.b32.xlu0 %v2568_v55, %s1932_s19 }
  0xbf   : > { %v2576_v3 = vpop.permute.xlu2 %557 }
  0xc0   : > { %4091 = vst [vmem:[#allocation81_spill] sm:$0xff] %v2576_v3  ;;  %v2578_v33 = vpop.permute.xlu1 %505  ;;  %v2580_v40 = vpop.permute.xlu0 %503 }
  0xc1   : > { %4092 = vst [vmem:[#allocation82_spill] sm:$0xff] %v2578_v33 }
  0xc5   : > { %661 = vrot.lane.b32.xlu2 %v2044_v28, %s1933_s20 }
  0xc6   : > { %659 = vrot.lane.b32.xlu1 %v1980_v1, %s1933_s20  ;;  %657 = vrot.lane.b32.xlu0 %v1977_v0, %s1933_s20 }
  0xc7   : > { %v2588_v5 = vpop.permute.xlu2 %563 }
  0xc8   : > { %4093 = vst [vmem:[#allocation83_spill] sm:$0xff] %v2588_v5  ;;  %v2590_v2 = vpop.permute.xlu1 %511  ;;  %v2592_v53 = vpop.permute.xlu0 %509 }
  0xc9   : > { %4094 = vst [vmem:[#allocation84_spill] sm:$0xff] %v2590_v2 }
  0xcd   : > { %667 = vrot.lane.b32.xlu2 %v2035_v25, %s1933_s20 }
  0xce   : > { %665 = vrot.lane.b32.xlu1 %v2032_v24, %s1933_s20  ;;  %663 = vrot.lane.b32.xlu0 %v2038_v26, %s1933_s20 }
  0xcf   : > { %v2600_v45 = vpop.permute.xlu2 %569 }
  0xd0   : > { %4095 = vst [vmem:[#allocation85_spill] sm:$0xff] %v2600_v45  ;;  %v2602_v62 = vpop.permute.xlu1 %517  ;;  %v2604_v3 = vpop.permute.xlu0 %515 }
  0xd1   : > { %4096 = vst [vmem:[#allocation86_spill] sm:$0xff] %v2602_v62 }
  0xd2   : > { %4097 = vst [vmem:[#allocation87_spill] sm:$0xff] %v2604_v3  ;;  %v2691_v3 = vld [vmem:[%s1974_s17 + $0x188] sm:$0xff] }
  0xd5   : > { %673 = vrot.lane.b32.xlu2 %v2109_v52, %s1933_s20 }
  0xd6   : > { %671 = vrot.lane.b32.xlu1 %v2066_v37, %s1933_s20  ;;  %669 = vrot.lane.b32.xlu0 %v2072_v39, %s1933_s20 }
  0xd7   : > { %v2612_v5 = vpop.permute.xlu2 %575 }
  0xd8   : > { %4098 = vst [vmem:[#allocation88_spill] sm:$0xff] %v2612_v5  ;;  %v2614_v18 = vpop.permute.xlu1 %523  ;;  %v2616_v2 = vpop.permute.xlu0 %521 }
  0xd9   : > { %4099 = vst [vmem:[#allocation89_spill] sm:$0xff] %v2614_v18 }
  0xda   : > { %4100 = vst [vmem:[#allocation90_spill] sm:$0xff] %v2616_v2 }
  0xdd   : > { %679 = vrot.lane.b32.xlu2 %v2100_v49, %s1933_s20 }
  0xde   : > { %677 = vrot.lane.b32.xlu1 %v2097_v48, %s1933_s20  ;;  %675 = vrot.lane.b32.xlu0 %v2103_v50, %s1933_s20 }
  0xdf   : > { %v2624_v45 = vpop.permute.xlu2 %581 }
  0xe0   : > { %4101 = vst [vmem:[#allocation91_spill] sm:$0xff] %v2624_v45  ;;  %v2626_v62 = vpop.permute.xlu1 %561  ;;  %v2628_v29 = vpop.permute.xlu0 %559 }
  0xe1   : > { %4102 = vst [vmem:[#allocation92_spill] sm:$0xff] %v2626_v62 }
  0xe2   : > { %4103 = vst [vmem:[#allocation93_spill] sm:$0xff] %v2628_v29 }
  0xe5   : > { %685 = vrot.lane.b32.xlu2 %v2175_v30, %s1933_s20 }
  0xe6   : > { %683 = vrot.lane.b32.xlu1 %v2132_v61, %s1933_s20  ;;  %681 = vrot.lane.b32.xlu0 %v2138_v63, %s1933_s20 }
  0xe7   : > { %v2636_v5 = vpop.permute.xlu2 %587 }
  0xe8   : > { %4104 = vst [vmem:[#allocation94_spill] sm:$0xff] %v2636_v5  ;;  %v2638_v18 = vpop.permute.xlu1 %567  ;;  %v2640_v33 = vpop.permute.xlu0 %565 }
  0xe9   : > { %4105 = vst [vmem:[#allocation95_spill] sm:$0xff] %v2638_v18 }
  0xea   : > { %4106 = vst [vmem:[#allocation96_spill] sm:$0xff] %v2640_v33 }
  0xed   : > { %691 = vrot.lane.b32.xlu2 %v2166_v20, %s1933_s20 }
  0xee   : > { %689 = vrot.lane.b32.xlu1 %v2163_v19, %s1933_s20  ;;  %687 = vrot.lane.b32.xlu0 %v2169_v23, %s1933_s20 }
  0xef   : > { %v2648_v45 = vpop.permute.xlu2 %593 }
  0xf0   : > { %v2650_v62 = vpop.permute.xlu1 %573  ;;  %v2652_v29 = vpop.permute.xlu0 %571 }
  0xf1   : > { %4107 = vst [vmem:[#allocation97_spill] sm:$0xff] %v2650_v62 }
  0xf2   : > { %4108 = vst [vmem:[#allocation98_spill] sm:$0xff] %v2652_v29 }
  0xf5   : > { %697 = vrot.lane.b32.xlu2 %v2241_v6, %s1933_s20 }
  0xf6   : > { %695 = vrot.lane.b32.xlu1 %v2198_v54, %s1933_s20  ;;  %693 = vrot.lane.b32.xlu0 %v2204_v56, %s1933_s20 }
  0xf7   : > { %v2660_v5 = vpop.permute.xlu2 %599 }
  0xf8   : > { %v2662_v18 = vpop.permute.xlu1 %579  ;;  %v2664_v33 = vpop.permute.xlu0 %577 }
  0xf9   : > { %4109 = vst [vmem:[#allocation99_spill] sm:$0xff] %v2662_v18 }
  0xfa   : > { %4110 = vst [vmem:[#allocation100_spill] sm:$0xff] %v2664_v33 }
  0xfd   : > { %703 = vrot.lane.b32.xlu2 %v2232_v43, %s1933_s20 }
  0xfe   : > { %701 = vrot.lane.b32.xlu1 %v2229_v42, %s1933_s20  ;;  %699 = vrot.lane.b32.xlu0 %v2235_v11, %s1933_s20 }
  0xff   : > { %v2672_v62 = vpop.permute.xlu2 %605 }
 0x100   : > { %v2674_v29 = vpop.permute.xlu1 %585  ;;  %v2676_v2 = vpop.permute.xlu0 %583 }
 0x101   : > { %4111 = vst [vmem:[#allocation101_spill] sm:$0xff] %v2674_v29  ;;  %v2694_v29 = vld [vmem:[%s1974_s17 + $0x180] sm:$0xff] }
 0x102   : > { %4112 = vst [vmem:[#allocation102_spill] sm:$0xff] %v2676_v2 }
 0x105   : > { %709 = vrot.lane.b32.xlu2 %v2301_v34, %s1933_s20 }
 0x106   : > { %707 = vrot.lane.b32.xlu1 %v2264_v41, %s1933_s20  ;;  %705 = vrot.lane.b32.xlu0 %v2270_v17, %s1933_s20 }
 0x107   : > { %v2684_v18 = vpop.permute.xlu2 %611 }
 0x108   : > { %v2686_v33 = vpop.permute.xlu1 %591  ;;  %v2688_v43 = vpop.permute.xlu0 %589 }
 0x109   : > { %4113 = vst [vmem:[#allocation103_spill] sm:$0xff] %v2686_v33 }
 0x10a   : > { %4114 = vst [vmem:[#allocation104_spill] sm:$0xff] %v2688_v43 }
 0x10d   : > { %715 = vrot.lane.b32.xlu2 %v2691_v3, %s1933_s20 }
 0x10e   : > { %713 = vrot.lane.b32.xlu1 %v2694_v29, %s1933_s20  ;;  %711 = vrot.lane.b32.xlu0 %v2295_v31, %s1933_s20 }
 0x10f   : > { %v2702_v17 = vpop.permute.xlu2 %617 }
 0x110   : > { %v2704_v41 = vpop.permute.xlu1 %597  ;;  %v2706_v2 = vpop.permute.xlu0 %595 }
 0x111   : > { %4115 = vst [vmem:[#allocation105_spill] sm:$0xff] %v2706_v2  ;;  %v4122_v2 = vld [vmem:[#allocation9_spill] sm:$0xff] }
 0x115   : > { %753 = vrot.lane.b32.xlu2 %v2004_v13, %s1934_s21 }
 0x116   : > { %751 = vrot.lane.b32.xlu1 %v2028_v22, %s1934_s21  ;;  %749 = vrot.lane.b32.xlu0 %v2015_v16, %s1934_s21 }
 0x117   : > { %v2714_v33 = vpop.permute.xlu2 %655 }
 0x118   : > { %4116 = vst [vmem:[#allocation106_spill] sm:$0xff] %v2714_v33  ;;  %v2716_v43 = vpop.permute.xlu1 %603  ;;  %v2718_v31 = vpop.permute.xlu0 %601 }
 0x119   : > { %4117 = vst [vmem:[#allocation107_spill] sm:$0xff] %v2716_v43 }
 0x11a   : > { %4118 = vst [vmem:[#allocation108_spill] sm:$0xff] %v2718_v31 }
 0x11d   : > { %759 = vrot.lane.b32.xlu2 %v2060_v35, %s1934_s21  ;;  %v4123_v35 = vld [vmem:[#allocation4_spill] sm:$0xff] }
 0x11e   : > { %757 = vrot.lane.b32.xlu1 %v2063_v36, %s1934_s21  ;;  %755 = vrot.lane.b32.xlu0 %v2025_v21, %s1934_s21 }
 0x11f   : > { %v2726_v13 = vpop.permute.xlu2 %661 }
 0x120   : > { %4119 = vst [vmem:[#allocation109_spill] sm:$0xff] %v2726_v13  ;;  %v2728_v22 = vpop.permute.xlu1 %609  ;;  %v2730_v16 = vpop.permute.xlu0 %607  ;;  %v4127_v13 = vld [vmem:[#allocation11_spill] sm:$0xff] }
 0x121   : > { %4120 = vst [vmem:[#allocation110_spill] sm:$0xff] %v2728_v22 }
 0x122   : > { %4121 = vst [vmem:[#allocation111_spill] sm:$0xff] %v2730_v16  ;;  %v4128_v16 = vld [vmem:[#allocation12_spill] sm:$0xff] }
 0x125   : > { %765 = vrot.lane.b32.xlu2 %v2091_v46, %s1934_s21  ;;  %v4129_v46 = vld [vmem:[#allocation7_spill] sm:$0xff] }
 0x126   : > { %763 = vrot.lane.b32.xlu1 %v4122_v2, %s1934_s21  ;;  %761 = vrot.lane.b32.xlu0 %v4123_v35, %s1934_s21 }
 0x127   : > { %v2738_v31 = vpop.permute.xlu2 %667 }
 0x128   : > { %4124 = vst [vmem:[#allocation112_spill] sm:$0xff] %v2738_v31  ;;  %v2740_v36 = vpop.permute.xlu1 %615  ;;  %v2742_v21 = vpop.permute.xlu0 %613  ;;  %v4133_v31 = vld [vmem:[#allocation14_spill] sm:$0xff] }
 0x129   : > { %4125 = vst [vmem:[#allocation113_spill] sm:$0xff] %v2740_v36 }
 0x12a   : > { %4126 = vst [vmem:[#allocation114_spill] sm:$0xff] %v2742_v21  ;;  %v4134_v21 = vld [vmem:[#allocation15_spill] sm:$0xff] }
 0x12d   : > { %771 = vrot.lane.b32.xlu2 %v4127_v13, %s1934_s21  ;;  %v4135_v13 = vld [vmem:[#allocation10_spill] sm:$0xff] }
 0x12e   : > { %769 = vrot.lane.b32.xlu1 %v4128_v16, %s1934_s21  ;;  %767 = vrot.lane.b32.xlu0 %v4129_v46, %s1934_s21 }
 0x12f   : > { %v2750_v22 = vpop.permute.xlu2 %673 }
 0x130   : > { %4130 = vst [vmem:[#allocation115_spill] sm:$0xff] %v2750_v22  ;;  %v2752_v2 = vpop.permute.xlu1 %653  ;;  %v2754_v35 = vpop.permute.xlu0 %619  ;;  %v4139_v22 = vld [vmem:[#allocation17_spill] sm:$0xff] }
 0x131   : > { %4131 = vst [vmem:[#allocation116_spill] sm:$0xff] %v2752_v2  ;;  %v4141_v2 = vld [vmem:[#allocation13_spill] sm:$0xff] }
 0x132   : > { %4132 = vst [vmem:[#allocation117_spill] sm:$0xff] %v2754_v35  ;;  %v4140_v35 = vld [vmem:[#allocation18_spill] sm:$0xff] }
 0x135   : > { %777 = vrot.lane.b32.xlu2 %v4133_v31, %s1934_s21 }
 0x136   : > { %775 = vrot.lane.b32.xlu1 %v4134_v21, %s1934_s21  ;;  %773 = vrot.lane.b32.xlu0 %v4135_v13, %s1934_s21 }
 0x137   : > { %v2762_v36 = vpop.permute.xlu2 %679 }
 0x138   : > { %4136 = vst [vmem:[#allocation118_spill] sm:$0xff] %v2762_v36  ;;  %v2764_v16 = vpop.permute.xlu1 %659  ;;  %v2766_v46 = vpop.permute.xlu0 %657  ;;  %v4145_v36 = vld [vmem:[#allocation20_spill] sm:$0xff] }
 0x139   : > { %4137 = vst [vmem:[#allocation119_spill] sm:$0xff] %v2764_v16  ;;  %v4147_v16 = vld [vmem:[#allocation16_spill] sm:$0xff] }
 0x13a   : > { %4138 = vst [vmem:[#allocation120_spill] sm:$0xff] %v2766_v46  ;;  %v4146_v46 = vld [vmem:[#allocation21_spill] sm:$0xff] }
 0x13d   : > { %783 = vrot.lane.b32.xlu2 %v4139_v22, %s1934_s21 }
 0x13e   : > { %781 = vrot.lane.b32.xlu1 %v4140_v35, %s1934_s21  ;;  %779 = vrot.lane.b32.xlu0 %v4141_v2, %s1934_s21 }
 0x13f   : > { %v2774_v31 = vpop.permute.xlu2 %685 }
 0x140   : > { %4142 = vst [vmem:[#allocation17_spill] sm:$0xff] %v2774_v31  ;;  %v2776_v21 = vpop.permute.xlu1 %665  ;;  %v2778_v13 = vpop.permute.xlu0 %663 }
 0x141   : > { %4143 = vst [vmem:[#allocation18_spill] sm:$0xff] %v2776_v21  ;;  %v4151_v21 = vld [vmem:[#allocation24_spill] sm:$0xff] }
 0x142   : > { %4144 = vst [vmem:[#allocation121_spill] sm:$0xff] %v2778_v13  ;;  %v4152_v13 = vld [vmem:[#allocation25_spill] sm:$0xff] }
 0x145   : > { %789 = vrot.lane.b32.xlu2 %v4145_v36, %s1934_s21  ;;  %v4153_v36 = vld [vmem:[#allocation19_spill] sm:$0xff] }
 0x146   : > { %787 = vrot.lane.b32.xlu1 %v4146_v46, %s1934_s21  ;;  %785 = vrot.lane.b32.xlu0 %v4147_v16, %s1934_s21 }
 0x147   : > { %v2786_v43 = vpop.permute.xlu2 %691 }
 0x148   : > { %4148 = vst [vmem:[#allocation122_spill] sm:$0xff] %v2786_v43  ;;  %v2788_v33 = vpop.permute.xlu1 %671  ;;  %v2790_v2 = vpop.permute.xlu0 %669  ;;  %v4156_v43 = vld [vmem:[#allocation27_spill] sm:$0xff] }
 0x149   : > { %4149 = vst [vmem:[#allocation123_spill] sm:$0xff] %v2788_v33  ;;  %v2817_v33 = vld [vmem:[%s1974_s17 + $0x190] sm:$0x3] }
 0x14a   : > { %4150 = vst [vmem:[#allocation124_spill] sm:$0xff] %v2790_v2 }
 0x14d   : > { %795 = vrot.lane.b32.xlu2 %v4151_v21, %s1934_s21  ;;  %v4157_v21 = vld [vmem:[#allocation23_spill] sm:$0xff] }
 0x14e   : > { %793 = vrot.lane.b32.xlu1 %v4152_v13, %s1934_s21  ;;  %791 = vrot.lane.b32.xlu0 %v4153_v36, %s1934_s21 }
 0x14f   : > { %v2798_v46 = vpop.permute.xlu2 %697 }
 0x150   : > { %v2800_v31 = vpop.permute.xlu1 %677  ;;  %v2802_v16 = vpop.permute.xlu0 %675 }
 0x151   : > { %4154 = vst [vmem:[#allocation125_spill] sm:$0xff] %v2800_v31  ;;  %v441_v31 = vrot.slane %v2817_v33, 1 }
 0x152   : > { %4155 = vst [vmem:[#allocation126_spill] sm:$0xff] %v2802_v16  ;;  %v4161_v16 = vld [vmem:[#allocation30_spill] sm:$0xff] }
 0x155   : > { %801 = vrot.lane.b32.xlu2 %v4156_v43, %s1934_s21  ;;  %v4162_v43 = vld [vmem:[#allocation26_spill] sm:$0xff] }
 0x156   : > { %799 = vrot.lane.b32.xlu1 %v2292_v58, %s1934_s21  ;;  %797 = vrot.lane.b32.xlu0 %v4157_v21, %s1934_s21  ;;  %v439_v21 = vrot.slane %v2691_v3, 1 }
 0x157   : > { %v2810_v2 = vpop.permute.xlu2 %703 }
 0x158   : > { %4158 = vst [vmem:[#allocation127_spill] sm:$0xff] %v2810_v2  ;;  %v2812_v13 = vpop.permute.xlu1 %683  ;;  %v2814_v36 = vpop.permute.xlu0 %681 }
 0x159   : > { %4159 = vst [vmem:[#allocation128_spill] sm:$0xff] %v2812_v13  ;;  %v438_v13 = vrot.slane %v2694_v29, 1 }
 0x15a   : > { %4160 = vst [vmem:[#allocation129_spill] sm:$0xff] %v2814_v36 }
 0x15d   : > { %807 = vrot.lane.b32.xlu2 %v2316_v60, %s1934_s21  ;;  %v2835_v60 = vsel %vm273_vm0, %v439_v21, %v441_v31 }
 0x15e   : > { %805 = vrot.lane.b32.xlu1 %v4161_v16, %s1934_s21  ;;  %803 = vrot.lane.b32.xlu0 %v4162_v43, %s1934_s21  ;;  %4165 = vst [vmem:[#allocation132_spill] sm:$0xff] %v2835_v60  ;;  %v2838_v16 = vsel %vm273_vm0, %v438_v13, %v439_v21  ;;  %v4168_v13 = vld [vmem:[#allocation31_spill] sm:$0xff] }
 0x15f   : > { %v2825_v58 = vpop.permute.xlu2 %709  ;;  %4166 = vst [vmem:[#allocation133_spill] sm:$0xff] %v2838_v16 }
 0x160   : > { %4163 = vst [vmem:[#allocation130_spill] sm:$0xff] %v2825_v58  ;;  %v2830_v36 = vpop.permute.xlu1 %689  ;;  %v2832_v2 = vpop.permute.xlu0 %687 }
 0x161   : > { %4164 = vst [vmem:[#allocation131_spill] sm:$0xff] %v2832_v2 }
 0x165   : > { %845 = vrot.lane.b32.xlu2 %v2334_v10, %s1935_s22 }
 0x166   : > { %811 = vrot.lane.b32.xlu1 %v2835_v60, %s1934_s21  ;;  %809 = vrot.lane.b32.xlu0 %v2838_v16, %s1934_s21  ;;  %v4176_v60 = vld [vmem:[#allocation43_spill] sm:$0xff] }
 0x167   : > { %v2846_v43 = vpop.permute.xlu2 %715 }
 0x168   : > { %4167 = vst [vmem:[#allocation134_spill] sm:$0xff] %v2846_v43  ;;  %v2848_v58 = vpop.permute.xlu1 %695  ;;  %v2850_v2 = vpop.permute.xlu0 %693  ;;  %v4171_v43 = vld [vmem:[#allocation39_spill] sm:$0xff] }
 0x16d   : > { %851 = vrot.lane.b32.xlu2 %v2353_v9, %s1935_s22  ;;  %v4172_v9 = vld [vmem:[#allocation33_spill] sm:$0xff] }
 0x16e   : > { %849 = vrot.lane.b32.xlu1 %v2356_v47, %s1935_s22  ;;  %847 = vrot.lane.b32.xlu0 %v4168_v13, %s1935_s22 }
 0x16f   : > { %v2858_v21 = vpop.permute.xlu2 %753 }
 0x170   : > { %4169 = vst [vmem:[#allocation31_spill] sm:$0xff] %v2858_v21  ;;  %v2860_v10 = vpop.permute.xlu1 %701  ;;  %v2862_v31 = vpop.permute.xlu0 %699  ;;  %v4175_v21 = vld [vmem:[#allocation42_spill] sm:$0xff] }
 0x171   : > { %4170 = vst [vmem:[#allocation135_spill] sm:$0xff] %v2862_v31 }
 0x175   : > { %857 = vrot.lane.b32.xlu2 %v2374_v44, %s1935_s22  ;;  %v4177_v44 = vld [vmem:[#allocation37_spill] sm:$0xff] }
 0x176   : > { %855 = vrot.lane.b32.xlu1 %v4171_v43, %s1935_s22  ;;  %853 = vrot.lane.b32.xlu0 %v4172_v9, %s1935_s22 }
 0x177   : > { %v2870_v16 = vpop.permute.xlu2 %759 }
 0x178   : > { %4173 = vst [vmem:[#allocation136_spill] sm:$0xff] %v2870_v16  ;;  %v2872_v47 = vpop.permute.xlu1 %707  ;;  %v2874_v13 = vpop.permute.xlu0 %705 }
 0x179   : > { %4174 = vst [vmem:[#allocation137_spill] sm:$0xff] %v2874_v13 }
 0x17d   : > { %863 = vrot.lane.b32.xlu2 %v4175_v21, %s1935_s22  ;;  %v4180_v21 = vld [vmem:[#allocation41_spill] sm:$0xff] }
 0x17e   : > { %861 = vrot.lane.b32.xlu1 %v4176_v60, %s1935_s22  ;;  %859 = vrot.lane.b32.xlu0 %v4177_v44, %s1935_s22 }
 0x17f   : > { %v2882_v31 = vpop.permute.xlu2 %765 }
 0x180   : > { %4178 = vst [vmem:[#allocation138_spill] sm:$0xff] %v2882_v31  ;;  %v2884_v43 = vpop.permute.xlu1 %713  ;;  %v2886_v9 = vpop.permute.xlu0 %711  ;;  %v4183_v31 = vld [vmem:[#allocation55_spill] sm:$0xff] }
 0x181   : > { %4179 = vst [vmem:[#allocation139_spill] sm:$0xff] %v2886_v9 }
 0x185   : > { %869 = vrot.lane.b32.xlu2 %v2421_v59, %s1935_s22  ;;  %v4184_v59 = vld [vmem:[#allocation47_spill] sm:$0xff] }
 0x186   : > { %867 = vrot.lane.b32.xlu1 %v2424_v4, %s1935_s22  ;;  %865 = vrot.lane.b32.xlu0 %v4180_v21, %s1935_s22 }
 0x187   : > { %v2894_v16 = vpop.permute.xlu2 %771 }
 0x188   : > { %4181 = vst [vmem:[#allocation140_spill] sm:$0xff] %v2894_v16  ;;  %v2896_v60 = vpop.permute.xlu1 %751  ;;  %v2898_v44 = vpop.permute.xlu0 %749  ;;  %v4187_v16 = vld [vmem:[#allocation53_spill] sm:$0xff] }
 0x189   : > { %4182 = vst [vmem:[#allocation141_spill] sm:$0xff] %v2898_v44 }
 0x18d   : > { %875 = vrot.lane.b32.xlu2 %v2447_v32, %s1935_s22 }
 0x18e   : > { %873 = vrot.lane.b32.xlu1 %v4183_v31, %s1935_s22  ;;  %871 = vrot.lane.b32.xlu0 %v4184_v59, %s1935_s22 }
 0x18f   : > { %v2906_v9 = vpop.permute.xlu2 %777 }
 0x190   : > { %4185 = vst [vmem:[#allocation142_spill] sm:$0xff] %v2906_v9  ;;  %v2908_v4 = vpop.permute.xlu1 %757  ;;  %v2910_v21 = vpop.permute.xlu0 %755  ;;  %v4190_v9 = vld [vmem:[#allocation66_spill] sm:$0xff] }
 0x191   : > { %4186 = vst [vmem:[#allocation143_spill] sm:$0xff] %v2910_v21 }
 0x195   : > { %881 = vrot.lane.b32.xlu2 %v2472_v7, %s1935_s22  ;;  %v4191_v7 = vld [vmem:[#allocation59_spill] sm:$0xff] }
 0x196   : > { %879 = vrot.lane.b32.xlu1 %v2475_v8, %s1935_s22  ;;  %877 = vrot.lane.b32.xlu0 %v4187_v16, %s1935_s22 }
 0x197   : > { %v2918_v44 = vpop.permute.xlu2 %783 }
 0x198   : > { %4188 = vst [vmem:[#allocation53_spill] sm:$0xff] %v2918_v44  ;;  %v2920_v31 = vpop.permute.xlu1 %763  ;;  %v2922_v59 = vpop.permute.xlu0 %761 }
 0x199   : > { %4189 = vst [vmem:[#allocation144_spill] sm:$0xff] %v2922_v59  ;;  %v444_v59 = vrot.slane %v2691_v3, 2 }
 0x19d   : > { %887 = vrot.lane.b32.xlu2 %v2498_v15, %s1935_s22  ;;  %v4193_v15 = vld [vmem:[#allocation64_spill] sm:$0xff] }
 0x19e   : > { %885 = vrot.lane.b32.xlu1 %v4190_v9, %s1935_s22  ;;  %883 = vrot.lane.b32.xlu0 %v4191_v7, %s1935_s22 }
 0x19f   : > { %v2930_v21 = vpop.permute.xlu2 %789 }
 0x1a0   : > { %v2932_v13 = vpop.permute.xlu1 %769  ;;  %v2934_v32 = vpop.permute.xlu0 %767 }
 0x1a1   : > { %4192 = vst [vmem:[#allocation145_spill] sm:$0xff] %v2934_v32  ;;  %v443_v32 = vrot.slane %v2694_v29, 2 }
 0x1a5   : > { %893 = vrot.lane.b32.xlu2 %v2523_v12, %s1935_s22 }
 0x1a6   : > { %891 = vrot.lane.b32.xlu1 %v2526_v14, %s1935_s22  ;;  %889 = vrot.lane.b32.xlu0 %v4193_v15, %s1935_s22  ;;  %v4196_v14 = vld [vmem:[#allocation70_spill] sm:$0xff] }
 0x1a7   : > { %v2942_v44 = vpop.permute.xlu2 %795 }
 0x1a8   : > { %v2944_v9 = vpop.permute.xlu1 %775  ;;  %v2946_v7 = vpop.permute.xlu0 %773 }
 0x1a9   : > { %4194 = vst [vmem:[#allocation146_spill] sm:$0xff] %v2944_v9 }
 0x1aa   : > { %4195 = vst [vmem:[#allocation147_spill] sm:$0xff] %v2946_v7  ;;  %v2963_v7 = vsel %vm354_vm1, %v443_v32, %v444_v59 }
 0x1ad   : > { %899 = vrot.lane.b32.xlu2 %v2549_v27, %s1935_s22 }
 0x1ae   : > { %897 = vrot.lane.b32.xlu1 %v2552_v51, %s1935_s22  ;;  %895 = vrot.lane.b32.xlu0 %v4196_v14, %s1935_s22  ;;  %v446_v14 = vrot.slane %v2817_v33, 2 }
 0x1af   : > { %v2956_v15 = vpop.permute.xlu2 %801 }
 0x1b0   : > { %v2958_v12 = vpop.permute.xlu1 %781  ;;  %v2960_v9 = vpop.permute.xlu0 %779 }
 0x1b1   : > { %4197 = vst [vmem:[#allocation148_spill] sm:$0xff] %v2958_v12 }
 0x1b2   : > { %4198 = vst [vmem:[#allocation149_spill] sm:$0xff] %v2960_v9  ;;  %v2977_v9 = vsel %vm354_vm1, %v444_v59, %v446_v14  ;;  %v1248_v14 = vsel %vm1229_vm2, %v2175_v30, %v2565_v57 }
 0x1b5   : > { %905 = vrot.lane.b32.xlu2 %v2963_v7, %s1935_s22 }
 0x1b6   : > { %903 = vrot.lane.b32.xlu1 %v2568_v55, %s1935_s22  ;;  %901 = vrot.lane.b32.xlu0 %v2546_v38, %s1935_s22 }
 0x1b7   : > { %v2971_v51 = vpop.permute.xlu2 %807 }
 0x1b8   : > { %v2974_v27 = vpop.permute.xlu1 %787  ;;  %v786_v12 = vpop.permute.xlu0 %785 }
 0x1bd   : > { %943 = vrot.lane.b32.xlu2 %v1980_v1, %s1936_s23 }
 0x1be   : > { %941 = vrot.lane.b32.xlu1 %v1977_v0, %s1936_s23  ;;  %907 = vrot.lane.b32.xlu0 %v2977_v9, %s1935_s22 }
 0x1bf   : > { %v2985_v32 = vpop.permute.xlu2 %845 }
 0x1c0   : > { %v2987_v38 = vpop.permute.xlu1 %793  ;;  %v792_v33 = vpop.permute.xlu0 %791 }
 0x1c5   : > { %949 = vrot.lane.b32.xlu2 %v2032_v24, %s1936_s23 }
 0x1c6   : > { %947 = vrot.lane.b32.xlu1 %v2038_v26, %s1936_s23  ;;  %945 = vrot.lane.b32.xlu0 %v2044_v28, %s1936_s23 }
 0x1c7   : > { %v2995_v1 = vpop.permute.xlu2 %851 }
 0x1c8   : > { %v2997_v0 = vpop.permute.xlu1 %799  ;;  %v2999_v59 = vpop.permute.xlu0 %797 }
 0x1cd   : > { %955 = vrot.lane.b32.xlu2 %v2066_v37, %s1936_s23 }
 0x1ce   : > { %953 = vrot.lane.b32.xlu1 %v2072_v39, %s1936_s23  ;;  %951 = vrot.lane.b32.xlu0 %v2035_v25, %s1936_s23 }
 0x1cf   : > { %v3007_v24 = vpop.permute.xlu2 %857 }
 0x1d0   : > { %v3009_v26 = vpop.permute.xlu1 %805  ;;  %v3011_v28 = vpop.permute.xlu0 %803 }
 0x1d5   : > { %961 = vrot.lane.b32.xlu2 %v2097_v48, %s1936_s23 }
 0x1d6   : > { %959 = vrot.lane.b32.xlu1 %v2103_v50, %s1936_s23  ;;  %957 = vrot.lane.b32.xlu0 %v2109_v52, %s1936_s23 }
 0x1d7   : > { %v3019_v37 = vpop.permute.xlu2 %863 }
 0x1d8   : > { %v3021_v39 = vpop.permute.xlu1 %811  ;;  %v3023_v25 = vpop.permute.xlu0 %809 }
 0x1dd   : > { %967 = vrot.lane.b32.xlu2 %v2132_v61, %s1936_s23 }
 0x1de   : > { %965 = vrot.lane.b32.xlu1 %v2138_v63, %s1936_s23  ;;  %963 = vrot.lane.b32.xlu0 %v2100_v49, %s1936_s23 }
 0x1df   : > { %v3031_v48 = vpop.permute.xlu2 %869 }
 0x1e0   : > { %v3033_v50 = vpop.permute.xlu1 %849  ;;  %v3035_v52 = vpop.permute.xlu0 %847 }
 0x1e5   : > { %973 = vrot.lane.b32.xlu2 %v2163_v19, %s1936_s23  ;;  %v1281_v19 = vsel %vm1262_vm3, %v1248_v14, %v2648_v45  ;;  %v3071_v14 = vld [vmem:[%s1974_s17 + $0x1a0] sm:$0xff] }
 0x1e6   : > { %971 = vrot.lane.b32.xlu1 %v2169_v23, %s1936_s23  ;;  %969 = vrot.lane.b32.xlu0 %v2175_v30, %s1936_s23  ;;  %v1314_v23 = vsel %vm1295_vm4, %v1281_v19, %v2830_v36  ;;  %v224_v36 = vld [vmem:[%s1974_s17 + $0x1a8] sm:$0x3] }
 0x1e7   : > { %v3043_v61 = vpop.permute.xlu2 %875  ;;  %v1347_v30 = vsel %vm1328_vm5, %v1314_v23, %v786_v12  ;;  %v452_v23 = vrot.slane %v3071_v14, 1 }
 0x1e8   : > { %4199 = vst [vmem:[#allocation150_spill] sm:$0xff] %v3043_v61  ;;  %v3045_v63 = vpop.permute.xlu1 %855  ;;  %v3047_v49 = vpop.permute.xlu0 %853 }
 0x1ed   : > { %979 = vrot.lane.b32.xlu2 %v2198_v54, %s1936_s23 }
 0x1ee   : > { %977 = vrot.lane.b32.xlu1 %v2204_v56, %s1936_s23  ;;  %975 = vrot.lane.b32.xlu0 %v2166_v20, %s1936_s23  ;;  %v1251_v56 = vsel %vm1229_vm2, %v2166_v20, %v2580_v40 }
 0x1ef   : > { %v882_v57 = vpop.permute.xlu2 %881  ;;  %v1284_v19 = vsel %vm1262_vm3, %v1251_v56, %v2660_v5 }
 0x1f0   : > { %v3063_v61 = vpop.permute.xlu1 %861  ;;  %v3066_v45 = vsel %vm1361_vm6, %v1347_v30, %v882_v57  ;;  %v3068_v54 = vpop.permute.xlu0 %859  ;;  %v1317_v12 = vsel %vm1295_vm4, %v1284_v19, %v2848_v58  ;;  %v454_v30 = vrot.slane %v224_v36, 1 }
 0x1f1   : > { %v1350_v20 = vsel %vm1328_vm5, %v1317_v12, %v792_v33 }
 0x1f2   : > { %v455_v58 = vsel %vm273_vm0, %v452_v23, %v454_v30 }
 0x1f5   : > { %985 = vrot.lane.b32.xlu2 %v2229_v42, %s1936_s23 }
 0x1f6   : > { %983 = vrot.lane.b32.xlu1 %v2235_v11, %s1936_s23  ;;  %981 = vrot.lane.b32.xlu0 %v2241_v6, %s1936_s23  ;;  %v1254_v11 = vsel %vm1229_vm2, %v2241_v6, %v2592_v53  ;;  %v457_v6 = vrot.slane %v3071_v14, 2  ;;  %v459_v53 = vrot.slane %v224_v36, 2 }
 0x1f7   : > { %v888_v40 = vpop.permute.xlu2 %887  ;;  %v1287_v56 = vsel %vm1262_vm3, %v1254_v11, %v2672_v62 }
 0x1f8   : > { %v3089_v57 = vpop.permute.xlu1 %867  ;;  %v3092_v5 = vsel %vm1361_vm6, %v1350_v20, %v888_v40  ;;  %v3094_v42 = vpop.permute.xlu0 %865  ;;  %v1320_v33 = vsel %vm1295_vm4, %v1287_v56, %v2860_v10  ;;  %v222_v10 = vld [vmem:[%s1974_s17 + $0x198] sm:$0xff]  ;;  %v4200_v40 = vld [vmem:[#allocation87_spill] sm:$0xff] }
 0x1f9   : > { %v1353_v19 = vsel %vm1328_vm5, %v1320_v33, %v2999_v59  ;;  %v451_v56 = vrot.slane %v222_v10, 1 }
 0x1fd   : > { %1099 = vrot.lane.b32.xlu2 %v455_v58, %s1937_s24  ;;  %v4201_v58 = vld [vmem:[#allocation22_spill] sm:$0xff] }
 0x1fe   : > { %1067 = vrot.lane.b32.xlu1 %v4139_v22, %s1937_s24  ;;  %1003 = vrot.lane.b32.xlu0 %v3071_v14, %s1936_s23  ;;  %v460_v22 = vsel %vm354_vm1, %v457_v6, %v459_v53  ;;  %v1257_v11 = vsel %vm1229_vm2, %v4201_v58, %v4200_v40  ;;  %v4202_v53 = vld [vmem:[#allocation90_spill] sm:$0xff]  ;;  %v1894_v40 = vld [vmem:[%s1974_s17 + $0xf0] sm:$0xff] }
 0x1ff   : > { %v894_v12 = vpop.permute.xlu2 %893  ;;  %v1290_v59 = vsel %vm1262_vm3, %v1257_v11, %v2684_v18 }
 0x200   : > { %v3112_v62 = vpop.permute.xlu1 %873  ;;  %v3115_v30 = vsel %vm1361_vm6, %v1353_v19, %v894_v12  ;;  %v3117_v20 = vpop.permute.xlu0 %871  ;;  %v1323_v14 = vsel %vm1295_vm4, %v1290_v59, %v2872_v47  ;;  %v453_v47 = vsel %vm273_vm0, %v451_v56, %v452_v23  ;;  %v1895_v56 = vld [vmem:[%s1974_s17 + $0x8] sm:$0xff] }
 0x201   : > { %v1356_v36 = vsel %vm1328_vm5, %v1323_v14, %v3011_v28 }
 0x205   : > { %1001 = vrot.lane.b32.xlu2 %v222_v10, %s1936_s23 }
 0x206   : > { %1195 = vrot.lane.b32.xlu1 %v460_v22, %s1938_s25  ;;  %1163 = vrot.lane.b32.xlu0 %v2475_v8, %s1938_s25  ;;  %v1260_v22 = vsel %vm1229_vm2, %v2301_v34, %v4202_v53  ;;  %v4203_v8 = vld [vmem:[#allocation61_spill] sm:$0xff]  ;;  %v1896_v53 = vld [vmem:[%s1974_s17 + $0x110] sm:$0xff] }
 0x207   : > { %v900_v33 = vpop.permute.xlu2 %899  ;;  %v1250_v58 = vsel %vm1229_vm2, %v1894_v40, %v4203_v8  ;;  %v1293_v28 = vsel %vm1262_vm3, %v1260_v22, %v2702_v17  ;;  %v1897_v40 = vld [vmem:[%s1974_s17 + $0x108] sm:$0xff]  ;;  %v4207_v8 = vld [vmem:[#allocation82_spill] sm:$0xff] }
 0x208   : > { %v3134_v19 = vpop.permute.xlu1 %879  ;;  %v3137_v18 = vsel %vm1361_vm6, %v1356_v36, %v900_v33  ;;  %v3139_v12 = vpop.permute.xlu0 %877  ;;  %v1283_v11 = vsel %vm1262_vm3, %v1250_v58, %v2704_v41  ;;  %v1326_v23 = vsel %vm1295_vm4, %v1293_v28, %v2884_v43  ;;  %v4204_v33 = vld [vmem:[#allocation52_spill] sm:$0xff]  ;;  %v1252_v58 = vsel %vm1229_vm2, %v1897_v40, %v4207_v8  ;;  %v4208_v28 = vld [vmem:[#allocation106_spill] sm:$0xff]  ;;  %v1899_v8 = vld [vmem:[%s1974_s17 + $0x138] sm:$0xff] }
 0x209   : > { %v1316_v34 = vsel %vm1295_vm4, %v1283_v11, %v2850_v2  ;;  %v1359_v17 = vsel %vm1328_vm5, %v1326_v23, %v3023_v25  ;;  %v1231_v2 = vsel %vm1229_vm2, %v1895_v56, %v4204_v33  ;;  %v4209_v23 = vld [vmem:[#allocation13_spill] sm:$0xff]  ;;  %v4214_v40 = vld [vmem:[#allocation96_spill] sm:$0xff] }
 0x20a   : > { %v1349_v41 = vsel %vm1328_vm5, %v1316_v34, %v2930_v21  ;;  %v4206_v21 = vld [vmem:[#allocation67_spill] sm:$0xff] }
 0x20b   : > { %v1253_v22 = vsel %vm1229_vm2, %v1896_v53, %v4206_v21  ;;  %v4210_v34 = vld [vmem:[#allocation107_spill] sm:$0xff]  ;;  %v1898_v21 = vld [vmem:[%s1974_s17 + $0x30] sm:$0xff] }
 0x20d   : > { %1161 = vrot.lane.b32.xlu2 %v4187_v16, %s1938_s25  ;;  %v456_v16 = vrot.slane %v222_v10, 2  ;;  %v4205_v10 = vld [vmem:[#allocation93_spill] sm:$0xff] }
 0x20e   : > { %1097 = vrot.lane.b32.xlu1 %v453_v47, %s1937_s24  ;;  %1065 = vrot.lane.b32.xlu0 %v4140_v35, %s1937_s24  ;;  %v1264_v47 = vsel %vm1262_vm3, %v1231_v2, %v4205_v10 }
 0x20f   : > { %v906_v59 = vpop.permute.xlu2 %905  ;;  %v458_v25 = vsel %vm354_vm1, %v456_v16, %v457_v6  ;;  %v1297_v11 = vsel %vm1295_vm4, %v1264_v47, %v4208_v28  ;;  %v1286_v6 = vsel %vm1262_vm3, %v1253_v22, %v4210_v34  ;;  %v1900_v28 = vld [vmem:[%s1974_s17 + $0x128] sm:$0xff]  ;;  %v4217_v34 = vld [vmem:[#allocation109_spill] sm:$0xff] }
 0x210   : > { %v886_v14 = vpop.permute.xlu1 %885  ;;  %v3166_v43 = vsel %vm1361_vm6, %v1359_v17, %v906_v59  ;;  %v3168_v36 = vpop.permute.xlu0 %883  ;;  %v4211_v17 = vld [vmem:[#allocation108_spill] sm:$0xff]  ;;  %v1330_v59 = vsel %vm1328_vm5, %v1297_v11, %v2896_v60 }
 0x211   : > { %v3171_v35 = vsel %vm1361_vm6, %v1349_v41, %v886_v14  ;;  %v1285_v16 = vsel %vm1262_vm3, %v1252_v58, %v4211_v17  ;;  %v4212_v14 = vld [vmem:[#allocation135_spill] sm:$0xff]  ;;  %v1363_v33 = vsel %vm1361_vm6, %v1330_v59, %v3035_v52  ;;  %v4213_v52 = vld [vmem:[#allocation32_spill] sm:$0xff]  ;;  %v4218_v17 = vld [vmem:[#allocation110_spill] sm:$0xff] }
 0x212   : > { %v1318_v41 = vsel %vm1295_vm4, %v1285_v16, %v2798_v46  ;;  %v1319_v56 = vsel %vm1295_vm4, %v1286_v6, %v4212_v14  ;;  %v1234_v22 = vsel %vm1229_vm2, %v1898_v21, %v4213_v52  ;;  %v4216_v11 = vld [vmem:[#allocation84_spill] sm:$0xff]  ;;  %v4219_v59 = vld [vmem:[#allocation111_spill] sm:$0xff] }
 0x213   : > { %v1352_v60 = vsel %vm1328_vm5, %v1319_v56, %v2942_v44  ;;  %v1267_v44 = vsel %vm1262_vm3, %v1234_v22, %v4214_v40  ;;  %v4220_v56 = vld [vmem:[#allocation54_spill] sm:$0xff] }
 0x214   : > { %v1300_v6 = vsel %vm1295_vm4, %v1267_v44, %v4217_v34  ;;  %v3273_v34 = vld [vmem:[%s1974_s17 + $0x150] sm:$0xff] }
 0x215   : > { %1063 = vrot.lane.b32.xlu2 %v4209_v23, %s1937_s24  ;;  %v1255_v23 = vsel %vm1229_vm2, %v1900_v28, %v4216_v11  ;;  %v1333_v14 = vsel %vm1328_vm5, %v1300_v6, %v2908_v4  ;;  %v4225_v28 = vld [vmem:[#allocation98_spill] sm:$0xff]  ;;  %v3267_v11 = vld [vmem:[%s1974_s17 + $0x158] sm:$0xff] }
 0x216   : > { %999 = vrot.lane.b32.xlu1 %v2691_v3, %s1936_s23  ;;  %1193 = vrot.lane.b32.xlu0 %v458_v25, %s1938_s25  ;;  %v1351_v3 = vsel %vm1328_vm5, %v1318_v41, %v2987_v38  ;;  %v4215_v38 = vld [vmem:[#allocation73_spill] sm:$0xff]  ;;  %v1288_v41 = vsel %vm1262_vm3, %v1255_v23, %v4219_v59  ;;  %v4227_v6 = vld [vmem:[#allocation86_spill] sm:$0xff] }
 0x217   : > { %v944_v2 = vpop.permute.xlu2 %943  ;;  %v1256_v58 = vsel %vm1229_vm2, %v1899_v8, %v4215_v38  ;;  %v1901_v38 = vld [vmem:[%s1974_s17 + $0x50] sm:$0xff] }
 0x218   : > { %v892_v10 = vpop.permute.xlu1 %891  ;;  %v3209_v25 = vsel %vm1394_vm7, %v1363_v33, %v944_v2  ;;  %v890_v47 = vpop.permute.xlu0 %889  ;;  %v1289_v16 = vsel %vm1262_vm3, %v1256_v58, %v4218_v17  ;;  %v4221_v33 = vld [vmem:[#allocation132_spill] sm:$0xff]  ;;  %v4222_v2 = vld [vmem:[#allocation127_spill] sm:$0xff]  ;;  %v1258_v17 = vsel %vm1229_vm2, %v3273_v34, %v4227_v6 }
 0x219   : > { %v3212_v46 = vsel %vm1361_vm6, %v1352_v60, %v892_v10  ;;  %v3215_v53 = vsel %vm1361_vm6, %v1351_v3, %v890_v47  ;;  %v4223_v60 = vld [vmem:[#allocation137_spill] sm:$0xff]  ;;  %v1366_v10 = vsel %vm1361_vm6, %v1333_v14, %v3047_v49 }
 0x21a   : > { %v1322_v3 = vsel %vm1295_vm4, %v1289_v16, %v4223_v60  ;;  %v4224_v49 = vld [vmem:[#allocation57_spill] sm:$0xff]  ;;  %v4228_v16 = vld [vmem:[#allocation112_spill] sm:$0xff]  ;;  %v4232_v60 = vld [vmem:[#allocation14_spill] sm:$0xff] }
 0x21b   : > { %v1355_v4 = vsel %vm1328_vm5, %v1322_v3, %v2956_v15  ;;  %v1237_v58 = vsel %vm1229_vm2, %v1901_v38, %v4224_v49  ;;  %v4230_v14 = vld [vmem:[#allocation113_spill] sm:$0xff]  ;;  %v4233_v3 = vld [vmem:[#allocation130_spill] sm:$0xff] }
 0x21c   : > { %v1270_v15 = vsel %vm1262_vm3, %v1237_v58, %v4225_v28 }
 0x21d   : > { %1191 = vrot.lane.b32.xlu2 %v2977_v9, %s1938_s25  ;;  %v1321_v9 = vsel %vm1295_vm4, %v1288_v41, %v4222_v2  ;;  %v1303_v59 = vsel %vm1295_vm4, %v1270_v15, %v4228_v16  ;;  %v4229_v41 = vld [vmem:[#allocation133_spill] sm:$0xff] }
 0x21e   : > { %1159 = vrot.lane.b32.xlu1 %v4220_v56, %s1938_s25  ;;  %1095 = vrot.lane.b32.xlu0 %v4221_v33, %s1937_s24  ;;  %v1354_v21 = vsel %vm1328_vm5, %v1321_v9, %v2997_v0  ;;  %v4226_v0 = vld [vmem:[#allocation79_spill] sm:$0xff]  ;;  %v4231_v33 = vld [vmem:[#allocation114_spill] sm:$0xff]  ;;  %v1336_v9 = vsel %vm1328_vm5, %v1303_v59, %v2920_v31  ;;  %v1904_v15 = vld [vmem:[%s1974_s17 + $0x78] sm:$0xff] }
 0x21f   : > { %v950_v47 = vpop.permute.xlu2 %949  ;;  %v1259_v23 = vsel %vm1229_vm2, %v3267_v11, %v4226_v0  ;;  %v1291_v2 = vsel %vm1262_vm3, %v1258_v17, %v4231_v33  ;;  %v4238_v16 = vld [vmem:[#allocation81_spill] sm:$0xff]  ;;  %v4240_v33 = vld [vmem:[#allocation115_spill] sm:$0xff] }
 0x220   : > { %v898_v52 = vpop.permute.xlu1 %897  ;;  %v3253_v22 = vsel %vm1394_vm7, %v1366_v10, %v950_v47  ;;  %v896_v40 = vpop.permute.xlu0 %895  ;;  %v1292_v56 = vsel %vm1262_vm3, %v1259_v23, %v4230_v14  ;;  %v1324_v10 = vsel %vm1295_vm4, %v1291_v2, %v4233_v3  ;;  %v4234_v47 = vld [vmem:[#allocation139_spill] sm:$0xff]  ;;  %v1905_v23 = vld [vmem:[%s1974_s17] sm:$0xff]  ;;  %v4239_v14 = vld [vmem:[#allocation89_spill] sm:$0xff] }
 0x221   : > { %v3256_v44 = vsel %vm1361_vm6, %v1355_v4, %v898_v52  ;;  %v3259_v8 = vsel %vm1361_vm6, %v1354_v21, %v896_v40  ;;  %v1325_v4 = vsel %vm1295_vm4, %v1292_v56, %v4234_v47  ;;  %v1369_v21 = vsel %vm1361_vm6, %v1336_v9, %v3068_v54  ;;  %v4235_v54 = vld [vmem:[#allocation62_spill] sm:$0xff]  ;;  %v4241_v9 = vld [vmem:[#allocation116_spill] sm:$0xff]  ;;  %v4242_v3 = vld [vmem:[#allocation117_spill] sm:$0xff] }
 0x222   : > { %v1358_v31 = vsel %vm1328_vm5, %v1325_v4, %v2971_v51  ;;  %v1357_v40 = vsel %vm1328_vm5, %v1324_v10, %v3009_v26  ;;  %v1240_v0 = vsel %vm1229_vm2, %v1904_v15, %v4235_v54  ;;  %v4236_v51 = vld [vmem:[#allocation46_spill] sm:$0xff]  ;;  %v4237_v26 = vld [vmem:[#allocation100_spill] sm:$0xff]  ;;  %v4243_v4 = vld [vmem:[#allocation55_spill] sm:$0xff] }
 0x223   : > { %v1230_v6 = vsel %vm1229_vm2, %v1905_v23, %v4236_v51  ;;  %v1273_v17 = vsel %vm1262_vm3, %v1240_v0, %v4237_v26 }
 0x224   : > { %v1263_v59 = vsel %vm1262_vm3, %v1230_v6, %v4238_v16  ;;  %v1306_v2 = vsel %vm1295_vm4, %v1273_v17, %v4240_v33  ;;  %v1907_v6 = vld [vmem:[%s1974_s17 + $0x18] sm:$0xff]  ;;  %v1908_v17 = vld [vmem:[%s1974_s17 + $0x20] sm:$0xff]  ;;  %v4251_v33 = vld [vmem:[#allocation119_spill] sm:$0xff] }
 0x225   : > { %1093 = vrot.lane.b32.xlu2 %v4229_v41, %s1937_s24  ;;  %v1906_v41 = vld [vmem:[%s1974_s17 + $0x170] sm:$0xff]  ;;  %v1339_v47 = vsel %vm1328_vm5, %v1306_v2, %v2932_v13 }
 0x226   : > { %1061 = vrot.lane.b32.xlu1 %v4232_v60, %s1937_s24  ;;  %997 = vrot.lane.b32.xlu0 %v2694_v29, %s1936_s23  ;;  %v1261_v56 = vsel %vm1229_vm2, %v1906_v41, %v4239_v14  ;;  %v1296_v60 = vsel %vm1295_vm4, %v1263_v59, %v4241_v9  ;;  %v4252_v9 = vld [vmem:[#allocation120_spill] sm:$0xff] }
 0x227   : > { %v956_v52 = vpop.permute.xlu2 %955  ;;  %v1294_v10 = vsel %vm1262_vm3, %v1261_v56, %v4242_v3  ;;  %v4250_v56 = vld [vmem:[#allocation47_spill] sm:$0xff]  ;;  %v4253_v3 = vld [vmem:[#allocation29_spill] sm:$0xff] }
 0x228   : > { %v904_v38 = vpop.permute.xlu1 %903  ;;  %v3303_v29 = vsel %vm1394_vm7, %v1369_v21, %v956_v52  ;;  %v902_v49 = vpop.permute.xlu0 %901  ;;  %v4244_v21 = vld [vmem:[#allocation134_spill] sm:$0xff] }
 0x229   : > { %v3306_v58 = vsel %vm1361_vm6, %v1358_v31, %v904_v38  ;;  %v3309_v28 = vsel %vm1361_vm6, %v1357_v40, %v902_v49  ;;  %v1327_v52 = vsel %vm1295_vm4, %v1294_v10, %v4244_v21  ;;  %v4245_v31 = vld [vmem:[#allocation141_spill] sm:$0xff]  ;;  %v1372_v38 = vsel %vm1361_vm6, %v1339_v47, %v3094_v42  ;;  %v4254_v10 = vld [vmem:[#allocation15_spill] sm:$0xff] }
 0x22a   : > { %v1329_v40 = vsel %vm1328_vm5, %v1296_v60, %v4245_v31  ;;  %v1360_v15 = vsel %vm1328_vm5, %v1327_v52, %v3021_v39  ;;  %v4246_v42 = vld [vmem:[#allocation45_spill] sm:$0xff]  ;;  %v4248_v39 = vld [vmem:[#allocation83_spill] sm:$0xff] }
 0x22b   : > { %v1362_v13 = vsel %vm1361_vm6, %v1329_v40, %v2985_v32  ;;  %v1232_v26 = vsel %vm1229_vm2, %v1907_v6, %v4246_v42  ;;  %v4247_v32 = vld [vmem:[#allocation51_spill] sm:$0xff]  ;;  %v4257_v6 = vld [vmem:[#allocation74_spill] sm:$0xff] }
 0x22c   : > { %v1233_v16 = vsel %vm1229_vm2, %v1908_v17, %v4247_v32  ;;  %v4255_v47 = vld [vmem:[#allocation31_spill] sm:$0xff]  ;;  %v4258_v17 = vld [vmem:[#allocation36_spill] sm:$0xff] }
 0x22d   : > { %995 = vrot.lane.b32.xlu2 %v1906_v41, %s1936_s23  ;;  %v1266_v59 = vsel %vm1262_vm3, %v1233_v16, %v4248_v39  ;;  %v4249_v41 = vld [vmem:[#allocation92_spill] sm:$0xff]  ;;  %v4256_v21 = vld [vmem:[#allocation143_spill] sm:$0xff]  ;;  %v4259_v16 = vld [vmem:[#allocation58_spill] sm:$0xff] }
 0x22e   : > { %1189 = vrot.lane.b32.xlu1 %v2963_v7, %s1938_s25  ;;  %1157 = vrot.lane.b32.xlu0 %v4243_v4, %s1938_s25  ;;  %v1265_v14 = vsel %vm1262_vm3, %v1232_v26, %v4249_v41  ;;  %v1299_v2 = vsel %vm1295_vm4, %v1266_v59, %v4251_v33  ;;  %v1910_v26 = vld [vmem:[%s1974_s17 + $0x38] sm:$0xff]  ;;  %v1911_v32 = vld [vmem:[%s1974_s17 + $0x48] sm:$0xff]  ;;  %v4260_v39 = vld [vmem:[#allocation104_spill] sm:$0xff] }
 0x22f   : > { %v962_v49 = vpop.permute.xlu2 %961  ;;  %v1298_v60 = vsel %vm1295_vm4, %v1265_v14, %v4252_v9  ;;  %v1332_v52 = vsel %vm1328_vm5, %v1299_v2, %v4256_v21  ;;  %v4261_v41 = vld [vmem:[#allocation85_spill] sm:$0xff]  ;;  %v4267_v21 = vld [vmem:[#allocation148_spill] sm:$0xff] }
 0x230   : > { %v942_v7 = vpop.permute.xlu1 %941  ;;  %v3348_v54 = vsel %vm1394_vm7, %v1372_v38, %v962_v49  ;;  %v908_v0 = vpop.permute.xlu0 %907  ;;  %v1331_v4 = vsel %vm1328_vm5, %v1298_v60, %v4255_v47  ;;  %v1365_v40 = vsel %vm1361_vm6, %v1332_v52, %v2995_v1  ;;  %v1235_v1 = vsel %vm1229_vm2, %v1910_v26, %v4258_v17  ;;  %v4263_v2 = vld [vmem:[#allocation17_spill] sm:$0xff]  ;;  %v4264_v60 = vld [vmem:[#allocation10_spill] sm:$0xff] }
 0x231   : > { %v3351_v23 = vsel %vm1394_vm7, %v1362_v13, %v942_v7  ;;  %v3354_v51 = vsel %vm1361_vm6, %v1360_v15, %v908_v0  ;;  %v1364_v38 = vsel %vm1361_vm6, %v1331_v4, %v3033_v50  ;;  %v1909_v0 = vld [vmem:[%s1974_s17 + $0xc0] sm:$0xff]  ;;  %v1236_v50 = vsel %vm1229_vm2, %v1911_v32, %v4259_v16  ;;  %v4266_v47 = vld [vmem:[#allocation121_spill] sm:$0xff] }
 0x232   : > { %v1246_v42 = vsel %vm1229_vm2, %v1909_v0, %v4257_v6  ;;  %v1269_v14 = vsel %vm1262_vm3, %v1236_v50, %v4261_v41  ;;  %v1914_v41 = vld [vmem:[%s1974_s17 + $0x60] sm:$0xff] }
 0x233   : > { %v1279_v59 = vsel %vm1262_vm3, %v1246_v42, %v4260_v39  ;;  %v1913_v39 = vld [vmem:[%s1974_s17 + $0xe0] sm:$0xff] }
 0x234   : > { %v1312_v9 = vsel %vm1295_vm4, %v1279_v59, %v4263_v2  ;;  %v4273_v2 = vld [vmem:[#allocation105_spill] sm:$0xff] }
 0x235   : > { %1155 = vrot.lane.b32.xlu2 %v4250_v56, %s1938_s25  ;;  %v4262_v56 = vld [vmem:[#allocation95_spill] sm:$0xff]  ;;  %v1345_v52 = vsel %vm1328_vm5, %v1312_v9, %v4267_v21 }
 0x236   : > { %1091 = vrot.lane.b32.xlu1 %v4253_v3, %s1937_s24  ;;  %1059 = vrot.lane.b32.xlu0 %v4254_v10, %s1937_s24  ;;  %v1268_v33 = vsel %vm1262_vm3, %v1235_v1, %v4262_v56  ;;  %v4265_v3 = vld [vmem:[#allocation18_spill] sm:$0xff]  ;;  %v1378_v6 = vsel %vm1361_vm6, %v1345_v52, %v3139_v12  ;;  %v4270_v12 = vld [vmem:[#allocation80_spill] sm:$0xff]  ;;  %v4272_v56 = vld [vmem:[#allocation63_spill] sm:$0xff] }
 0x237   : > { %v3380_v31 = vpop.permute.xlu2 %967  ;;  %v1302_v10 = vsel %vm1295_vm4, %v1269_v14, %v4265_v3  ;;  %v1301_v4 = vsel %vm1295_vm4, %v1268_v33, %v4266_v47  ;;  %v1249_v59 = vsel %vm1229_vm2, %v1913_v39, %v4270_v12  ;;  %v4277_v52 = vld [vmem:[#allocation76_spill] sm:$0xff] }
 0x238   : > { %v948_v49 = vpop.permute.xlu1 %947  ;;  %v946_v13 = vpop.permute.xlu0 %945  ;;  %v1282_v9 = vsel %vm1262_vm3, %v1249_v59, %v4273_v2 }
 0x239   : > { %v3387_v15 = vsel %vm1394_vm7, %v1365_v40, %v948_v49  ;;  %v3390_v7 = vsel %vm1394_vm7, %v1364_v38, %v946_v13  ;;  %v1912_v40 = vld [vmem:[%s1974_s17 + $0x168] sm:$0xff]  ;;  %v4268_v38 = vld [vmem:[#allocation136_spill] sm:$0xff] }
 0x23a   : > { %v1334_v49 = vsel %vm1328_vm5, %v1301_v4, %v4268_v38  ;;  %v4269_v13 = vld [vmem:[#allocation144_spill] sm:$0xff]  ;;  %v4276_v4 = vld [vmem:[#allocation122_spill] sm:$0xff] }
 0x23b   : > { %v1335_v0 = vsel %vm1328_vm5, %v1302_v10, %v4269_v13  ;;  %v1367_v17 = vsel %vm1361_vm6, %v1334_v49, %v3045_v63  ;;  %v1915_v63 = vld [vmem:[%s1974_s17 + $0x68] sm:$0xff]  ;;  %v4275_v10 = vld [vmem:[#allocation97_spill] sm:$0xff]  ;;  %v1315_v21 = vsel %vm1295_vm4, %v1282_v9, %v4276_v4  ;;  %v4279_v49 = vld [vmem:[#allocation124_spill] sm:$0xff] }
 0x23c   : > { %v1368_v26 = vsel %vm1361_vm6, %v1335_v0, %v3007_v24  ;;  %v4271_v24 = vld [vmem:[#allocation40_spill] sm:$0xff]  ;;  %v1239_v33 = vsel %vm1229_vm2, %v1915_v63, %v4272_v56  ;;  %v1348_v0 = vsel %vm1328_vm5, %v1315_v21, %v2974_v27  ;;  %v4288_v4 = vld [vmem:[#allocation26_spill] sm:$0xff]  ;;  %v4289_v21 = vld [vmem:[#allocation125_spill] sm:$0xff] }
 0x23d   : > { %1057 = vrot.lane.b32.xlu2 %v4264_v60, %s1937_s24  ;;  %v1238_v14 = vsel %vm1229_vm2, %v1914_v41, %v4271_v24  ;;  %v4274_v60 = vld [vmem:[#allocation88_spill] sm:$0xff]  ;;  %v1381_v39 = vsel %vm1361_vm6, %v1348_v0, %v3168_v36 }
 0x23e   : > { %993 = vrot.lane.b32.xlu1 %v1912_v40, %s1936_s23  ;;  %1187 = vrot.lane.b32.xlu0 %v2568_v55, %s1938_s25  ;;  %v1272_v3 = vsel %vm1262_vm3, %v1239_v33, %v4274_v60  ;;  %v1271_v47 = vsel %vm1262_vm3, %v1238_v14, %v4275_v10  ;;  %v4278_v40 = vld [vmem:[#allocation123_spill] sm:$0xff]  ;;  %v1916_v33 = vld [vmem:[%s1974_s17 + $0x80] sm:$0xff]  ;;  %v4284_v36 = vld [vmem:[#allocation44_spill] sm:$0xff] }
 0x23f   : > { %v974_v42 = vpop.permute.xlu2 %973  ;;  %v1305_v38 = vsel %vm1295_vm4, %v1272_v3, %v4278_v40  ;;  %v1304_v13 = vsel %vm1295_vm4, %v1271_v47, %v4279_v49  ;;  %v1241_v2 = vsel %vm1229_vm2, %v1916_v33, %v4284_v36  ;;  %v1917_v9 = vld [vmem:[%s1974_s17 + $0x90] sm:$0xff]  ;;  %v4287_v10 = vld [vmem:[#allocation99_spill] sm:$0xff]  ;;  %v4290_v40 = vld [vmem:[#allocation126_spill] sm:$0xff] }
 0x240   : > { %v954_v1 = vpop.permute.xlu1 %953  ;;  %v3432_v55 = vsel %vm1394_vm7, %v1378_v6, %v974_v42  ;;  %v952_v32 = vpop.permute.xlu0 %951  ;;  %v4280_v6 = vld [vmem:[#allocation48_spill] sm:$0xff]  ;;  %v4281_v42 = vld [vmem:[#allocation30_spill] sm:$0xff]  ;;  %v1274_v47 = vsel %vm1262_vm3, %v1241_v2, %v4287_v10  ;;  %v4291_v49 = vld [vmem:[#allocation11_spill] sm:$0xff] }
 0x241   : > { %v3435_v16 = vsel %vm1394_vm7, %v1368_v26, %v954_v1  ;;  %v3438_v50 = vsel %vm1394_vm7, %v1367_v17, %v952_v32  ;;  %v4282_v26 = vld [vmem:[#allocation138_spill] sm:$0xff]  ;;  %v4283_v1 = vld [vmem:[#allocation145_spill] sm:$0xff]  ;;  %v4296_v33 = vld [vmem:[#allocation56_spill] sm:$0xff] }
 0x242   : > { %v1337_v17 = vsel %vm1328_vm5, %v1304_v13, %v4282_v26  ;;  %v1338_v32 = vsel %vm1328_vm5, %v1305_v38, %v4283_v1  ;;  %v1307_v38 = vsel %vm1295_vm4, %v1274_v47, %v4290_v40  ;;  %v4292_v13 = vld [vmem:[#allocation140_spill] sm:$0xff]  ;;  %v4297_v2 = vld [vmem:[#allocation103_spill] sm:$0xff]  ;;  %v4302_v10 = vld [vmem:[#allocation53_spill] sm:$0xff] }
 0x243   : > { %v1371_v27 = vsel %vm1361_vm6, %v1338_v32, %v3019_v37  ;;  %v1370_v59 = vsel %vm1361_vm6, %v1337_v17, %v3063_v61  ;;  %v4285_v37 = vld [vmem:[#allocation69_spill] sm:$0xff]  ;;  %v4286_v61 = vld [vmem:[#allocation91_spill] sm:$0xff]  ;;  %v1340_v0 = vsel %vm1328_vm5, %v1307_v38, %v4292_v13 }
 0x244   : > { %v1242_v60 = vsel %vm1229_vm2, %v1917_v9, %v4285_v37  ;;  %v1373_v1 = vsel %vm1361_vm6, %v1340_v0, %v3089_v57  ;;  %v4295_v57 = vld [vmem:[#allocation49_spill] sm:$0xff]  ;;  %v4299_v37 = vld [vmem:[#allocation131_spill] sm:$0xff]  ;;  %v1919_v0 = vld [vmem:[%s1974_s17 + $0x140] sm:$0xff] }
 0x245   : > { %1185 = vrot.lane.b32.xlu2 %v4277_v52, %s1938_s25  ;;  %v1275_v3 = vsel %vm1262_vm3, %v1242_v60, %v4286_v61  ;;  %v4300_v61 = vld [vmem:[#allocation27_spill] sm:$0xff] }
 0x246   : > { %1153 = vrot.lane.b32.xlu1 %v4280_v6, %s1938_s25  ;;  %1089 = vrot.lane.b32.xlu0 %v4281_v42, %s1937_s24  ;;  %v1308_v52 = vsel %vm1295_vm4, %v1275_v3, %v4289_v21  ;;  %v4293_v6 = vld [vmem:[#allocation147_spill] sm:$0xff]  ;;  %v4301_v3 = vld [vmem:[#allocation12_spill] sm:$0xff] }
 0x247   : > { %v980_v12 = vpop.permute.xlu2 %979  ;;  %v1341_v42 = vsel %vm1328_vm5, %v1308_v52, %v4293_v6  ;;  %v4303_v13 = vld [vmem:[#allocation7_spill] sm:$0xff]  ;;  %v4304_v6 = vld [vmem:[#allocation78_spill] sm:$0xff] }
 0x248   : > { %v960_v41 = vpop.permute.xlu1 %959  ;;  %v3480_v24 = vsel %vm1394_vm7, %v1381_v39, %v980_v12  ;;  %v958_v14 = vpop.permute.xlu0 %957  ;;  %v1374_v17 = vsel %vm1361_vm6, %v1341_v42, %v3031_v48  ;;  %v4294_v48 = vld [vmem:[#allocation77_spill] sm:$0xff] }
 0x249   : > { %v3483_v63 = vsel %vm1394_vm7, %v1371_v27, %v960_v41  ;;  %v3486_v56 = vsel %vm1394_vm7, %v1370_v59, %v958_v14  ;;  %v1918_v14 = vld [vmem:[%s1974_s17 + $0xc8] sm:$0xff] }
 0x24a   : > { %v1247_v36 = vsel %vm1229_vm2, %v1918_v14, %v4296_v33  ;;  %v1920_v33 = vld [vmem:[%s1974_s17 + $0xb0] sm:$0xff] }
 0x24b   : > { %v1280_v9 = vsel %vm1262_vm3, %v1247_v36, %v4297_v2  ;;  %v4309_v2 = vld [vmem:[#allocation94_spill] sm:$0xff] }
 0x24c   : > { %v1313_v60 = vsel %vm1295_vm4, %v1280_v9, %v4299_v37  ;;  %v4310_v9 = vld [vmem:[#allocation128_spill] sm:$0xff]  ;;  %v4311_v37 = vld [vmem:[#allocation149_spill] sm:$0xff] }
 0x24d   : > { %1087 = vrot.lane.b32.xlu2 %v4288_v4, %s1937_s24  ;;  %v1346_v47 = vsel %vm1328_vm5, %v1313_v60, %v4302_v10  ;;  %v4313_v10 = vld [vmem:[#allocation150_spill] sm:$0xff] }
 0x24e   : > { %1055 = vrot.lane.b32.xlu1 %v4291_v49, %s1937_s24  ;;  %991 = vrot.lane.b32.xlu0 %v3267_v11, %s1936_s23  ;;  %v1379_v21 = vsel %vm1361_vm6, %v1346_v47, %v3134_v19 }
 0x24f   : > { %v986_v26 = vpop.permute.xlu2 %985 }
 0x250   : > { %v966_v32 = vpop.permute.xlu1 %965  ;;  %v3518_v39 = vsel %vm1394_vm7, %v3215_v53, %v986_v26  ;;  %v964_v11 = vpop.permute.xlu0 %963 }
 0x251   : > { %v3521_v12 = vsel %vm1394_vm7, %v1374_v17, %v966_v32  ;;  %v3524_v27 = vsel %vm1394_vm7, %v1373_v1, %v964_v11  ;;  %v4305_v1 = vld [vmem:[#allocation70_spill] sm:$0xff]  ;;  %v4307_v11 = vld [vmem:[#allocation28_spill] sm:$0xff] }
 0x252   : > { %v4306_v32 = vld [vmem:[#allocation42_spill] sm:$0xff] }
 0x255   : > { %989 = vrot.lane.b32.xlu2 %v3273_v34, %s1936_s23  ;;  %v4298_v34 = vld [vmem:[#allocation41_spill] sm:$0xff] }
 0x256   : > { %1183 = vrot.lane.b32.xlu1 %v4294_v48, %s1938_s25  ;;  %1151 = vrot.lane.b32.xlu0 %v4295_v57, %s1938_s25 }
 0x257   : > { %v1100_v59 = vpop.permute.xlu2 %1099 }
 0x258   : > { %v972_v41 = vpop.permute.xlu1 %971  ;;  %v3532_v53 = vpop.permute.xlu0 %969 }
 0x25d   : > { %1149 = vrot.lane.b32.xlu2 %v4298_v34, %s1938_s25 }
 0x25e   : > { %1085 = vrot.lane.b32.xlu1 %v4300_v61, %s1937_s24  ;;  %1053 = vrot.lane.b32.xlu0 %v4301_v3, %s1937_s24  ;;  %v4312_v3 = vld [vmem:[#allocation43_spill] sm:$0xff] }
 0x25f   : > { %v3549_v4 = vpop.permute.xlu2 %1001 }
 0x260   : > { %v978_v52 = vpop.permute.xlu1 %977  ;;  %v976_v40 = vpop.permute.xlu0 %975 }
 0x261   : > { %v3555_v38 = vsel %vm1394_vm7, %v3066_v45, %v978_v52  ;;  %v3558_v49 = vsel %vm1394_vm7, %v1379_v21, %v976_v40  ;;  %v4314_v21 = vld [vmem:[#allocation23_spill] sm:$0xff]  ;;  %v4315_v52 = vld [vmem:[#allocation8_spill] sm:$0xff] }
 0x265   : > { %1051 = vrot.lane.b32.xlu2 %v4303_v13, %s1937_s24 }
 0x266   : > { %987 = vrot.lane.b32.xlu1 %v1919_v0, %s1936_s23  ;;  %1181 = vrot.lane.b32.xlu0 %v4304_v6, %s1938_s25 }
 0x267   : > { %v1162_v19 = vpop.permute.xlu2 %1161 }
 0x268   : > { %v984_v42 = vpop.permute.xlu1 %983  ;;  %v982_v26 = vpop.permute.xlu0 %981 }
 0x269   : > { %v3568_v45 = vsel %vm1394_vm7, %v3092_v5, %v984_v42  ;;  %v3572_v17 = vsel %vm1394_vm7, %v3171_v35, %v982_v26  ;;  %v4308_v5 = vld [vmem:[#allocation75_spill] sm:$0xff] }
 0x26a   : > { %v1245_v36 = vsel %vm1229_vm2, %v1920_v33, %v4308_v5  ;;  %v4319_v5 = vld [vmem:[#allocation24_spill] sm:$0xff] }
 0x26b   : > { %v1278_v35 = vsel %vm1262_vm3, %v1245_v36, %v4309_v2  ;;  %v4320_v36 = vld [vmem:[#allocation142_spill] sm:$0xff] }
 0x26c   : > { %v1311_v34 = vsel %vm1295_vm4, %v1278_v35, %v4310_v9  ;;  %v4321_v35 = vld [vmem:[#allocation9_spill] sm:$0xff]  ;;  %v4322_v9 = vld [vmem:[#allocation71_spill] sm:$0xff] }
 0x26d   : > { %1179 = vrot.lane.b32.xlu2 %v4305_v1, %s1938_s25  ;;  %v1344_v60 = vsel %vm1328_vm5, %v1311_v34, %v4311_v37 }
 0x26e   : > { %1147 = vrot.lane.b32.xlu1 %v4306_v32, %s1938_s25  ;;  %1083 = vrot.lane.b32.xlu0 %v4307_v11, %s1937_s24  ;;  %v1377_v47 = vsel %vm1361_vm6, %v1344_v60, %v4313_v10  ;;  %v1921_v32 = vld [vmem:[%s1974_s17 + $0xa8] sm:$0xff]  ;;  %v4316_v11 = vld [vmem:[#allocation50_spill] sm:$0xff] }
 0x26f   : > { %v3580_v48 = vpop.permute.xlu2 %1063  ;;  %v1410_v40 = vsel %vm1394_vm7, %v1377_v47, %v972_v41  ;;  %v1244_v41 = vsel %vm1229_vm2, %v1921_v32, %v4316_v11  ;;  %v4327_v32 = vld [vmem:[#allocation102_spill] sm:$0xff] }
 0x270   : > { %v1068_v57 = vpop.permute.xlu1 %1067  ;;  %v1004_v14 = vpop.permute.xlu0 %1003 }
 0x271   : > { %v1426_v61 = vsel %vm1394_vm7, %v3354_v51, %v1004_v14  ;;  %v1443_v51 = vsel %vm1427_vm8, %v1410_v40, %v1068_v57  ;;  %v4317_v57 = vld [vmem:[#allocation101_spill] sm:$0xff] }
 0x272   : > { %v1459_v42 = vsel %vm1427_vm8, %v1426_v61, %v1100_v59  ;;  %v1277_v14 = vsel %vm1262_vm3, %v1244_v41, %v4317_v57  ;;  %v4318_v59 = vld [vmem:[#allocation129_spill] sm:$0xff]  ;;  %v4329_v41 = vld [vmem:[#allocation146_spill] sm:$0xff] }
 0x273   : > { %v1310_v33 = vsel %vm1295_vm4, %v1277_v14, %v4318_v59  ;;  %v4330_v14 = vld [vmem:[#allocation64_spill] sm:$0xff] }
 0x274   : > { %v1343_v2 = vsel %vm1328_vm5, %v1310_v33, %v4320_v36  ;;  %v4331_v33 = vld [vmem:[#allocation38_spill] sm:$0xff] }
 0x275   : > { %1145 = vrot.lane.b32.xlu2 %v4312_v3, %s1938_s25  ;;  %v1376_v34 = vsel %vm1361_vm6, %v1343_v2, %v3112_v62  ;;  %v4324_v62 = vld [vmem:[#allocation72_spill] sm:$0xff] }
 0x276   : > { %1081 = vrot.lane.b32.xlu1 %v4314_v21, %s1937_s24  ;;  %1049 = vrot.lane.b32.xlu0 %v4315_v52, %s1937_s24  ;;  %v1409_v60 = vsel %vm1394_vm7, %v1376_v34, %v3532_v53  ;;  %v4323_v21 = vld [vmem:[#allocation4_spill] sm:$0xff]  ;;  %v4325_v52 = vld [vmem:[#allocation37_spill] sm:$0xff]  ;;  %v1425_v53 = vsel %vm1394_vm7, %v3166_v43, %v3549_v4  ;;  %v4328_v43 = vld [vmem:[#allocation118_spill] sm:$0xff] }
 0x277   : > { %v1192_v13 = vpop.permute.xlu2 %1191 }
 0x278   : > { %v1196_v0 = vpop.permute.xlu1 %1195  ;;  %v1164_v6 = vpop.permute.xlu0 %1163 }
 0x279   : > { %v1476_v26 = vsel %vm1460_vm9, %v1443_v51, %v1164_v6  ;;  %v1492_v1 = vsel %vm1460_vm9, %v1459_v42, %v1196_v0  ;;  %v1922_v42 = vld [vmem:[%s1974_s17 + $0x98] sm:$0xff] }
 0x27a   : > { %1794 = vmatpush.xpose.msk.msra.mxu0 %vm1535_vm10, %v1476_v26  ;;  %1840 = vmatpush.xpose.msk.msra.mxu2 %vm1535_vm10, %v1476_v26  ;;  %v4326_v26 = vld [vmem:[#allocation68_spill] sm:$0xff] }
 0x27b   : > { %1816 = vmatpush.xpose.msk.msra.mxu1 %vm1535_vm10, %v1492_v1  ;;  %1856 = vmatpush.xpose.msk.msra.mxu3 %vm1535_vm10, %v1492_v1  ;;  %v1243_v1 = vsel %vm1229_vm2, %v1922_v42, %v4326_v26 }
 0x27c   : > { %v1276_v11 = vsel %vm1262_vm3, %v1243_v1, %v4327_v32  ;;  %v4339_v1 = vld [vmem:[#allocation3_spill] sm:$0xff] }
 0x27d   : > { %1079 = vrot.lane.b32.xlu2 %v4319_v5, %s1937_s24  ;;  %v1309_v4 = vsel %vm1295_vm4, %v1276_v11, %v4328_v43  ;;  %v4332_v5 = vld [vmem:[#allocation25_spill] sm:$0xff] }
 0x27e   : > { %1047 = vrot.lane.b32.xlu1 %v4321_v35, %s1937_s24  ;;  %1177 = vrot.lane.b32.xlu0 %v4322_v9, %s1938_s25  ;;  %v1342_v57 = vsel %vm1328_vm5, %v1309_v4, %v4329_v41 }
 0x27f   : > { %v1094_v37 = vpop.permute.xlu2 %1093  ;;  %v1375_v59 = vsel %vm1361_vm6, %v1342_v57, %v3117_v20  ;;  %v4342_v57 = vld [vmem:[#allocation59_spill] sm:$0xff] }
 0x280   : > { %v1098_v61 = vpop.permute.xlu1 %1097  ;;  %v1066_v3 = vpop.permute.xlu0 %1065  ;;  %v1408_v36 = vsel %vm1394_vm7, %v1375_v59, %v3380_v31  ;;  %v4333_v31 = vld [vmem:[#allocation39_spill] sm:$0xff]  ;;  %v4344_v59 = vld [vmem:[#allocation21_spill] sm:$0xff] }
 0x281   : > { %v1442_v10 = vsel %vm1427_vm8, %v1409_v60, %v1066_v3  ;;  %v1441_v35 = vsel %vm1427_vm8, %v1408_v36, %v3580_v48  ;;  %v4335_v48 = vld [vmem:[#allocation5_spill] sm:$0xff] }
 0x282   : > { %v1475_v47 = vsel %vm1460_vm9, %v1442_v10, %v1162_v19  ;;  %v1458_v19 = vsel %vm1427_vm8, %v1425_v53, %v1098_v61  ;;  %v4338_v53 = vld [vmem:[#allocation65_spill] sm:$0xff] }
 0x283   : > { %1795 = vmatpush.xpose.msk.msra.mxu0 %vm1535_vm10, %v1475_v47  ;;  %1841 = vmatpush.xpose.msk.msra.mxu2 %vm1535_vm10, %v1475_v47 }
 0x285   : > { %1045 = vrot.lane.b32.xlu2 %v4323_v21, %s1937_s24 }
 0x286   : > { %1175 = vrot.lane.b32.xlu1 %v4324_v62, %s1938_s25  ;;  %1143 = vrot.lane.b32.xlu0 %v4325_v52, %s1938_s25  ;;  %v4337_v52 = vld [vmem:[#allocation6_spill] sm:$0xff] }
 0x287   : > { %v3642_v40 = vpop.permute.xlu2 %995 }
 0x288   : > { %v1000_v51 = vpop.permute.xlu1 %999  ;;  %v1194_v0 = vpop.permute.xlu0 %1193 }
 0x289   : > { %v1491_v6 = vsel %vm1460_vm9, %v1458_v19, %v1194_v0  ;;  %v1424_v9 = vsel %vm1394_vm7, %v3306_v58, %v1000_v51  ;;  %v4334_v58 = vld [vmem:[#allocation19_spill] sm:$0xff] }
 0x28a   : > { %1817 = vmatpush.xpose.msk.msra.mxu1 %vm1535_vm10, %v1491_v6  ;;  %1857 = vmatpush.xpose.msk.msra.mxu3 %vm1535_vm10, %v1491_v6 }
 0x28d   : > { %1173 = vrot.lane.b32.xlu2 %v4330_v14, %s1938_s25  ;;  %v4343_v14 = vld [vmem:[#allocation34_spill] sm:$0xff] }
 0x28e   : > { %1141 = vrot.lane.b32.xlu1 %v4331_v33, %s1938_s25  ;;  %1077 = vrot.lane.b32.xlu0 %v4332_v5, %s1937_s24  ;;  %v1422_v33 = vsel %vm1394_vm7, %v3137_v18, %v3642_v40 }
 0x28f   : > { %v1156_v2 = vpop.permute.xlu2 %1155 }
 0x290   : > { %v1160_v34 = vpop.permute.xlu1 %1159  ;;  %v1096_v60 = vpop.permute.xlu0 %1095 }
 0x291   : > { %v1457_v20 = vsel %vm1427_vm8, %v1424_v9, %v1096_v60  ;;  %v1474_v61 = vsel %vm1460_vm9, %v1441_v35, %v1160_v34  ;;  %v4345_v9 = vld [vmem:[#allocation35_spill] sm:$0xff]  ;;  %v4346_v34 = vld [vmem:[#allocation16_spill] sm:$0xff]  ;;  %v4347_v60 = vld [vmem:[#allocation2_spill] sm:$0xff] }
 0x292   : > { %1796 = vmatpush.xpose.msk.msra.mxu0 %vm1535_vm10, %v1474_v61  ;;  %1842 = vmatpush.xpose.msk.msra.mxu2 %vm1535_vm10, %v1474_v61  ;;  %v1490_v3 = vsel %vm1460_vm9, %v1457_v20, %v1192_v13  ;;  %v4336_v13 = vld [vmem:[#allocation20_spill] sm:$0xff] }
 0x293   : > { %1818 = vmatpush.xpose.msk.msra.mxu1 %vm1535_vm10, %v1490_v3  ;;  %1858 = vmatpush.xpose.msk.msra.mxu3 %vm1535_vm10, %v1490_v3 }
 0x295   : > { %1139 = vrot.lane.b32.xlu2 %v4333_v31, %s1938_s25 }
 0x296   : > { %1075 = vrot.lane.b32.xlu1 %v4334_v58, %s1937_s24  ;;  %1043 = vrot.lane.b32.xlu0 %v4335_v48, %s1937_s24 }
 0x297   : > { %v1058_v10 = vpop.permute.xlu2 %1057 }
 0x298   : > { %v1062_v47 = vpop.permute.xlu1 %1061  ;;  %v998_v21 = vpop.permute.xlu0 %997  ;;  %v1438_v18 = vsel %vm1427_vm8, %v3348_v54, %v1058_v10  ;;  %v4348_v54 = vld [vmem:[#allocation60_spill] sm:$0xff] }
 0x299   : > { %v1423_v62 = vsel %vm1394_vm7, %v3309_v28, %v998_v21  ;;  %v1440_v51 = vsel %vm1427_vm8, %v3521_v12, %v1062_v47  ;;  %v4340_v12 = vld [vmem:[#allocation66_spill] sm:$0xff] }
 0x29a   : > { %v1456_v42 = vsel %vm1427_vm8, %v1423_v62, %v1094_v37  ;;  %v4341_v37 = vld [vmem:[#allocation33_spill] sm:$0xff] }
 0x29d   : > { %1073 = vrot.lane.b32.xlu2 %v4336_v13, %s1937_s24 }
 0x29e   : > { %1041 = vrot.lane.b32.xlu1 %v4337_v52, %s1937_s24  ;;  %1171 = vrot.lane.b32.xlu0 %v4338_v53, %s1938_s25 }
 0x29f   : > { %v1186_v19 = vpop.permute.xlu2 %1185 }
 0x2a0   : > { %v1190_v0 = vpop.permute.xlu1 %1189  ;;  %v1158_v6 = vpop.permute.xlu0 %1157 }
 0x2a1   : > { %v1473_v26 = vsel %vm1460_vm9, %v1440_v51, %v1158_v6  ;;  %v1489_v28 = vsel %vm1460_vm9, %v1456_v42, %v1190_v0 }
 0x2a2   : > { %1797 = vmatpush.xpose.msk.msra.mxu0 %vm1535_vm10, %v1473_v26  ;;  %1843 = vmatpush.xpose.msk.msra.mxu2 %vm1535_vm10, %v1473_v26 }
 0x2a3   : > { %1819 = vmatpush.xpose.msk.msra.mxu1 %vm1535_vm10, %v1489_v28  ;;  %1859 = vmatpush.xpose.msk.msra.mxu3 %vm1535_vm10, %v1489_v28 }
 0x2a5   : > { %1039 = vrot.lane.b32.xlu2 %v4339_v1, %s1937_s24 }
 0x2a6   : > { %1169 = vrot.lane.b32.xlu1 %v4340_v12, %s1938_s25  ;;  %1137 = vrot.lane.b32.xlu0 %v4341_v37, %s1938_s25 }
 0x2a7   : > { %v1088_v32 = vpop.permute.xlu2 %1087 }
 0x2a8   : > { %v1092_v11 = vpop.permute.xlu1 %1091  ;;  %v1060_v43 = vpop.permute.xlu0 %1059 }
 0x2a9   : > { %v1439_v4 = vsel %vm1427_vm8, %v3524_v27, %v1060_v43  ;;  %v1455_v27 = vsel %vm1427_vm8, %v1422_v33, %v1092_v11 }
 0x2aa   : > { %v1472_v41 = vsel %vm1460_vm9, %v1439_v4, %v1156_v2 }
 0x2ab   : > { %1798 = vmatpush.xpose.msk.msra.mxu0 %vm1535_vm10, %v1472_v41  ;;  %1844 = vmatpush.xpose.msk.msra.mxu2 %vm1535_vm10, %v1472_v41 }
 0x2ad   : > { %1167 = vrot.lane.b32.xlu2 %v4342_v57, %s1938_s25 }
 0x2ae   : > { %1135 = vrot.lane.b32.xlu1 %v4343_v14, %s1938_s25  ;;  %1071 = vrot.lane.b32.xlu0 %v4344_v59, %s1937_s24 }
 0x2af   : > { %v990_v2 = vpop.permute.xlu2 %989 }
 0x2b0   : > { %v994_v5 = vpop.permute.xlu1 %993  ;;  %v1188_v36 = vpop.permute.xlu0 %1187  ;;  %v1419_v26 = vsel %vm1394_vm7, %v3115_v30, %v990_v2 }
 0x2b1   : > { %v1488_v35 = vsel %vm1460_vm9, %v1455_v27, %v1188_v36  ;;  %v1421_v40 = vsel %vm1394_vm7, %v3256_v44, %v994_v5 }
 0x2b2   : > { %1820 = vmatpush.xpose.msk.msra.mxu1 %vm1535_vm10, %v1488_v35  ;;  %1860 = vmatpush.xpose.msk.msra.mxu3 %vm1535_vm10, %v1488_v35 }
 0x2b5   : > { %1133 = vrot.lane.b32.xlu2 %v4345_v9, %s1938_s25 }
 0x2b6   : > { %1069 = vrot.lane.b32.xlu1 %v4346_v34, %s1937_s24  ;;  %1037 = vrot.lane.b32.xlu0 %v4347_v60, %s1937_s24 }
 0x2b7   : > { %v1150_v48 = vpop.permute.xlu2 %1149 }
 0x2b8   : > { %v1154_v20 = vpop.permute.xlu1 %1153  ;;  %v1090_v61 = vpop.permute.xlu0 %1089 }
 0x2b9   : > { %v1454_v3 = vsel %vm1427_vm8, %v1421_v40, %v1090_v61  ;;  %v1471_v31 = vsel %vm1460_vm9, %v1438_v18, %v1154_v20 }
 0x2ba   : > { %1799 = vmatpush.xpose.msk.msra.mxu0 %vm1535_vm10, %v1471_v31  ;;  %1845 = vmatpush.xpose.msk.msra.mxu2 %vm1535_vm10, %v1471_v31  ;;  %v1487_v58 = vsel %vm1460_vm9, %v1454_v3, %v1186_v19 }
 0x2bb   : > { %1821 = vmatpush.xpose.msk.msra.mxu1 %vm1535_vm10, %v1487_v58  ;;  %1861 = vmatpush.xpose.msk.msra.mxu3 %vm1535_vm10, %v1487_v58 }
 0x2be   : > { %1165 = vrot.lane.b32.xlu0 %v4348_v54, %s1938_s25  ;;  %s1873_s25 = smul.u32 96, %s4350_s13 }
 0x2bf   : > { %v1052_v47 = vpop.permute.xlu2 %1051 }
 0x2c0   : > { %v1056_v44 = vpop.permute.xlu1 %1055  ;;  %v992_v10 = vpop.permute.xlu0 %991  ;;  %s3899_s28 = scalar_lea.vmem %s3919_s3, %s1873_s25 }
 0x2c1   : > { %v1420_v21 = vsel %vm1394_vm7, %v3259_v8, %v992_v10  ;;  %v1437_v62 = vsel %vm1427_vm8, %v3483_v63, %v1056_v44 }
 0x2c2   : > { %v1453_v53 = vsel %vm1427_vm8, %v1420_v21, %v1088_v32 }
 0x2c7   : > { %v1180_v8 = vpop.permute.xlu2 %1179 }
 0x2c8   : > { %v1184_v13 = vpop.permute.xlu1 %1183  ;;  %v1152_v52 = vpop.permute.xlu0 %1151 }
 0x2c9   : > { %v1470_v19 = vsel %vm1460_vm9, %v1437_v62, %v1152_v52  ;;  %v1486_v51 = vsel %vm1460_vm9, %v1453_v53, %v1184_v13  ;;  %v1939_v13 = vmov 0   ;;  %v1499_v52 = vld [vmem:[%s3918_s2] sm:$0xff] }
 0x2ca   : > { %1800 = vmatpush.xpose.msk.msra.mxu0 %vm1535_vm10, %v1470_v19  ;;  %1846 = vmatpush.xpose.msk.msra.mxu2 %vm1535_vm10, %v1470_v19 }
 0x2cb   : > { %1822 = vmatpush.xpose.msk.msra.mxu1 %vm1535_vm10, %v1486_v51  ;;  %1862 = vmatpush.xpose.msk.msra.mxu3 %vm1535_vm10, %v1486_v51 }
 0x2cc   : > { %1891 = vset.pattern.permute.xlu1 %v1939_v13  ;;  %1893 = vset.pattern.permute.xlu0 %v1939_v13 }
 0x2cd   : > { %1892 = vset.pattern.permute.xlu2 %v1939_v13  ;;  %1507 = vperm.xlu1 %1891, %v1499_v52  }
 0x2cf   : > { %v1146_v37 = vpop.permute.xlu2 %1145 }
 0x2d0   : > { %v1086_v0 = vpop.permute.xlu1 %1085  ;;  %v1054_v6 = vpop.permute.xlu0 %1053 }
 0x2d1   : > { %v1436_v63 = vsel %vm1427_vm8, %v3486_v56, %v1054_v6  ;;  %v1452_v28 = vsel %vm1427_vm8, %v1419_v26, %v1086_v0  ;;  %v1435_v56 = vsel %vm1427_vm8, %v3303_v29, %v1052_v47 }
 0x2d2   : > { %v1469_v42 = vsel %vm1460_vm9, %v1436_v63, %v1150_v48 }
 0x2d3   : > { %1801 = vmatpush.xpose.msk.msra.mxu0 %vm1535_vm10, %v1469_v42  ;;  %1847 = vmatpush.xpose.msk.msra.mxu2 %vm1535_vm10, %v1469_v42 }
 0x2d7   : > { %v1080_v14 = vpop.permute.xlu2 %1079 }
 0x2d8   : > { %v988_v1 = vpop.permute.xlu1 %987  ;;  %v1182_v12 = vpop.permute.xlu0 %1181 }
 0x2d9   : > { %v1485_v32 = vsel %vm1460_vm9, %v1452_v28, %v1182_v12  ;;  %v1418_v11 = vsel %vm1394_vm7, %v3212_v46, %v988_v1  ;;  %v1500_v12 = vld [vmem:[%s3918_s2 + $0x8] sm:$0xff] }
 0x2da   : > { %1823 = vmatpush.xpose.msk.msra.mxu1 %vm1535_vm10, %v1485_v32  ;;  %1863 = vmatpush.xpose.msk.msra.mxu3 %vm1535_vm10, %v1485_v32 }
 0x2db   : > { %1512 = vperm.xlu2 %1892, %v1500_v12  }
 0x2df   : > { %v1046_v27 = vpop.permute.xlu2 %1045 }
 0x2e0   : > { %v1148_v43 = vpop.permute.xlu1 %1147  ;;  %v1084_v4 = vpop.permute.xlu0 %1083 }
 0x2e1   : > { %v1451_v30 = vsel %vm1427_vm8, %v1418_v11, %v1084_v4  ;;  %v1468_v41 = vsel %vm1460_vm9, %v1435_v56, %v1148_v43  ;;  %v1496_v43 = vld [vmem:[%s3917_s1 + $0x18] sm:$0xff]  ;;  %v1493_v4 = vld [vmem:[%s3917_s1] sm:$0xff] }
 0x2e2   : > { %1802 = vmatpush.xpose.msk.msra.mxu0 %vm1535_vm10, %v1468_v41  ;;  %1848 = vmatpush.xpose.msk.msra.mxu2 %vm1535_vm10, %v1468_v41  ;;  %v1484_v57 = vsel %vm1460_vm9, %v1451_v30, %v1180_v8  ;;  %v1503_v30 = vld [vmem:[%s3918_s2 + $0x20] sm:$0xff] }
 0x2e3   : > { %1824 = vmatpush.xpose.msk.msra.mxu1 %vm1535_vm10, %v1484_v57  ;;  %1864 = vmatpush.xpose.msk.msra.mxu3 %vm1535_vm10, %v1484_v57 }
 0x2e4   : > { %1527 = vperm.xlu2 %1892, %v1503_v30  }
 0x2e7   : > { %v1174_v9 = vpop.permute.xlu2 %1173 }
 0x2e8   : > { %v1082_v29 = vpop.permute.xlu1 %1081  ;;  %v1050_v59 = vpop.permute.xlu0 %1049 }
 0x2e9   : > { %v1434_v46 = vsel %vm1427_vm8, %v3435_v16, %v1050_v59  ;;  %v1450_v5 = vsel %vm1427_vm8, %v3518_v39, %v1082_v29  ;;  %v1449_v16 = vsel %vm1427_vm8, %v3568_v45, %v1080_v14  ;;  %v1432_v45 = vsel %vm1427_vm8, %v3253_v22, %v1046_v27  ;;  %v1497_v29 = vld [vmem:[%s3917_s1 + $0x20] sm:$0xff]  ;;  %v1494_v59 = vld [vmem:[%s3917_s1 + $0x8] sm:$0xff] }
 0x2ea   : > { %v1467_v33 = vsel %vm1460_vm9, %v1434_v46, %v1146_v37  ;;  %v1495_v46 = vld [vmem:[%s3917_s1 + $0x10] sm:$0xff] }
 0x2eb   : > { %1803 = vmatpush.xpose.msk.msra.mxu0 %vm1535_vm10, %v1467_v33  ;;  %1849 = vmatpush.xpose.msk.msra.mxu2 %vm1535_vm10, %v1467_v33 }
 0x2f0   : > { %v1048_v36 = vpop.permute.xlu1 %1047  ;;  %v1178_v2 = vpop.permute.xlu0 %1177 }
 0x2f1   : > { %v1483_v35 = vsel %vm1460_vm9, %v1450_v5, %v1178_v2  ;;  %v1433_v34 = vsel %vm1427_vm8, %v3438_v50, %v1048_v36  ;;  %v1140_v50 = vpop.permute.xlu2 %1139 }
 0x2f2   : > { %1825 = vmatpush.xpose.msk.msra.mxu1 %vm1535_vm10, %v1483_v35  ;;  %1865 = vmatpush.xpose.msk.msra.mxu3 %vm1535_vm10, %v1483_v35 }
 0x2f8   : > { %v1176_v60 = vpop.permute.xlu1 %1175  ;;  %v1144_v18 = vpop.permute.xlu0 %1143 }
 0x2f9   : > { %v1466_v40 = vsel %vm1460_vm9, %v1433_v34, %v1144_v18  ;;  %v1482_v39 = vsel %vm1460_vm9, %v1449_v16, %v1176_v60 }
 0x2fa   : > { %1804 = vmatpush.xpose.msk.msra.mxu0 %vm1535_vm10, %v1466_v40  ;;  %1850 = vmatpush.xpose.msk.msra.mxu2 %vm1535_vm10, %v1466_v40 }
 0x2fb   : > { %1826 = vmatpush.xpose.msk.msra.mxu1 %vm1535_vm10, %v1482_v39  ;;  %1866 = vmatpush.xpose.msk.msra.mxu3 %vm1535_vm10, %v1482_v39 }
 0x300   : > { %v1142_v20 = vpop.permute.xlu1 %1141  ;;  %v1078_v61 = vpop.permute.xlu0 %1077 }
 0x301   : > { %v1448_v3 = vsel %vm1427_vm8, %v3572_v17, %v1078_v61  ;;  %v1465_v31 = vsel %vm1460_vm9, %v1432_v45, %v1142_v20  ;;  %v1074_v17 = vpop.permute.xlu2 %1073 }
 0x302   : > { %1805 = vmatpush.xpose.msk.msra.mxu0 %vm1535_vm10, %v1465_v31  ;;  %1851 = vmatpush.xpose.msk.msra.mxu2 %vm1535_vm10, %v1465_v31  ;;  %v1481_v58 = vsel %vm1460_vm9, %v1448_v3, %v1174_v9 }
 0x303   : > { %1827 = vmatpush.xpose.msk.msra.mxu1 %vm1535_vm10, %v1481_v58  ;;  %1867 = vmatpush.xpose.msk.msra.mxu3 %vm1535_vm10, %v1481_v58 }
 0x308   : > { %v1076_v48 = vpop.permute.xlu1 %1075  ;;  %v1044_v22 = vpop.permute.xlu0 %1043 }
 0x309   : > { %v1431_v54 = vsel %vm1427_vm8, %v3387_v15, %v1044_v22  ;;  %v1447_v10 = vsel %vm1427_vm8, %v3480_v24, %v1076_v48  ;;  %v1040_v15 = vpop.permute.xlu2 %1039  ;;  %v1446_v24 = vsel %vm1427_vm8, %v3555_v38, %v1074_v17  ;;  %v1502_v38 = vld [vmem:[%s3918_s2 + $0x18] sm:$0xff] }
 0x30a   : > { %v1464_v44 = vsel %vm1460_vm9, %v1431_v54, %v1140_v50  ;;  %1522 = vperm.xlu1 %1891, %v1502_v38  }
 0x30b   : > { %1806 = vmatpush.xpose.msk.msra.mxu0 %vm1535_vm10, %v1464_v44  ;;  %1852 = vmatpush.xpose.msk.msra.mxu2 %vm1535_vm10, %v1464_v44 }
 0x310   : > { %v1042_v47 = vpop.permute.xlu1 %1041  ;;  %v1172_v21 = vpop.permute.xlu0 %1171 }
 0x311   : > { %v1480_v62 = vsel %vm1460_vm9, %v1447_v10, %v1172_v21  ;;  %v1430_v53 = vsel %vm1427_vm8, %v3390_v7, %v1042_v47  ;;  %v1168_v6 = vpop.permute.xlu2 %1167  ;;  %v1429_v7 = vsel %vm1427_vm8, %v3209_v25, %v1040_v15  ;;  %v1504_v25 = vld [vmem:[%s3918_s2 + $0x28] sm:$0xff] }
 0x312   : > { %1828 = vmatpush.xpose.msk.msra.mxu1 %vm1535_vm10, %v1480_v62  ;;  %1868 = vmatpush.xpose.msk.msra.mxu3 %vm1535_vm10, %v1480_v62 }
 0x313   : > { %1532 = vperm.xlu1 %1891, %v1504_v25  }
 0x318   : > { %v1170_v19 = vpop.permute.xlu1 %1169  ;;  %v1138_v51 = vpop.permute.xlu0 %1137 }
 0x319   : > { %v1463_v8 = vsel %vm1460_vm9, %v1430_v53, %v1138_v51  ;;  %v1479_v0 = vsel %vm1460_vm9, %v1446_v24, %v1170_v19  ;;  %v1134_v37 = vpop.permute.xlu2 %1133 }
 0x31a   : > { %1807 = vmatpush.xpose.msk.msra.mxu0 %vm1535_vm10, %v1463_v8  ;;  %1853 = vmatpush.xpose.msk.msra.mxu2 %vm1535_vm10, %v1463_v8 }
 0x31b   : > { %1829 = vmatpush.xpose.msk.msra.mxu1 %vm1535_vm10, %v1479_v0  ;;  %1869 = vmatpush.xpose.msk.msra.mxu3 %vm1535_vm10, %v1479_v0 }
 0x320   : > { %v1136_v63 = vpop.permute.xlu1 %1135  ;;  %v1072_v42 = vpop.permute.xlu0 %1071 }
 0x321   : > { %v1445_v26 = vsel %vm1427_vm8, %v3558_v49, %v1072_v42  ;;  %v1462_v28 = vsel %vm1460_vm9, %v1429_v7, %v1136_v63  ;;  %v1501_v49 = vld [vmem:[%s3918_s2 + $0x10] sm:$0xff] }
 0x322   : > { %1808 = vmatpush.xpose.msk.msra.mxu0 %vm1535_vm10, %v1462_v28  ;;  %1854 = vmatpush.xpose.msk.msra.mxu2 %vm1535_vm10, %v1462_v28  ;;  %v1478_v1 = vsel %vm1460_vm9, %v1445_v26, %v1168_v6 }
 0x323   : > { %1830 = vmatpush.xpose.msk.msra.mxu1 %vm1535_vm10, %v1478_v1  ;;  %1870 = vmatpush.xpose.msk.msra.mxu3 %vm1535_vm10, %v1478_v1 }
 0x324   : > { %1517 = vperm.xlu0 %1893, %v1501_v49  }
 0x328   : > { %v1038_v32 = vpop.permute.xlu0 %1037  ;;  %v1070_v41 = vpop.permute.xlu1 %1069 }
 0x329   : > { %v1428_v56 = vsel %vm1427_vm8, %v3351_v23, %v1038_v32  ;;  %v1444_v23 = vsel %vm1427_vm8, %v3432_v55, %v1070_v41  ;;  %v1498_v55 = vld [vmem:[%s3917_s1 + $0x28] sm:$0xff] }
 0x32a   : > { %v1461_v11 = vsel %vm1460_vm9, %v1428_v56, %v1134_v37 }
 0x32b   : > { %1809 = vmatpush.xpose.msk.msra.mxu0 %vm1535_vm10, %v1461_v11  ;;  %1855 = vmatpush.xpose.msk.msra.mxu2 %vm1535_vm10, %v1461_v11 }
 0x32e   : > { %1813 = vmatmul.msk.f32.vlgmr.msra.gmra.mxu2 %vm1535_vm10, %v1496_v43  ;;  %1810 = vmatmul.msk.f32.vlgmr.msra.gmra.mxu0 %vm1535_vm10, %v1493_v4 }
 0x330   : > { %v1166_v57 = vpop.permute.xlu0 %1165 }
 0x331   : > { %v1477_v14 = vsel %vm1460_vm9, %v1444_v23, %v1166_v57 }
 0x332   : > { %1831 = vmatpush.xpose.msk.msra.mxu1 %vm1535_vm10, %v1477_v14  ;;  %1871 = vmatpush.xpose.msk.msra.mxu3 %vm1535_vm10, %v1477_v14 }
 0x335   : > { %1835 = vmatmul.msk.f32.vlgmr.msra.gmra.mxu3 %vm1535_vm10, %v1496_v43  ;;  %1832 = vmatmul.msk.f32.vlgmr.msra.gmra.mxu1 %vm1535_vm10, %v1493_v4  ;;  %v1513_v36 = vpop.permute.xlu2 %1512 }
 0x336   : > { %1814 = vmatmul.msk.f32.gmra.mxu2 %vm1535_vm10, %v1497_v29  ;;  %1811 = vmatmul.msk.f32.gmra.mxu0 %vm1535_vm10, %v1494_v59 }
 0x33d   : > { %1836 = vmatmul.msk.f32.gmra.mxu3 %vm1535_vm10, %v1497_v29  ;;  %1833 = vmatmul.msk.f32.gmra.mxu1 %vm1535_vm10, %v1494_v59 }
 0x33e   : > { %1815 = vmatmul.msk.f32.gmra.mxu2 %vm1535_vm10, %v1498_v55  ;;  %1812 = vmatmul.msk.f32.gmra.mxu0 %vm1535_vm10, %v1495_v46  ;;  %v1528_v40 = vpop.permute.xlu2 %1527 }
 0x33f   : > { %v1508_v33 = vpop.permute.xlu1 %1507 }
 0x345   : > { %1837 = vmatmul.msk.f32.gmra.mxu3 %vm1535_vm10, %v1498_v55  ;;  %1834 = vmatmul.msk.f32.gmra.mxu1 %vm1535_vm10, %v1495_v46 }
 0x37c   : > { %v1523_v2 = vpop.permute.xlu1 %1522 }
 0x385   : > { %v1533_v54 = vpop.permute.xlu1 %1532 }
 0x396   : > { %v1518_v61 = vpop.permute.xlu0 %1517 }
 0x3ab   : > { %v1667_v27 = vpop.f32.mrf.mxu0 }
 0x3ac   : > { %v1668_v5 = vadd.f32 %v1667_v27, %v1508_v33 }
 0x3ae   : > { %1720 = vst [vmem:[%s3899_s28] sm:$0xff] %v1668_v5 }
 0x3b1   : > { %v1676_v35 = vpop.f32.mrf.mxu2 }
 0x3b2   : > { %v1677_v9 = vadd.f32 %v1676_v35, %v1523_v2  ;;  %v1702_v16 = vpop.f32.mrf.mxu1 }
 0x3b3   : > { %v1703_v34 = vadd.f32 %v1702_v16, %v1508_v33  ;;  %v1670_v60 = vpop.f32.mrf.mxu0 }
 0x3b4   : > { %1726 = vst [vmem:[%s3899_s28 + $0x30] sm:$0xff] %v1677_v9  ;;  %v1671_v18 = vadd.f32 %v1670_v60, %v1513_v36 }
 0x3b5   : > { %1721 = vst [vmem:[%s3899_s28 + $0x8] sm:$0xff] %v1703_v34 }
 0x3b6   : > { %1722 = vst [vmem:[%s3899_s28 + $0x10] sm:$0xff] %v1671_v18 }
 0x3b8   : > { %v1711_v39 = vpop.f32.mrf.mxu3 }
 0x3b9   : > { %v1712_v45 = vadd.f32 %v1711_v39, %v1523_v2  ;;  %v1679_v20 = vpop.f32.mrf.mxu2 }
 0x3ba   : > { %v1680_v50 = vadd.f32 %v1679_v20, %v1528_v40  ;;  %v1705_v3 = vpop.f32.mrf.mxu1 }
 0x3bb   : > { %1727 = vst [vmem:[%s3899_s28 + $0x38] sm:$0xff] %v1712_v45  ;;  %v1706_v31 = vadd.f32 %v1705_v3, %v1513_v36  ;;  %v1673_v58 = vpop.f32.mrf.mxu0 }
 0x3bc   : > { %1728 = vst [vmem:[%s3899_s28 + $0x40] sm:$0xff] %v1680_v50  ;;  %v1674_v48 = vadd.f32 %v1673_v58, %v1518_v61 }
 0x3bd   : > { %1723 = vst [vmem:[%s3899_s28 + $0x18] sm:$0xff] %v1706_v31 }
 0x3be   : > { %1724 = vst [vmem:[%s3899_s28 + $0x20] sm:$0xff] %v1674_v48 }
 0x3c0   : > { %v1714_v22 = vpop.f32.mrf.mxu3 }
 0x3c1   : > { %v1715_v44 = vadd.f32 %v1714_v22, %v1528_v40  ;;  %v1682_v17 = vpop.f32.mrf.mxu2 }
 0x3c2   : > { %v1683_v10 = vadd.f32 %v1682_v17, %v1533_v54  ;;  %v1708_v47 = vpop.f32.mrf.mxu1 }
 0x3c3   : > { %1729 = vst [vmem:[%s3899_s28 + $0x48] sm:$0xff] %v1715_v44  ;;  %v1709_v21 = vadd.f32 %v1708_v47, %v1518_v61 }
 0x3c4   : > { %1730 = vst [vmem:[%s3899_s28 + $0x50] sm:$0xff] %v1683_v10 }
 0x3c5   : > { %1725 = vst [vmem:[%s3899_s28 + $0x28] sm:$0xff] %v1709_v21 }
 0x3c8   : > { %v1717_v62 = vpop.f32.mrf.mxu3 }
 0x3c9   : > { %v1718_v13 = vadd.f32 %v1717_v62, %v1533_v54 }
 0x3cb   : > { %1731 = vst [vmem:[%s3899_s28 + $0x58] sm:$0xff] %v1718_v13 }
 0x3cc PF: > { %s13_s12 = sadd.s32 1, %s1929_s12  }
 0x3cd   : > { %p10_p4 = scmp.ge.s32.totalorder %s13_s12, 4  }
 0x3cf   :  { %12 = sbr.rel (!%p10_p4) target bundleno = 1 (0x1), region = 62 }

// kernel: ssd_box_head_forward.5
= control target key start
LH: loop header
LB: loop body
LE: loop exit
PB: predicated region body
PF: predicated region fallthrough
CT: control target
= control target key end

     0   :  { %10 = vsyncpa [#allocation3], 0  ;;  %s1456_s0 = inlined_call_operand.vmem [shape: f32[2,4,1408], index: 0, kind: input, shape index: {}]   ;;  %s1457_s1 = inlined_call_operand.vmem [shape: f32[2,8,1408], index: 1, kind: input, shape index: {}]   ;;  %s1458_s2 = inlined_call_operand.vmem [shape: f32[4,1408], index: 2, kind: input, shape index: {}]   ;;  %s1459_s3 = inlined_call_operand.hbm [shape: f32[2,8,1408], index: 3, kind: output, shape index: {0}]   ;;  %s1460_s4 = inlined_call_operand.hbm [shape: f32[2,4,1408], index: 4, kind: output, shape index: {1}]  }
   0x1   :  { %12 = vsyncpa [#allocation3 + $0x1], 0 }
   0x2   :  { %13 = vsyncpa [#allocation5], 0 }
   0x3   :  { %15 = vsyncpa [#allocation5 + $0x1], 0  ;;  %s1069_s15 = smov 0   ;;  %s1071_s16 = smov 0  }
   0x4   :  { %s1073_s17 = smov 0   ;;  %s1075_s18 = smov 0  }
   0x5 LB: > { %s1090_s19 = sadd.s32 4294967295, %s1042_s18   ;;  %s826_s20 = sadd.s32 4294967294, %s1042_s18   ;;  %s1042_s18 = sphi %s1075_s18, %s1466_s18   ;;  %s1038_s17 = sphi %s1073_s17, %s1465_s17   ;;  %s1034_s16 = sphi %s1071_s16, %s1464_s16   ;;  %s1030_s15 = sphi %s1069_s15, %s1463_s15  }
   0x6   : > { %s1094_s21 = sadd.s32 1, %s1042_s18   ;;  %s101_s22 = sadd.s32 1, %s1038_s17 }
   0x7   : > { %s98_s23 = ssub.s32 %s1042_s18, %s1094_s21  ;;  %p111_p0 = scmp.ne.s32.totalorder %s1038_s17, %s1034_s16 }
   0x8   : > { %p99_p1 = scmp.eq.s32.totalorder %s98_s23, 0  ;;  %p112_p2 = scmp.eq.s32.totalorder %s1090_s19, 1 }
   0x9   : > { %p117_p3 = scmp.ne.s32.totalorder %s1034_s16, %s1030_s15  ;;  %p118_p4 = scmp.eq.s32.totalorder %s826_s20, 1 }
   0xa   : > { %s1105_s24 = scalar_select %p99_p1, %s1038_s17, %s101_s22  }
   0xb   : > { %p1107_p5 = por %p112_p2, %p111_p0  ;;  %p1111_p6 = por %p118_p4, %p117_p3 }
   0xc   : > { %p829_p7 = scmp.ge.s32.totalorder %s1042_s18, 1  ;;  %p181_p8 = scmp.lt.s32.totalorder %s1042_s18, 3 }
   0xe   : > { %p182_p9 = pnand %p829_p7, %p181_p8 }
   0xf   : > { %p217_p10 = scmp.lt.s32.totalorder (!%p182_p9), %s1090_s19, 1  ;;  %s1272_s5 = sand.u32 (!%p182_p9), 1, %s1034_s16  }
  0x10   : > { %185 = sbr.rel (%p182_p9) target bundleno = 134 (0x86), region = 32  ;;  %s691_s22 = scalar_lea.sflag (!%p182_p9), [#allocation5], %s1272_s5 }
  0x11   : > { %s842_s7 = smul.u32 (!%p182_p9), 88, %s1272_s5  ;;  %s968_s30 = scalar_lea.hbm (!%p182_p9), %s1460_s4, 88 }
  0x12   : > { %s847_s10 = smul.u32 (!%p182_p9), 44, %s1090_s19 }
  0x13   : > { %s1350_s9 = scalar_lea.vmem (!%p182_p9), [#allocation2], %s842_s7 }
  0x14   : > { %s1378_s13 = scalar_lea.hbm (!%p182_p9), %s1460_s4, %s847_s10 }
  0x15   : > { %s218_s27 = scalar_select %p217_p10, %s1090_s19, 1  ;;  %v442_v0 = vld [vmem:[%s1458_s2] sm:$0xff]  ;;  %v1128_v1 = vld [vmem:[%s1458_s2 + $0x8] sm:$0xff]  ;;  %v1133_v2 = vld [vmem:[%s1458_s2 + $0x10] sm:$0xff]  ;;  %vm641_vm0 = vcmask 1041408   ;;  %vm668_vm1 = vcmask 1043456  }
  0x16   : > { %v832_v4 = vrot.slane %v442_v0, 10  ;;  %v833_v6 = vrot.slane %v1128_v1, 10  ;;  %v834_v12 = vrot.slane %v1133_v2, 10  ;;  %v1145_v14 = vld [vmem:[%s1458_s2 + $0x18] sm:$0xff]  ;;  %v1150_v19 = vld [vmem:[%s1458_s2 + $0x20] sm:$0xff] }
  0x17   : > { %s844_s28 = smul.u32 44, %s218_s27  ;;  %v1155_v20 = vld [vmem:[%s1458_s2 + $0x28] sm:$0xf]  ;;  %v835_v27 = vrot.slane %v1145_v14, 10  ;;  %v836_v30 = vrot.slane %v1150_v19, 10 }
  0x18   : > { %s845_s29 = smul.u32 88, %s218_s27  ;;  %v837_v31 = vrot.slane %v1155_v20, 10 }
  0x19   : > { %s221_s6 = scalar_lea.vmem %s1456_s0, %s844_s28 }
  0x1a   : > { %v436_v3 = vld [vmem:[%s221_s6] sm:$0xff]  ;;  %v437_v5 = vld [vmem:[%s221_s6 + $0x8] sm:$0xff]  ;;  %v438_v7 = vld [vmem:[%s221_s6 + $0x10] sm:$0xff]  ;;  %s1139_s20 = scalar_lea.vmem %s1457_s1, %s845_s29 }
  0x1b   : > { %v448_v8 = vmul.f32 0.1, %v436_v3  ;;  %v490_v9 = vmul.f32 0.2, %v436_v3  ;;  %v449_v10 = vmul.f32 0.1, %v437_v5 }
  0x1c   : > { %v491_v11 = vmul.f32 0.2, %v437_v5  ;;  %v492_v13 = vmul.f32 0.2, %v438_v7  ;;  %v450_v16 = vmul.f32 0.1, %v438_v7 }
  0x1d   : > { %v496_v15 = vmul.f32 1.442695, %v490_v9  ;;  %v439_v17 = vld [vmem:[%s221_s6 + $0x18] sm:$0xff]  ;;  %v440_v18 = vld [vmem:[%s221_s6 + $0x20] sm:$0xff]  ;;  %v478_v21 = vmul.f32 %v832_v4, %v448_v8  ;;  %v479_v22 = vmul.f32 %v833_v6, %v449_v10  ;;  %v441_v25 = vld [vmem:[%s221_s6 + $0x28] sm:$0xf] }
  0x1e   : > { %v498_v23 = vmul.f32 1.442695, %v491_v11  ;;  %v500_v24 = vmul.f32 1.442695, %v492_v13  ;;  %v451_v26 = vmul.f32 0.1, %v439_v17  ;;  %v480_v33 = vmul.f32 %v834_v12, %v450_v16 }
  0x1f   : > { %892 = vpow2.f32 %v496_v15  ;;  %v493_v28 = vmul.f32 0.2, %v439_v17  ;;  %v1159_v29 = vld [vmem:[%s1139_s20] sm:$0xff]  ;;  %v1164_v32 = vld [vmem:[%s1139_s20 + $0x8] sm:$0xff]  ;;  %v494_v35 = vmul.f32 0.2, %v440_v18  ;;  %v1169_v37 = vadd.f32 %v478_v21, %v442_v0 }
  0x20   : > { %894 = vpow2.f32 %v498_v23  ;;  %v1167_v36 = vld [vmem:[%s1139_s20 + $0x10] sm:$0xff]  ;;  %v1172_v38 = vadd.f32 %v479_v22, %v1128_v1  ;;  %v495_v39 = vmul.f32 0.2, %v441_v25  ;;  %v238_v40 = vrot.slane %v1159_v29, 4  ;;  %v1176_v41 = vld [vmem:[%s1139_s20 + $0x18] sm:$0xff]  ;;  %s843_s6 = smul.u32 44, %s1272_s5 }
  0x21   : > { %896 = vpow2.f32 %v500_v24  ;;  %v502_v34 = vmul.f32 1.442695, %v493_v28  ;;  %v481_v42 = vmul.f32 %v835_v27, %v451_v26  ;;  %v504_v43 = vmul.f32 1.442695, %v494_v35  ;;  %v1201_v27 = vld [vmem:[%s1139_s20 + $0x20] sm:$0xff] }
  0x22   : > { %v244_v44 = vrot.slane %v1164_v32, 4  ;;  %v452_v45 = vmul.f32 0.1, %v440_v18  ;;  %v506_v46 = vmul.f32 1.442695, %v495_v39  ;;  %v239_v47 = vmax.f32 %v1159_v29, %v238_v40  ;;  %s1324_s8 = scalar_lea.vmem [#allocation4], %s843_s6 }
  0x23   : > { %898 = vpow2.f32 %v502_v34  ;;  %v250_v48 = vrot.slane %v1167_v36, 4  ;;  %v453_v50 = vmul.f32 0.1, %v441_v25  ;;  %v256_v52 = vrot.slane %v1176_v41, 4  ;;  %s719_s14 = sshll.u32 %s1324_s8, 4  ;;  %s720_s14 = int_to_ptr.vmem [resolvable:$true] %s719_s14 }
  0x24   : > { %900 = vpow2.f32 %v504_v43  ;;  %v245_v51 = vmax.f32 %v1164_v32, %v244_v44  ;;  %v240_v55 = vrot.slane %v239_v47, 2  ;;  %v1186_v59 = vadd.f32 %v480_v33, %v1133_v2 }
  0x25   : > { %v893_v49 = vpop.eup %892  ;;  %902 = vpow2.f32 %v506_v46  ;;  %v251_v56 = vmax.f32 %v1167_v36, %v250_v48  ;;  %v1189_v60 = vadd.f32 %v481_v42, %v1145_v14  ;;  %v482_v6 = vmul.f32 %v836_v30, %v452_v45 }
  0x26   : > { %v895_v53 = vpop.eup %894  ;;  %v508_v54 = vmul.f32 %v893_v49, %v442_v0  ;;  %v246_v61 = vrot.slane %v245_v51, 2  ;;  %v241_v3 = vmax.f32 %v239_v47, %v240_v55  ;;  %v483_v7 = vmul.f32 %v837_v31, %v453_v50  ;;  %v1215_v50 = vld [vmem:[%s1139_s20 + $0x28] sm:$0xff] }
  0x27   : > { %v897_v57 = vpop.eup %896  ;;  %v509_v58 = vmul.f32 %v895_v53, %v1128_v1  ;;  %v252_v4 = vrot.slane %v251_v56, 2  ;;  %v257_v11 = vmax.f32 %v1176_v41, %v256_v52  ;;  %v1208_v35 = vadd.f32 %v482_v6, %v1150_v19 }
  0x28   : > { %v514_v62 = vmul.f32 0.5, %v508_v54  ;;  %v510_v63 = vmul.f32 %v897_v57, %v1133_v2  ;;  %v247_v8 = vmax.f32 %v245_v51, %v246_v61  ;;  %v242_v15 = vrot.slane %v241_v3, 1 }
  0x29   : > { %v899_v0 = vpop.eup %898  ;;  %v515_v5 = vmul.f32 0.5, %v509_v58  ;;  %v253_v17 = vmax.f32 %v251_v56, %v252_v4  ;;  %v258_v33 = vrot.slane %v257_v11, 2  ;;  %v262_v45 = vrot.slane %v1201_v27, 4 }
  0x2a   : > { %v526_v9 = vrot.slane %v514_v62, 6  ;;  %v516_v10 = vmul.f32 0.5, %v510_v63  ;;  %v511_v1 = vmul.f32 %v899_v0, %v1145_v14  ;;  %v901_v12 = vpop.eup %900  ;;  %v248_v16 = vrot.slane %v247_v8, 1 }
  0x2b   : > { %v528_v13 = vrot.slane %v515_v5, 6  ;;  %v903_v2 = vpop.eup %902  ;;  %v512_v23 = vmul.f32 %v901_v12, %v1150_v19  ;;  %v243_v14 = vmax.f32 %v241_v3, %v242_v15  ;;  %v254_v49 = vrot.slane %v253_v17, 1 }
  0x2c   : > { %v1194_v18 = vrot.slane %v526_v9, 4  ;;  %v530_v21 = vrot.slane %v516_v10, 6  ;;  %v517_v22 = vmul.f32 0.5, %v511_v1  ;;  %v513_v25 = vmul.f32 %v903_v2, %v1155_v20 }
  0x2d   : > { %v1197_v24 = vrot.slane %v528_v13, 4  ;;  %v249_v26 = vmax.f32 %v247_v8, %v248_v16  ;;  %v518_v39 = vmul.f32 0.5, %v512_v23  ;;  %v304_v44 = vsub.f32 %v1159_v29, %v243_v14  ;;  %v1251_v13 = vld [vmem:[%s1139_s20 + $0x38] sm:$0xff] }
  0x2e   : > { %v544_v28 = vsub.f32 %v1169_v37, %v1194_v18  ;;  %v531_v30 = vrot.slane %v530_v21, 4  ;;  %v532_v31 = vrot.slane %v517_v22, 6  ;;  %v519_v40 = vmul.f32 0.5, %v513_v25 }
  0x2f   : > { %v545_v34 = vsub.f32 %v1172_v38, %v1197_v24  ;;  %v534_v46 = vrot.slane %v518_v39, 6  ;;  %v305_v48 = vsub.f32 %v1164_v32, %v249_v26  ;;  %v1219_v51 = vadd.f32 %v483_v7, %v1155_v20  ;;  %v1230_v20 = vld [vmem:[%s1139_s20 + $0x30] sm:$0xff] }
  0x30   : > { %562 = vst [vmem:[#allocation1] ss:$2 sm:$0xff] %v544_v28  ;;  %v546_v42 = vsub.f32 %v1186_v59, %v531_v30  ;;  %v533_v43 = vrot.slane %v532_v31, 4  ;;  %v536_v47 = vrot.slane %v519_v40, 6  ;;  %v315_v52 = vmul.f32 1.442695, %v304_v44 }
  0x31   : > { %564 = vst [vmem:[#allocation1 + $0x10] ss:$2 sm:$0xff] %v545_v34  ;;  %v259_v53 = vmax.f32 %v257_v11, %v258_v33  ;;  %v1221_v29 = vrot.slane %v534_v46, 4  ;;  %v317_v55 = vmul.f32 1.442695, %v305_v48  ;;  %v255_v56 = vmax.f32 %v253_v17, %v254_v49 }
  0x32   : > { %566 = vst [vmem:[#allocation1 + $0x20] ss:$2 sm:$0xff] %v546_v42  ;;  %v547_v19 = vsub.f32 %v1189_v60, %v533_v43  ;;  %v1223_v54 = vrot.slane %v536_v47, 4  ;;  %904 = vpow2.f32 %v315_v52  ;;  %v263_v57 = vmax.f32 %v1201_v27, %v262_v45 }
  0x33   : > { %v260_v32 = vrot.slane %v259_v53, 1  ;;  %v268_v58 = vrot.slane %v1215_v50, 4  ;;  %v548_v61 = vsub.f32 %v1208_v35, %v1221_v29  ;;  %906 = vpow2.f32 %v317_v55 }
  0x34   : > { %568 = vst [vmem:[#allocation1 + $0x30] ss:$2 sm:$0xff] %v547_v19  ;;  %v549_v62 = vsub.f32 %v1219_v51, %v1223_v54  ;;  %v264_v3 = vrot.slane %v263_v57, 2  ;;  %v552_v4 = vadd.f32 %v531_v30, %v1186_v59  ;;  %v306_v7 = vsub.f32 %v1167_v36, %v255_v56 }
  0x35   : > { %v261_v63 = vmax.f32 %v259_v53, %v260_v32  ;;  %v269_v9 = vmax.f32 %v1215_v50, %v268_v58  ;;  %v274_v10 = vrot.slane %v1230_v20, 4  ;;  %v553_v1 = vadd.f32 %v533_v43, %v1189_v60 }
  0x36   : > { %v265_v8 = vmax.f32 %v263_v57, %v264_v3  ;;  %v550_v2 = vadd.f32 %v1194_v18, %v1169_v37  ;;  %v551_v22 = vadd.f32 %v1197_v24, %v1172_v38  ;;  %v319_v25 = vmul.f32 1.442695, %v306_v7  ;;  %v1277_v24 = vld [vmem:[%s1139_s20 + $0x40] sm:$0xff] }
  0x37   : > { %v1235_v0 = vld.sshfl [vmem:[#allocation1] sm:$0xff pattern:$0x75316420]  ;;  %v1237_v5 = vld.sshfl [vmem:[#allocation1 + $0x8] sm:$0xff pattern:$0x75316420]  ;;  %v307_v59 = vsub.f32 %v1176_v41, %v261_v63  ;;  %v275_v17 = vmax.f32 %v1230_v20, %v274_v10  ;;  %v554_v19 = vadd.f32 %v1221_v29, %v1208_v35  ;;  %v555_v52 = vadd.f32 %v1223_v54, %v1219_v51 }
  0x38   : > { %577 = vst [vmem:[#allocation1] ss:$2 sm:$0xff] %v548_v61  ;;  %v1239_v6 = vld.sshfl [vmem:[#allocation1 + $0x10] sm:$0xff pattern:$0x75316420]  ;;  %v1253_v15 = vpop.eup %904  ;;  %v266_v36 = vrot.slane %v265_v8, 1  ;;  %908 = vpow2.f32 %v319_v25 }
  0x39   : > { %v1245_v11 = vld.sshfl [vmem:[#allocation1 + $0x18] sm:$0xff pattern:$0x75316420]  ;;  %v1247_v12 = vld.sshfl [vmem:[#allocation1 + $0x20] sm:$0xff pattern:$0x75316420]  ;;  %v1263_v21 = vpop.eup %906 }
  0x3a   : > { %578 = vst [vmem:[#allocation1 + $0x10] ss:$2 sm:$0xff] %v549_v62  ;;  %v1255_v16 = vld.sshfl [vmem:[#allocation1 + $0x28] sm:$0xff pattern:$0x75316420]  ;;  %v337_v41 = vrot.slane %v1253_v15, 4  ;;  %v267_v14 = vmax.f32 %v265_v8, %v266_v36 }
  0x3b   : > { %603 = vst [vmem:[#allocation1 + $0x20] ss:$2 sm:$0xff] %v552_v4  ;;  %v1260_v60 = vld.sshfl [vmem:[#allocation1 + $0x30] sm:$0xff pattern:$0x75316420]  ;;  %v270_v26 = vrot.slane %v269_v9, 2 }
  0x3c   : > { %v1267_v23 = vld.sshfl [vmem:[#allocation1 + $0x38] sm:$0xff pattern:$0x75316420]  ;;  %v338_v37 = vadd.f32 %v1253_v15, %v337_v41  ;;  %v343_v18 = vrot.slane %v1263_v21, 4  ;;  %v321_v28 = vmul.f32 1.442695, %v307_v59  ;;  %v308_v31 = vsub.f32 %v1201_v27, %v267_v14 }
  0x3d   : > { %605 = vst [vmem:[#allocation1 + $0x30] ss:$2 sm:$0xff] %v553_v1  ;;  %v276_v30 = vrot.slane %v275_v17, 2  ;;  %v271_v33 = vmax.f32 %v269_v9, %v270_v26  ;;  %v280_v38 = vrot.slane %v1251_v13, 4  ;;  %v286_v49 = vrot.slane %v1277_v24, 4 }
  0x3e   : > { %v344_v40 = vadd.f32 %v1263_v21, %v343_v18  ;;  %910 = vpow2.f32 %v321_v28  ;;  %v339_v43 = vrot.slane %v338_v37, 2  ;;  %v323_v44 = vmul.f32 1.442695, %v308_v31  ;;  %v1292_v62 = vpop.eup %908 }
  0x3f   : > { %v1279_v34 = vld.sshfl [vmem:[#allocation1] sm:$0xff pattern:$0x75316420]  ;;  %v1281_v39 = vld.sshfl [vmem:[#allocation1 + $0x8] sm:$0xff pattern:$0x75316420]  ;;  %v277_v42 = vmax.f32 %v275_v17, %v276_v30  ;;  %v281_v27 = vmax.f32 %v1251_v13, %v280_v38  ;;  %v1296_v35 = vmax.f32 %v1277_v24, %v286_v49 }
  0x40   : > { %599 = vst [vmem:[#allocation1] ss:$2 sm:$0xff] %v550_v2  ;;  %v272_v45 = vrot.slane %v271_v33, 1  ;;  %v345_v47 = vrot.slane %v344_v40, 2  ;;  %v340_v55 = vadd.f32 %v339_v43, %v338_v37  ;;  %912 = vpow2.f32 %v323_v44 }
  0x41   : > { %v1285_v46 = vld.sshfl [vmem:[#allocation1 + $0x10] sm:$0xff pattern:$0x75316420]  ;;  %v278_v48 = vrot.slane %v277_v42, 1  ;;  %v282_v61 = vrot.slane %v281_v27, 2  ;;  %v349_v9 = vrot.slane %v1292_v62, 4 }
  0x42   : > { %601 = vst [vmem:[#allocation1 + $0x10] ss:$2 sm:$0xff] %v551_v22  ;;  %v610_v53 = vld.sshfl [vmem:[#allocation1 + $0x20] sm:$0xff pattern:$0x75316420]  ;;  %v273_v56 = vmax.f32 %v271_v33, %v272_v45  ;;  %v346_v58 = vadd.f32 %v345_v47, %v344_v40  ;;  %v341_v4 = vrot.slane %v340_v55, 1 }
  0x43   : > { %v611_v32 = vld.sshfl [vmem:[#allocation1 + $0x28] sm:$0xff pattern:$0x75316420]  ;;  %v623_v57 = vrot.slane %v610_v53, 6  ;;  %v279_v7 = vmax.f32 %v277_v42, %v278_v48  ;;  %v350_v14 = vadd.f32 %v1292_v62, %v349_v9  ;;  %v283_v26 = vmax.f32 %v281_v27, %v282_v61 }
  0x44   : > { %v624_v63 = vrot.slane %v611_v32, 6  ;;  %v612_v3 = vld.sshfl [vmem:[#allocation1 + $0x30] sm:$0xff pattern:$0x75316420]  ;;  %v1298_v51 = vpop.eup %910  ;;  %v347_v8 = vrot.slane %v346_v58, 1  ;;  %v309_v10 = vsub.f32 %v1215_v50, %v273_v56  ;;  %v342_v36 = vadd.f32 %v341_v4, %v340_v55  ;;  %v1341_v4 = vld [vmem:[%s1139_s20 + $0x48] sm:$0xff] }
  0x45   : > { %v613_v29 = vld.sshfl [vmem:[#allocation1 + $0x38] sm:$0xff pattern:$0x75316420]  ;;  %v625_v54 = vrot.slane %v612_v3, 6  ;;  %v355_v17 = vrot.slane %v1298_v51, 4  ;;  %v646_v22 = vsel %vm641_vm0, %v1247_v12, %v623_v57  ;;  %v310_v38 = vsub.f32 %v1230_v20, %v279_v7 }
  0x46   : > { %v647_v1 = vsel %vm641_vm0, %v1255_v16, %v624_v63  ;;  %v626_v59 = vrot.slane %v613_v29, 6  ;;  %v348_v25 = vadd.f32 %v347_v8, %v346_v58  ;;  %v1310_v28 = vpop.eup %912  ;;  %914 = vrcp.f32 %v342_v36 }
  0x47   : > { %v606_v2 = vld.sshfl [vmem:[#allocation1] sm:$0xff pattern:$0x75316420]  ;;  %v607_v41 = vld.sshfl [vmem:[#allocation1 + $0x8] sm:$0xff pattern:$0x75316420]  ;;  %v648_v12 = vsel %vm641_vm0, %v1260_v60, %v625_v54  ;;  %v356_v33 = vadd.f32 %v1298_v51, %v355_v17 }
  0x48   : > { %614 = vst [vmem:[#allocation1] ss:$2 sm:$0xff] %v554_v19  ;;  %v665_v37 = vrot.slane %v647_v1, 4  ;;  %v649_v50 = vsel %vm641_vm0, %v1267_v23, %v626_v59  ;;  %v619_v16 = vrot.slane %v606_v2, 6  ;;  %v620_v18 = vrot.slane %v607_v41, 6 }
  0x49   : > { %v608_v30 = vld.sshfl [vmem:[#allocation1 + $0x10] sm:$0xff pattern:$0x75316420]  ;;  %v609_v31 = vld.sshfl [vmem:[#allocation1 + $0x18] sm:$0xff pattern:$0x75316420]  ;;  %916 = vrcp.f32 %v348_v25 }
  0x4a   : > { %615 = vst [vmem:[#allocation1 + $0x10] ss:$2 sm:$0xff] %v555_v52  ;;  %v671_v40 = vsel %vm668_vm1, %v646_v22, %v665_v37  ;;  %v666_v42 = vrot.slane %v649_v50, 4  ;;  %v642_v23 = vsel %vm641_vm0, %v1235_v0, %v619_v16  ;;  %v643_v43 = vsel %vm641_vm0, %v1237_v5, %v620_v18 }
  0x4b   : > { %681 = vst [vmem:[%s1324_s8 + $0x10] sm:$0xff] %v671_v40  ;;  %v663_v60 = vrot.slane %v643_v43, 4  ;;  %v621_v20 = vrot.slane %v608_v30, 6  ;;  %v622_v44 = vrot.slane %v609_v31, 6  ;;  %v351_v27 = vrot.slane %v350_v14, 2 }
  0x4c   : > { %v672_v45 = vsel %vm668_vm1, %v648_v12, %v666_v42  ;;  %v357_v47 = vrot.slane %v356_v33, 2  ;;  %v361_v0 = vrot.slane %v1310_v28, 4  ;;  %v325_v19 = vmul.f32 1.442695, %v309_v10  ;;  %v915_v32 = vpop.eup %914  ;;  %v1346_v10 = vld [vmem:[%s1139_s20 + $0x50] sm:$0xff]  ;;  %s721_s20 = sshll.u32 %s1378_s13, 4  ;;  %s722_s20 = int_to_ptr.hbm [resolvable:$true] %s721_s20 }
  0x4d   : > { %682 = vst [vmem:[%s1324_s8 + $0x18] sm:$0xff] %v672_v45  ;;  %v669_v5 = vsel %vm668_vm1, %v642_v23, %v663_v60  ;;  %v644_v48 = vsel %vm641_vm0, %v1239_v6, %v621_v20  ;;  %v645_v49 = vsel %vm641_vm0, %v1245_v11, %v622_v44  ;;  %v352_v53 = vadd.f32 %v351_v27, %v350_v14  ;;  %s962_s23 = sshra.s32 %s722_s20, 4  ;;  %s963_s23 = int_to_ptr.hbm [resolvable:$true] %s962_s23 }
  0x4e   : > { %679 = vst [vmem:[%s1324_s8] sm:$0xff] %v669_v5  ;;  %v664_v52 = vrot.slane %v645_v49, 4  ;;  %v358_v55 = vadd.f32 %v357_v47, %v356_v33  ;;  %v362_v56 = vadd.f32 %v1310_v28, %v361_v0  ;;  %918 = vpow2.f32 %v325_v19  ;;  %s964_s27 = scalar_lea.hbm %s963_s23, 44  ;;  %p969_p0 = scmp.lt.s32.totalorder %s963_s23, %s1460_s4 }
  0x4f   : > { %v327_v57 = vmul.f32 1.442695, %v310_v38  ;;  %v284_v58 = vrot.slane %v283_v26, 1  ;;  %v288_v6 = vrot.slane %v1296_v35, 2  ;;  %v414_v11 = vmul.f32 %v915_v32, %v1253_v15  ;;  %v917_v7 = vpop.eup %916  ;;  %p965_p11 = scmp.ne.s32.totalorder %s963_s23, %s964_s27  ;;  %p970_p1 = scmp.lt.s32.totalorder %s968_s30, %s964_s27 }
  0x50   : > { %v670_v61 = vsel %vm668_vm1, %v644_v48, %v664_v52  ;;  %v353_v63 = vrot.slane %v352_v53, 1  ;;  %v359_v3 = vrot.slane %v358_v55, 1  ;;  %v363_v54 = vrot.slane %v362_v56, 2  ;;  %v616_v45 = vld.sshfl [vmem:[#allocation1] sm:$0xff pattern:$0x75316420] }
  0x51   : > { %680 = vst [vmem:[%s1324_s8 + $0x8] sm:$0xff] %v670_v61  ;;  %v618_v29 = vld.sshfl [vmem:[#allocation1 + $0x10] sm:$0xff pattern:$0x75316420]  ;;  %920 = vpow2.f32 %v327_v57  ;;  %v285_v8 = vmax.f32 %v283_v26, %v284_v58  ;;  %v289_v9 = vmax.f32 %v1296_v35, %v288_v6  ;;  %v415_v15 = vmul.f32 %v917_v7, %v1263_v21  ;;  %p966_p12 = pnand %p965_p11, %p1107_p5  ;;  %p971_p2 = por %p970_p1, %p969_p0 }
  0x52   : > { %v629_v1 = vrot.slane %v618_v29, 6  ;;  %425 = vst [vmem:[%s1350_s9] sm:$0xff] %v414_v11  ;;  %v354_v59 = vadd.f32 %v353_v63, %v352_v53  ;;  %v360_v36 = vadd.f32 %v359_v3, %v358_v55  ;;  %v364_v17 = vadd.f32 %v363_v54, %v362_v56  ;;  %v617_v27 = vld.sshfl [vmem:[#allocation1 + $0x8] sm:$0xff pattern:$0x75316420] }
  0x53   : > { %v311_v2 = vsub.f32 %v1251_v13, %v285_v8  ;;  %v290_v41 = vrot.slane %v289_v9, 1  ;;  %v292_v35 = vrot.slane %v1341_v4, 4  ;;  %426 = vst [vmem:[%s1350_s9 + $0x8] sm:$0xff] %v415_v15  ;;  %v298_v25 = vrot.slane %v1346_v10, 4  ;;  %p967_p13 = pneg %p966_p12 }
  0x54   : > { %v652_v22 = vsel %vm641_vm0, %v1285_v46, %v629_v1  ;;  %922 = vrcp.f32 %v354_v59  ;;  %v1360_v14 = vpop.eup %918  ;;  %v365_v21 = vrot.slane %v364_v17, 1  ;;  %v628_v52 = vrot.slane %v617_v27, 6 }
  0x55   : > { %684 = vst [vmem:[%s1324_s8 + $0x28] sm:$0xf] %v652_v22  ;;  %924 = vrcp.f32 %v360_v36  ;;  %v329_v26 = vmul.f32 1.442695, %v311_v2  ;;  %v291_v37 = vmax.f32 %v289_v9, %v290_v41  ;;  %v367_v13 = vrot.slane %v1360_v14, 4  ;;  %p972_p3 = pnand %p971_p2, %p967_p13 }
  0x56   : > { %v293_v50 = vmax.f32 %v1341_v4, %v292_v35  ;;  %v299_v16 = vmax.f32 %v1346_v10, %v298_v25  ;;  %v366_v46 = vadd.f32 %v365_v21, %v364_v17  ;;  %v651_v58 = vsel %vm641_vm0, %v1281_v39, %v628_v52 }
  0x57   : > { %v1366_v18 = vpop.eup %920  ;;  %926 = vpow2.f32 %v329_v26  ;;  %v312_v30 = vsub.f32 %v1277_v24, %v291_v37  ;;  %v368_v31 = vadd.f32 %v1360_v14, %v367_v13  ;;  %v667_v8 = vrot.slane %v651_v58, 4 }
  0x58   : > { %v373_v12 = vrot.slane %v1366_v18, 4  ;;  %v294_v33 = vrot.slane %v293_v50, 2  ;;  %v300_v38 = vrot.slane %v299_v16, 2  ;;  %928 = vrcp.f32 %v366_v46 }
  0x59   : > { %v331_v40 = vmul.f32 1.442695, %v312_v30  ;;  %v369_v23 = vrot.slane %v368_v31, 2 }
  0x5a   : > { %v923_v42 = vpop.eup %922  ;;  %v374_v43 = vadd.f32 %v1366_v18, %v373_v12  ;;  %v295_v60 = vmax.f32 %v293_v50, %v294_v33  ;;  %v301_v20 = vmax.f32 %v299_v16, %v300_v38 }
  0x5b   : > { %v925_v44 = vpop.eup %924  ;;  %v416_v24 = vmul.f32 %v923_v42, %v1292_v62  ;;  %930 = vpow2.f32 %v331_v40  ;;  %v370_v0 = vadd.f32 %v369_v23, %v368_v31  ;;  %v627_v62 = vrot.slane %v616_v45, 6 }
  0x5c   : > { %v417_v47 = vmul.f32 %v925_v44, %v1298_v51  ;;  %v375_v5 = vrot.slane %v374_v43, 2  ;;  %v296_v48 = vrot.slane %v295_v60, 1  ;;  %v302_v19 = vrot.slane %v301_v20, 1 }
  0x5d   : > { %v1380_v49 = vpop.eup %926  ;;  %427 = vst [vmem:[%s1350_s9 + $0x10] sm:$0xff] %v416_v24  ;;  %v371_v53 = vrot.slane %v370_v0, 1  ;;  %v650_v54 = vsel %vm641_vm0, %v1279_v34, %v627_v62 }
  0x5e   : > { %428 = vst [vmem:[%s1350_s9 + $0x18] sm:$0xff] %v417_v47  ;;  %v376_v55 = vadd.f32 %v375_v5, %v374_v43  ;;  %v379_v51 = vrot.slane %v1380_v49, 4  ;;  %v297_v56 = vmax.f32 %v295_v60, %v296_v48  ;;  %v929_v32 = vpop.eup %928  ;;  %v303_v57 = vmax.f32 %v301_v20, %v302_v19 }
  0x5f   : > { %v418_v6 = vmul.f32 %v929_v32, %v1310_v28  ;;  %v372_v61 = vadd.f32 %v371_v53, %v370_v0 }
  0x60   : > { %v377_v11 = vrot.slane %v376_v55, 1  ;;  %v380_v63 = vadd.f32 %v1380_v49, %v379_v51  ;;  %v313_v7 = vsub.f32 %v1341_v4, %v297_v56  ;;  %v314_v29 = vsub.f32 %v1346_v10, %v303_v57 }
  0x61   : > { %v1391_v3 = vpop.eup %930  ;;  %429 = vst [vmem:[%s1350_s9 + $0x20] sm:$0xff] %v418_v6  ;;  %932 = vrcp.f32 %v372_v61  ;;  %v673_v4 = vsel %vm668_vm1, %v650_v54, %v667_v8 }
  0x62   : > { %v378_v39 = vadd.f32 %v377_v11, %v376_v55  ;;  %v381_v28 = vrot.slane %v380_v63, 2  ;;  %v385_v9 = vrot.slane %v1391_v3, 4  ;;  %v333_v1 = vmul.f32 1.442695, %v313_v7  ;;  %683 = vst [vmem:[%s1324_s8 + $0x20] sm:$0xff] %v673_v4 }
  0x63   : > { %v335_v15 = vmul.f32 1.442695, %v314_v29 }
  0x64   : > { %934 = vrcp.f32 %v378_v39  ;;  %v382_v10 = vadd.f32 %v381_v28, %v380_v63  ;;  %v386_v59 = vadd.f32 %v1391_v3, %v385_v9 }
  0x65   : > { %936 = vpow2.f32 %v333_v1 }
  0x66   : > { %975 = shalt.err (!%p972_p3)
}
  0x67   : > { %849 = dma.vmem_to_hbm [thread:$0]  (%p1107_p5), %s720_s14, 704, %s722_s20, %s691_s22   ;;  %v383_v34 = vrot.slane %v382_v10, 1  ;;  %v387_v36 = vrot.slane %v386_v59, 2  ;;  %938 = vpow2.f32 %v335_v15  ;;  %v933_v17 = vpop.eup %932 }
  0x68   : > { %v419_v35 = vmul.f32 %v933_v17, %v1360_v14  ;;  %s846_s8 = smul.u32 88, %s1090_s19  ;;  %s704_s13 = sshll.u32 %s1350_s9, 4  ;;  %s705_s13 = int_to_ptr.vmem [resolvable:$true] %s704_s13 }
  0x69   : > { %v384_v2 = vadd.f32 %v383_v34, %v382_v10  ;;  %v388_v41 = vadd.f32 %v387_v36, %v386_v59  ;;  %s686_s19 = scalar_lea.sflag [#allocation3], %s1272_s5  ;;  %s996_s28 = scalar_lea.hbm %s1459_s3, 176 }
  0x6a   : > { %v935_v22 = vpop.eup %934  ;;  %430 = vst [vmem:[%s1350_s9 + $0x28] sm:$0xff] %v419_v35  ;;  %s702_s12 = scalar_lea.hbm %s1459_s3, %s846_s8 }
  0x6b   : > { %940 = vrcp.f32 %v384_v2  ;;  %v389_v25 = vrot.slane %v388_v41, 1  ;;  %v937_v21 = vpop.eup %936  ;;  %v420_v26 = vmul.f32 %v935_v22, %v1366_v18  ;;  %s706_s14 = sshll.u32 %s702_s12, 4  ;;  %s707_s14 = int_to_ptr.hbm [resolvable:$true] %s706_s14 }
  0x6c   : > { %v391_v50 = vrot.slane %v937_v21, 4  ;;  %s990_s20 = sshra.s32 %s707_s14, 4  ;;  %s991_s20 = int_to_ptr.hbm [resolvable:$true] %s990_s20 }
  0x6d   : > { %v939_v37 = vpop.eup %938  ;;  %v390_v13 = vadd.f32 %v389_v25, %v388_v41  ;;  %431 = vst [vmem:[%s1350_s9 + $0x30] sm:$0xff] %v420_v26  ;;  %s992_s22 = scalar_lea.hbm %s991_s20, 88  ;;  %p997_p9 = scmp.lt.s32.totalorder %s991_s20, %s1459_s3 }
  0x6e   : > { %v397_v16 = vrot.slane %v939_v37, 4  ;;  %v392_v46 = vadd.f32 %v937_v21, %v391_v50  ;;  %p993_p4 = scmp.ne.s32.totalorder %s991_s20, %s992_s22  ;;  %p998_p10 = scmp.lt.s32.totalorder %s996_s28, %s992_s22 }
  0x6f   : > { %942 = vrcp.f32 %v390_v13 }
  0x70   : > { %v398_v30 = vadd.f32 %v939_v37, %v397_v16  ;;  %v393_v14 = vrot.slane %v392_v46, 2  ;;  %p994_p7 = pnand %p993_p4, %p1107_p5  ;;  %p999_p11 = por %p998_p10, %p997_p9 }
  0x71   : > { %v941_v31 = vpop.eup %940 }
  0x72   : > { %v421_v12 = vmul.f32 %v941_v31, %v1380_v49  ;;  %v399_v33 = vrot.slane %v398_v30, 2  ;;  %v394_v38 = vadd.f32 %v393_v14, %v392_v46  ;;  %p995_p8 = pneg %p994_p7 }
  0x74   : > { %432 = vst [vmem:[%s1350_s9 + $0x38] sm:$0xff] %v421_v12  ;;  %v400_v40 = vadd.f32 %v399_v33, %v398_v30  ;;  %v395_v42 = vrot.slane %v394_v38, 1  ;;  %p1000_p12 = pnand %p999_p11, %p995_p8 }
  0x75   : > { %v943_v18 = vpop.eup %942 }
  0x76   : > { %v422_v23 = vmul.f32 %v943_v18, %v1391_v3  ;;  %v401_v43 = vrot.slane %v400_v40, 1  ;;  %v396_v60 = vadd.f32 %v395_v42, %v394_v38 }
  0x78   : > { %433 = vst [vmem:[%s1350_s9 + $0x40] sm:$0xff] %v422_v23  ;;  %v402_v20 = vadd.f32 %v401_v43, %v400_v40  ;;  %944 = vrcp.f32 %v396_v60 }
  0x7a   : > { %946 = vrcp.f32 %v402_v20 }
  0x7e   : > { %v945_v44 = vpop.eup %944 }
  0x7f   : > { %v423_v45 = vmul.f32 %v945_v44, %v937_v21 }
  0x80   : > { %v947_v24 = vpop.eup %946 }
  0x81   : > { %v424_v27 = vmul.f32 %v947_v24, %v939_v37  ;;  %434 = vst [vmem:[%s1350_s9 + $0x48] sm:$0xff] %v423_v45 }
  0x83   : > { %435 = vst [vmem:[%s1350_s9 + $0x50] sm:$0xff] %v424_v27 }
  0x84   : > { %1003 = shalt.err (!%p1000_p12)
}
  0x85   : > { %848 = dma.vmem_to_hbm [thread:$0]  (%p1107_p5), %s705_s13, 1408, %s707_s14, %s686_s19  }
  0x86 PF: > { %p859_p13 = scmp.ge.s32.totalorder %s1042_s18, 2  ;;  %s733_s5 = sand.u32 1, %s1030_s15  }
  0x87   : > { %s734_s9 = scalar_lea.sflag [#allocation3], %s733_s5 }
  0x88   : > { %p853_p0 = pnand %p859_p13, %p1111_p6 }
  0x8a   : > { %p854_p1 = pneg %p853_p0 }
  0x8c   : > { %1021 = dma.done.wait (%p854_p1), %s734_s9, 1408  }
  0x8d   : > { %1023 = vsyncadd (%p854_p1), %s734_s9, 4294965888  ;;  %s744_s6 = scalar_lea.sflag [#allocation5], %s733_s5 }
  0x8e   : > { %1025 = dma.done.wait (%p854_p1), %s744_s6, 704  }
  0x8f   : > { %1027 = vsyncadd (%p854_p1), %s744_s6, 4294966592  ;;  %p18_p5 = scmp.ge.s32.totalorder %s1094_s21, 4   ;;  %s1463_s15 = smov %s1034_s16 }
  0x90   : > { %s1464_s16 = smov %s1038_s17  ;;  %s1465_s17 = smov %s1105_s24 }
  0x91   : > { %s1466_s18 = smov %s1094_s21  ;;  %20 = sbr.rel (!%p18_p5) target bundleno = 5 (0x5), region = 93 }
  0x96   :  { %750 = vsyncpa [#allocation3], 1 }
  0x97   :  { %752 = vsyncpa [#allocation3 + $0x1], 1 }
  0x98   :  { %753 = vsyncpa [#allocation5], 1 }
  0x99   :  { %755 = vsyncpa [#allocation5 + $0x1], 1 }

</bundles_post_ra>
